<compile_context>
chip_gen: v7x
topology: tpu7x:2x2x1
jax: 0.10.0
libtpu: 0.0.40
codegen_flags: <defaults>
</compile_context>

<pallas_src>
import math
import functools

import jax
import jax.numpy as jnp
from jax import lax
from jax.experimental import pallas as pl
from jax.experimental.pallas import tpu as pltpu


# ----------------------------- helpers ---------------------------------------

def _round_up(x, m):
    return ((x + m - 1) // m) * m


def _gelu_exact(x):
    # PyTorch nn.GELU() default = exact erf GELU (computed in f32 in-kernel).
    return 0.5 * x * (1.0 + lax.erf(x * (1.0 / math.sqrt(2.0))))


def _pad_rows(x2d, m_pad):
    m = x2d.shape[0]
    if m == m_pad:
        return x2d
    return jnp.pad(x2d, ((0, m_pad - m), (0, 0)))


def _choose_tm(M, desired=256):
    """Token tile: multiple of 8 that divides the 8-padded row count (<=7 pad rows),
    preferring >=2 blocks so v7x's two TensorCores both get work."""
    Mp = _round_up(max(M, 1), 8)
    cands = [t for t in range(8, min(desired, Mp) + 1, 8) if Mp % t == 0]
    two_plus = [t for t in cands if Mp // t >= 2]
    tm = max(two_plus) if two_plus else (max(cands) if cands else 8)
    return tm, Mp


@functools.lru_cache(maxsize=None)
def _device_vmem_bytes():
    try:
        info = pltpu.get_tpu_info()
        return int(getattr(info, "vmem_capacity_bytes", 64 << 20))
    except Exception:
        return 64 << 20          # conservative: v7x per-core VMEM


def _vmem_limit(est_bytes):
    # Cap scoped VMEM at 75% of the device's physical VMEM (v7x = 64 MiB).
    cap = int(0.75 * _device_vmem_bytes())
    return int(min(max(int(est_bytes), 16 << 20), cap))


# ----------------------------- linear (y = x @ W + b) ------------------------

def _linear_kernel(x_ref, w_ref, b_ref, o_ref):
    y = jnp.dot(x_ref[...], w_ref[...], preferred_element_type=jnp.float32)
    o_ref[...] = (y + b_ref[...].astype(jnp.float32)).astype(o_ref.dtype)


def linear(x2d, w, b, *, desired_tm=256):
    M, Din = x2d.shape
    Dout = w.shape[1]
    tm, Mp = _choose_tm(M, desired_tm)
    xp = _pad_rows(x2d, Mp)
    item = jnp.dtype(x2d.dtype).itemsize

    # N-tile the weight so its double-buffered copy stays within a modest budget
    # (v7x 64 MiB safe); for small layers tn == Dout (weight fully resident).
    budget = 12 << 20
    tn = Dout
    if Dout % 128 == 0:
        while tn > 128 and 2 * Din * tn * item > budget:
            cand = [t for t in range(128, tn, 128) if Dout % t == 0]
            if not cand:
                break
            tn = max(cand)
    n_blocks = Dout // tn

    est = 2 * (tm * Din + Din * tn + tn + tm * tn) * item + (4 << 20)

    out = pl.pallas_call(
        _linear_kernel,
        out_shape=jax.ShapeDtypeStruct((Mp, Dout), x2d.dtype),
        grid_spec=pltpu.PrefetchScalarGridSpec(
            num_scalar_prefetch=0,
            grid=(Mp // tm, n_blocks),
            in_specs=[
                pl.BlockSpec((tm, Din), lambda i, n: (i, 0)),
                pl.BlockSpec((Din, tn), lambda i, n: (0, n)),
                pl.BlockSpec((1, tn), lambda i, n: (0, n)),
            ],
            out_specs=pl.BlockSpec((tm, tn), lambda i, n: (i, n)),
        ),
        compiler_params=pltpu.CompilerParams(
            dimension_semantics=("parallel", "parallel"),
            vmem_limit_bytes=_vmem_limit(est)),
    )(xp, w, b.reshape(1, Dout))
    return out[:M]


# ----------------------------- out-projection + LayerNorm1 -------------------

def _outproj_ln_kernel(x_ref, w_ref, b_ref, g_ref, beta_ref, o_ref, *, eps):
    y = jnp.dot(x_ref[...], w_ref[...], preferred_element_type=jnp.float32)
    y = y + b_ref[...].astype(jnp.float32)
    # LayerNorm1 fused into the matmul epilogue (f32 statistics).
    mean = jnp.mean(y, axis=-1, keepdims=True)
    c = y - mean
    var = jnp.mean(c * c, axis=-1, keepdims=True)
    yn = c * lax.rsqrt(var + eps)
    o_ref[...] = (yn * g_ref[...].astype(jnp.float32)
                  + beta_ref[...].astype(jnp.float32)).astype(o_ref.dtype)


def outproj_layernorm(x2d, w, b, gamma, beta, *, eps=1e-5, desired_tm=256):
    M, Din = x2d.shape
    Dout = w.shape[1]
    tm, Mp = _choose_tm(M, desired_tm)
    xp = _pad_rows(x2d, Mp)
    item = jnp.dtype(x2d.dtype).itemsize
    est = 2 * (tm * Din + Din * Dout + 3 * Dout + tm * Dout) * item + (4 << 20)

    # TODO(synk): for very large d_model the (Din, Dout) weight should be K-tiled
    # with an f32 accumulator (LayerNorm needs full output rows, so no N-tiling).
    out = pl.pallas_call(
        functools.partial(_outproj_ln_kernel, eps=eps),
        out_shape=jax.ShapeDtypeStruct((Mp, Dout), x2d.dtype),
        grid_spec=pltpu.PrefetchScalarGridSpec(
            num_scalar_prefetch=0,
            grid=(Mp // tm,),
            in_specs=[
                pl.BlockSpec((tm, Din), lambda i: (i, 0)),
                pl.BlockSpec((Din, Dout), lambda i: (0, 0)),
                pl.BlockSpec((1, Dout), lambda i: (0, 0)),
                pl.BlockSpec((1, Dout), lambda i: (0, 0)),
                pl.BlockSpec((1, Dout), lambda i: (0, 0)),
            ],
            out_specs=pl.BlockSpec((tm, Dout), lambda i: (i, 0)),
        ),
        compiler_params=pltpu.CompilerParams(
            dimension_semantics=("parallel",),
            vmem_limit_bytes=_vmem_limit(est)),
    )(xp, w, b.reshape(1, Dout), gamma.reshape(1, Dout), beta.reshape(1, Dout))
    return out[:M]


# ----------------------------- multi-head self-attention ---------------------

def _mhsa_kernel(qkv_ref, o_ref, *, n_heads, d_head, scale):
    # qkv_ref block: (1, S, 3*D) packed [q | k | v]; head h occupies columns
    # h*d_head:(h+1)*d_head within each D-wide section. All heads of one batch are
    # processed per grid step so the output store is lane-dense (S, D).
    D = n_heads * d_head
    outs = []
    for h in range(n_heads):
        lo = h * d_head
        hi = (h + 1) * d_head
        q = qkv_ref[0, :, lo:hi] * scale                 # (S, Dh), native dtype
        k = qkv_ref[0, :, D + lo:D + hi]                 # (S, Dh)
        v = qkv_ref[0, :, 2 * D + lo:2 * D + hi]         # (S, Dh)
        # Contract last dims directly (no explicit k.T materialization).
        s = lax.dot_general(q, k, (((1,), (1,)), ((), ())),
                            preferred_element_type=jnp.float32)   # (S, S) f32
        m = jnp.max(s, axis=-1, keepdims=True)
        p = jnp.exp(s - m)
        l = jnp.sum(p, axis=-1, keepdims=True)
        o = jnp.dot(p.astype(v.dtype), v, preferred_element_type=jnp.float32)
        # Deferred softmax normalization: one (S, Dh) scale instead of (S, S).
        # (pl.reciprocal(l, approx=True) is available when bf16-level tolerance is ok.)
        outs.append(o * pl.reciprocal(l, approx=False))
    o_ref[0] = jnp.concatenate(outs, axis=-1).astype(o_ref.dtype)


def mha_self_attention_ln(x, w_qkv, b_qkv, w_o, b_o, ln1_g, ln1_b, n_heads):
    """sa(x,x,x) -> out-projection with LayerNorm1 fused. Returns (B*S, D)."""
    B, S, D = x.shape
    Dh = D // n_heads
    M = B * S

    # Packed QKV projection; reshape to (B, S, 3D) is a free contiguous view.
    qkv = linear(x.reshape(M, D), w_qkv, b_qkv).reshape(B, S, 3 * D)

    scale = 1.0 / math.sqrt(Dh)
    item = jnp.dtype(x.dtype).itemsize
    est = 2 * (S * 3 * D + S * D) * item + S * S * 4 + (4 << 20)

    # TODO(synk): whole-sequence (S,S) scores per head in VMEM; switch to a
    # flash-style KV-tiled online-softmax kernel for long sequences (v7x first).
    attn = pl.pallas_call(
        functools.partial(_mhsa_kernel, n_heads=n_heads, d_head=Dh, scale=scale),
        out_shape=jax.ShapeDtypeStruct((B, S, D), x.dtype),
        grid_spec=pltpu.PrefetchScalarGridSpec(
            num_scalar_prefetch=0,
            grid=(B,),
            in_specs=[pl.BlockSpec((1, S, 3 * D), lambda b: (b, 0, 0))],
            out_specs=pl.BlockSpec((1, S, D), lambda b: (b, 0, 0)),
        ),
        compiler_params=pltpu.CompilerParams(
            dimension_semantics=("parallel",),
            vmem_limit_bytes=_vmem_limit(est)),
    )(qkv)

    # Out-projection with LayerNorm1 fused into the epilogue.
    return outproj_layernorm(attn.reshape(M, D), w_o, b_o, ln1_g, ln1_b)


# ----------------------------- MLP + residual + LayerNorm2, K-tiled ----------

def _mlp_res_ln_kernel(x_ref, w1_ref, b1_ref, w2_ref, b2_ref, g_ref, beta_ref,
                       o_ref, acc_ref, *, eps):
    # grid = (tokens, hidden_k); hidden axis is the reduction (last, "arbitrary").
    k = pl.program_id(1)

    @pl.when(k == 0)
    def _():
        acc_ref[...] = jnp.zeros_like(acc_ref)

    # Operands stay in their native dtype (bf16-friendly); f32 accumulation.
    h = jnp.dot(x_ref[...], w1_ref[...], preferred_element_type=jnp.float32)
    h = _gelu_exact(h + b1_ref[...].astype(jnp.float32))
    acc_ref[...] += jnp.dot(h.astype(w2_ref.dtype), w2_ref[...],
                            preferred_element_type=jnp.float32)

    @pl.when(k == pl.num_programs(1) - 1)
    def _():
        # Residual add + LayerNorm2 fused into the final store.
        z = (acc_ref[...] + b2_ref[...].astype(jnp.float32)
             + x_ref[...].astype(jnp.float32))
        mean = jnp.mean(z, axis=-1, keepdims=True)
        c = z - mean
        var = jnp.mean(c * c, axis=-1, keepdims=True)
        zn = c * lax.rsqrt(var + eps)
        o_ref[...] = (zn * g_ref[...].astype(jnp.float32)
                      + beta_ref[...].astype(jnp.float32)).astype(o_ref.dtype)


def mlp_residual_layernorm(x2d, w1, b1, w2, b2, gamma, beta, *, eps=1e-5,
                           desired_tm=256):
    M, Din = x2d.shape
    Dh = w1.shape[1]
    Dout = w2.shape[1]
    assert Dout == Din, "residual requires d_model == out_features"

    tm, Mp = _choose_tm(M, desired_tm)
    xp = _pad_rows(x2d, Mp)
    item = jnp.dtype(x2d.dtype).itemsize

    # Keep weights fully resident (nk=1) whenever they fit the generation's VMEM
    # budget; otherwise K-tile with the largest 128-multiple divisor of d_ff.
    budget = int(0.6 * _device_vmem_bytes())

    def fits(tk_):
        e = (2 * (tm * Din + Din * tk_ + tk_ + tk_ * Dout + 3 * Dout
                  + tm * Dout) * item + tm * Dout * 4 + (4 << 20))
        return e <= budget

    if fits(Dh):
        tk = Dh
    else:
        divs = [t for t in range(128, Dh, 128) if Dh % t == 0 and fits(t)]
        tk = max(divs) if divs else (128 if Dh % 128 == 0 else Dh)
    nk = Dh // tk

    est = (2 * (tm * Din + Din * tk + tk + tk * Dout + 3 * Dout + tm * Dout) * item
           + tm * Dout * 4 + (4 << 20))

    weight_passes = (Mp // tm) if nk > 1 else 1
    cost = pl.CostEstimate(
        flops=int(2 * Mp * Dh * (Din + Dout)),
        transcendentals=int(Mp * Dh),
        bytes_accessed=int(item * (Mp * Din + Mp * Dout
                                   + weight_passes * (Din * Dh + Dh + Dh * Dout)
                                   + 3 * Dout)),
    )

    out = pl.pallas_call(
        functools.partial(_mlp_res_ln_kernel, eps=eps),
        out_shape=jax.ShapeDtypeStruct((Mp, Dout), x2d.dtype),
        grid_spec=pltpu.PrefetchScalarGridSpec(
            num_scalar_prefetch=0,
            grid=(Mp // tm, nk),
            in_specs=[
                pl.BlockSpec((tm, Din), lambda i, k: (i, 0)),   # x1 tile (resident over k)
                pl.BlockSpec((Din, tk), lambda i, k: (0, k)),   # w1 k-slice
                pl.BlockSpec((1, tk), lambda i, k: (0, k)),     # b1 k-slice
                pl.BlockSpec((tk, Dout), lambda i, k: (k, 0)),  # w2 k-slice
                pl.BlockSpec((1, Dout), lambda i, k: (0, 0)),   # b2
                pl.BlockSpec((1, Dout), lambda i, k: (0, 0)),   # ln2 gamma
                pl.BlockSpec((1, Dout), lambda i, k: (0, 0)),   # ln2 beta
            ],
            out_specs=pl.BlockSpec((tm, Dout), lambda i, k: (i, 0)),
            scratch_shapes=[pltpu.VMEM((tm, Dout), jnp.float32)],
        ),
        compiler_params=pltpu.CompilerParams(
            dimension_semantics=("parallel", "arbitrary"),
            vmem_limit_bytes=_vmem_limit(est)),
        cost_estimate=cost,
    )(xp, w1, b1.reshape(1, Dh), w2, b2.reshape(1, Dout),
      gamma.reshape(1, Dout), beta.reshape(1, Dout))
    return out[:M]


# ----------------------------- EncoderLayer forward --------------------------

@functools.partial(jax.jit, static_argnames=("n_heads",))
def encoder_layer_forward(x, params, *, n_heads):
    """Parallel block_mode, blocks=('sa',), ref_mca=None, gate=None, eval mode."""
    B, S, D = x.shape
    # new_x = 0 + 1 * dropout(sa(x, x, x)) -> identity dropout, g=1 (gate None)
    # x1 = LayerNorm1(new_x)   (fused into out-projection epilogue)
    x1 = mha_self_attention_ln(x, params["w_qkv"], params["b_qkv"],
                               params["w_o"], params["b_o"],
                               params["ln1_g"], params["ln1_b"], n_heads)
    # out = LayerNorm2(x1 + Mlp(x1))   (residual + LN2 fused into MLP final store)
    out = mlp_residual_layernorm(x1, params["w1"], params["b1"],
                                 params["w2"], params["b2"],
                                 params["ln2_g"], params["ln2_b"])
    return out.reshape(B, S, D)


# ----------------------------- pure-JAX reference ----------------------------

def _ref_encoder_layer(x, p, n_heads):
    B, S, D = x.shape
    Dh = D // n_heads
    x2d = x.reshape(B * S, D)

    qkv = x2d @ p["w_qkv"] + p["b_qkv"]
    q, k, v = jnp.split(qkv, 3, axis=-1)

    def heads(t):
        return t.reshape(B, S, n_heads, Dh).transpose(0, 2, 1, 3)

    q, k, v = heads(q), heads(k), heads(v)
    s = jnp.einsum("bhqd,bhkd->bhqk", q, k) / math.sqrt(Dh)
    a = jax.nn.softmax(s, axis=-1)
    o = jnp.einsum("bhqk,bhkd->bhqd", a, v)
    o = o.transpose(0, 2, 1, 3).reshape(B * S, D)
    sa = o @ p["w_o"] + p["b_o"]

    def ln(t, g, b, eps=1e-5):
        mu = t.mean(-1, keepdims=True)
        var = ((t - mu) ** 2).mean(-1, keepdims=True)
        return (t - mu) / jnp.sqrt(var + eps) * g + b

    x1 = ln(sa, p["ln1_g"], p["ln1_b"])
    h = _gelu_exact(x1 @ p["w1"] + p["b1"])
    y = h @ p["w2"] + p["b2"]
    out = ln(x1 + y, p["ln2_g"], p["ln2_b"])
    return out.reshape(B, S, D)


# ----------------------------- demo ------------------------------------------

if __name__ == "__main__":
    key = jax.random.PRNGKey(0)

    B = 2
    seq_len = 64            # h = w = 8
    d_model = 128           # lane-dense feature dims (multiples of 128)
    n_heads = 4
    d_ff = 4 * d_model      # 512

    keys = jax.random.split(key, 10)

    def u(k, shape, fan_in):
        bound = 1.0 / math.sqrt(fan_in)
        return jax.random.uniform(k, shape, minval=-bound, maxval=bound,
                                  dtype=jnp.float32)

    # f32 params for a tight correctness check; the kernels never force operand
    # dtype, so casting params/x to bf16 runs the MXU in bf16 with f32 accumulation.
    params = dict(
        # MultiheadAttention: packed qkv in-projection + out-projection
        # (stored transposed vs torch so kernels do x @ W + b).
        w_qkv=u(keys[0], (d_model, 3 * d_model), d_model),
        b_qkv=u(keys[1], (3 * d_model,), d_model),
        w_o=u(keys[2], (d_model, d_model), d_model),
        b_o=u(keys[3], (d_model,), d_model),
        ln1_g=jnp.ones((d_model,), jnp.float32),
        ln1_b=jnp.zeros((d_model,), jnp.float32),
        # Mlp (ffn)
        w1=u(keys[4], (d_model, d_ff), d_model),
        b1=u(keys[5], (d_ff,), d_model),
        w2=u(keys[6], (d_ff, d_model), d_ff),
        b2=u(keys[7], (d_model,), d_ff),
        ln2_g=jnp.ones((d_model,), jnp.float32),
        ln2_b=jnp.zeros((d_model,), jnp.float32),
    )

    x = jax.random.normal(keys[8], (B, seq_len, d_model), dtype=jnp.float32)

    out = encoder_layer_forward(x, params, n_heads=n_heads)
    jax.block_until_ready(out)

    ref = _ref_encoder_layer(x, params, n_heads)
    max_diff = float(jnp.max(jnp.abs(out - ref)))
    assert out.shape == ref.shape
    assert jnp.allclose(out, ref, atol=2e-3, rtol=2e-3), (
        f"mismatch vs reference, max_abs_diff={max_diff}")

    print("KERNEL_OK")
</pallas_src>

<mosaic_0001>
module attributes {stable_mosaic.version = 11 : i64} {
  func.func @_outproj_ln_kernel(%arg0: i32, %arg1: memref<64x128xf32, #tpu.memory_space<vmem>>, %arg2: memref<128x128xf32, #tpu.memory_space<vmem>>, %arg3: memref<1x128xf32, #tpu.memory_space<vmem>>, %arg4: memref<1x128xf32, #tpu.memory_space<vmem>>, %arg5: memref<1x128xf32, #tpu.memory_space<vmem>>, %arg6: memref<64x128xf32, #tpu.memory_space<vmem>>) attributes {dimension_semantics = [#tpu.dimension_semantics<parallel>], iteration_bounds = array<i64: 2>, scalar_prefetch = 0 : i64, scratch_operands = 0 : i64, tpu.core_type = #tpu.core_type<tc>, window_params = [{transform_indices = @transform_0, window_bounds = array<i64: 64, 128>}, {pipeline_mode = #tpu.pipeline_mode<synchronous>, transform_indices = @transform_1, window_bounds = array<i64: 128, 128>}, {pipeline_mode = #tpu.pipeline_mode<synchronous>, transform_indices = @transform_2, window_bounds = array<i64: 1, 128>}, {pipeline_mode = #tpu.pipeline_mode<synchronous>, transform_indices = @transform_3, window_bounds = array<i64: 1, 128>}, {pipeline_mode = #tpu.pipeline_mode<synchronous>, transform_indices = @transform_4, window_bounds = array<i64: 1, 128>}, {transform_indices = @transform_5, window_bounds = array<i64: 64, 128>}]} {
    %c0 = arith.constant 0 : index
    %c0_0 = arith.constant 0 : index
    %0 = vector.load %arg1[%c0, %c0_0] : memref<64x128xf32, #tpu.memory_space<vmem>>, vector<64x128xf32>
    %c0_1 = arith.constant 0 : index
    %c0_2 = arith.constant 0 : index
    %1 = vector.load %arg2[%c0_1, %c0_2] : memref<128x128xf32, #tpu.memory_space<vmem>>, vector<128x128xf32>
    %cst = arith.constant dense<0.000000e+00> : vector<64x128xf32>
    %2 = tpu.matmul %0, %1, %cst {dimension_numbers = #tpu.dot_dimension_numbers<[1], [0], [0], [1], [0, 0, 1, 1], [], []>} : vector<64x128xf32>, vector<128x128xf32>, vector<64x128xf32> -> vector<64x128xf32>
    %c0_3 = arith.constant 0 : index
    %c0_4 = arith.constant 0 : index
    %3 = vector.load %arg3[%c0_3, %c0_4] : memref<1x128xf32, #tpu.memory_space<vmem>>, vector<1x128xf32>
    %4 = vector.broadcast %3 : vector<1x128xf32> to vector<64x128xf32>
    %5 = arith.addf %2, %4 : vector<64x128xf32>
    %cst_5 = arith.constant dense<0.000000e+00> : vector<64xf32>
    %6 = vector.multi_reduction <add>, %5, %cst_5 [1] : vector<64x128xf32> to vector<64xf32>
    %7 = vector.shape_cast %6 : vector<64xf32> to vector<64x1xf32>
    %cst_6 = arith.constant 1.280000e+02 : f32
    %8 = vector.broadcast %cst_6 : f32 to vector<64x1xf32>
    %9 = arith.divf %7, %8 : vector<64x1xf32>
    %10 = vector.broadcast %9 : vector<64x1xf32> to vector<64x128xf32>
    %11 = arith.subf %5, %10 : vector<64x128xf32>
    %12 = arith.mulf %11, %11 : vector<64x128xf32>
    %cst_7 = arith.constant dense<0.000000e+00> : vector<64xf32>
    %13 = vector.multi_reduction <add>, %12, %cst_7 [1] : vector<64x128xf32> to vector<64xf32>
    %14 = vector.shape_cast %13 : vector<64xf32> to vector<64x1xf32>
    %cst_8 = arith.constant 1.280000e+02 : f32
    %15 = vector.broadcast %cst_8 : f32 to vector<64x1xf32>
    %16 = arith.divf %14, %15 : vector<64x1xf32>
    %cst_9 = arith.constant 9.99999974E-6 : f32
    %17 = vector.broadcast %cst_9 : f32 to vector<64x1xf32>
    %18 = arith.addf %16, %17 : vector<64x1xf32>
    %19 = math.rsqrt %18 : vector<64x1xf32>
    %20 = vector.broadcast %19 : vector<64x1xf32> to vector<64x128xf32>
    %21 = arith.mulf %11, %20 : vector<64x128xf32>
    %c0_10 = arith.constant 0 : index
    %c0_11 = arith.constant 0 : index
    %22 = vector.load %arg4[%c0_10, %c0_11] : memref<1x128xf32, #tpu.memory_space<vmem>>, vector<1x128xf32>
    %23 = vector.broadcast %22 : vector<1x128xf32> to vector<64x128xf32>
    %24 = arith.mulf %21, %23 : vector<64x128xf32>
    %c0_12 = arith.constant 0 : index
    %c0_13 = arith.constant 0 : index
    %25 = vector.load %arg5[%c0_12, %c0_13] : memref<1x128xf32, #tpu.memory_space<vmem>>, vector<1x128xf32>
    %26 = vector.broadcast %25 : vector<1x128xf32> to vector<64x128xf32>
    %27 = arith.addf %24, %26 : vector<64x128xf32>
    %c0_14 = arith.constant 0 : index
    %c0_15 = arith.constant 0 : index
    %28 = vector.load %arg6[%c0_14, %c0_15] : memref<64x128xf32, #tpu.memory_space<vmem>>, vector<64x128xf32>
    tpu.vector_store %arg6[%c0_14, %c0_15], %27 {strides = array<i32>} : memref<64x128xf32, #tpu.memory_space<vmem>>, vector<64x128xf32>,
    return
  }
  func.func @transform_0(%arg0: i32) -> (i32, i32) {
    %c0_i32 = arith.constant 0 : i32
    %c0_i32_0 = arith.constant 0 : i32
    return %arg0, %c0_i32 : i32, i32
  }
  func.func @transform_1(%arg0: i32) -> (i32, i32) {
    %c0_i32 = arith.constant 0 : i32
    %c0_i32_0 = arith.constant 0 : i32
    %c0_i32_1 = arith.constant 0 : i32
    return %c0_i32, %c0_i32_0 : i32, i32
  }
  func.func @transform_2(%arg0: i32) -> (i32, i32) {
    %c0_i32 = arith.constant 0 : i32
    %c0_i32_0 = arith.constant 0 : i32
    %c0_i32_1 = arith.constant 0 : i32
    return %c0_i32, %c0_i32_0 : i32, i32
  }
  func.func @transform_3(%arg0: i32) -> (i32, i32) {
    %c0_i32 = arith.constant 0 : i32
    %c0_i32_0 = arith.constant 0 : i32
    %c0_i32_1 = arith.constant 0 : i32
    return %c0_i32, %c0_i32_0 : i32, i32
  }
  func.func @transform_4(%arg0: i32) -> (i32, i32) {
    %c0_i32 = arith.constant 0 : i32
    %c0_i32_0 = arith.constant 0 : i32
    %c0_i32_1 = arith.constant 0 : i32
    return %c0_i32, %c0_i32_0 : i32, i32
  }
  func.func @transform_5(%arg0: i32) -> (i32, i32) {
    %c0_i32 = arith.constant 0 : i32
    %c0_i32_0 = arith.constant 0 : i32
    return %arg0, %c0_i32 : i32, i32
  }
}

module attributes {stable_mosaic.version = 11 : i64} {
  func.func @_linear_kernel(%arg0: i32, %arg1: i32, %arg2: memref<64x128xf32, #tpu.memory_space<vmem>>, %arg3: memref<128x384xf32, #tpu.memory_space<vmem>>, %arg4: memref<1x384xf32, #tpu.memory_space<vmem>>, %arg5: memref<64x384xf32, #tpu.memory_space<vmem>>) attributes {dimension_semantics = [#tpu.dimension_semantics<parallel>, #tpu.dimension_semantics<parallel>], iteration_bounds = array<i64: 2, 1>, scalar_prefetch = 0 : i64, scratch_operands = 0 : i64, tpu.core_type = #tpu.core_type<tc>, window_params = [{transform_indices = @transform_0, window_bounds = array<i64: 64, 128>}, {transform_indices = @transform_1, window_bounds = array<i64: 128, 384>}, {transform_indices = @transform_2, window_bounds = array<i64: 1, 384>}, {transform_indices = @transform_3, window_bounds = array<i64: 64, 384>}]} {
    %c0 = arith.constant 0 : index
    %c0_0 = arith.constant 0 : index
    %0 = vector.load %arg2[%c0, %c0_0] : memref<64x128xf32, #tpu.memory_space<vmem>>, vector<64x128xf32>
    %c0_1 = arith.constant 0 : index
    %c0_2 = arith.constant 0 : index
    %1 = vector.load %arg3[%c0_1, %c0_2] : memref<128x384xf32, #tpu.memory_space<vmem>>, vector<128x384xf32>
    %cst = arith.constant dense<0.000000e+00> : vector<64x384xf32>
    %2 = tpu.matmul %0, %1, %cst {dimension_numbers = #tpu.dot_dimension_numbers<[1], [0], [0], [1], [0, 0, 1, 1], [], []>} : vector<64x128xf32>, vector<128x384xf32>, vector<64x384xf32> -> vector<64x384xf32>
    %c0_3 = arith.constant 0 : index
    %c0_4 = arith.constant 0 : index
    %3 = vector.load %arg4[%c0_3, %c0_4] : memref<1x384xf32, #tpu.memory_space<vmem>>, vector<1x384xf32>
    %4 = vector.broadcast %3 : vector<1x384xf32> to vector<64x384xf32>
    %5 = arith.addf %2, %4 : vector<64x384xf32>
    %c0_5 = arith.constant 0 : index
    %c0_6 = arith.constant 0 : index
    %6 = vector.load %arg5[%c0_5, %c0_6] : memref<64x384xf32, #tpu.memory_space<vmem>>, vector<64x384xf32>
    tpu.vector_store %arg5[%c0_5, %c0_6], %5 {strides = array<i32>} : memref<64x384xf32, #tpu.memory_space<vmem>>, vector<64x384xf32>,
    return
  }
  func.func @transform_0(%arg0: i32, %arg1: i32) -> (i32, i32) {
    %c0_i32 = arith.constant 0 : i32
    %c0_i32_0 = arith.constant 0 : i32
    return %arg0, %c0_i32 : i32, i32
  }
  func.func @transform_1(%arg0: i32, %arg1: i32) -> (i32, i32) {
    %c0_i32 = arith.constant 0 : i32
    %c0_i32_0 = arith.constant 0 : i32
    return %c0_i32, %arg1 : i32, i32
  }
  func.func @transform_2(%arg0: i32, %arg1: i32) -> (i32, i32) {
    %c0_i32 = arith.constant 0 : i32
    %c0_i32_0 = arith.constant 0 : i32
    return %c0_i32, %arg1 : i32, i32
  }
  func.func @transform_3(%arg0: i32, %arg1: i32) -> (i32, i32) {
    %c0_i32 = arith.constant 0 : i32
    return %arg0, %arg1 : i32, i32
  }
}

module attributes {stable_mosaic.version = 11 : i64} {
  func.func @_mhsa_kernel(%arg0: i32, %arg1: memref<1x64x384xf32, #tpu.memory_space<vmem>>, %arg2: memref<1x64x128xf32, #tpu.memory_space<vmem>>) attributes {dimension_semantics = [#tpu.dimension_semantics<parallel>], iteration_bounds = array<i64: 2>, scalar_prefetch = 0 : i64, scratch_operands = 0 : i64, tpu.core_type = #tpu.core_type<tc>, window_params = [{transform_indices = @transform_0, window_bounds = array<i64: 1, 64, 384>}, {transform_indices = @transform_1, window_bounds = array<i64: 1, 64, 128>}]} {
    %c0 = arith.constant 0 : index
    %c0_0 = arith.constant 0 : index
    %c0_1 = arith.constant 0 : index
    %0 = vector.load %arg1[%c0, %c0_0, %c0_1] : memref<1x64x384xf32, #tpu.memory_space<vmem>>, vector<1x64x32xf32>
    %1 = vector.shape_cast %0 : vector<1x64x32xf32> to vector<64x32xf32>
    %cst = arith.constant 0.176776692 : f32
    %2 = vector.broadcast %cst : f32 to vector<64x32xf32>
    %3 = arith.mulf %1, %2 : vector<64x32xf32>
    %c0_2 = arith.constant 0 : index
    %c0_3 = arith.constant 0 : index
    %c128 = arith.constant 128 : index
    %4 = vector.load %arg1[%c0_2, %c0_3, %c128] : memref<1x64x384xf32, #tpu.memory_space<vmem>>, vector<1x64x32xf32>
    %5 = vector.shape_cast %4 : vector<1x64x32xf32> to vector<64x32xf32>
    %c0_4 = arith.constant 0 : index
    %c0_5 = arith.constant 0 : index
    %c256 = arith.constant 256 : index
    %6 = vector.load %arg1[%c0_4, %c0_5, %c256] : memref<1x64x384xf32, #tpu.memory_space<vmem>>, vector<1x64x32xf32>
    %7 = vector.shape_cast %6 : vector<1x64x32xf32> to vector<64x32xf32>
    %cst_6 = arith.constant dense<0.000000e+00> : vector<64x64xf32>
    %8 = tpu.matmul %3, %5, %cst_6 {dimension_numbers = #tpu.dot_dimension_numbers<[1], [1], [0], [0], [0, 0, 1, 0], [], []>} : vector<64x32xf32>, vector<64x32xf32>, vector<64x64xf32> -> vector<64x64xf32>
    %cst_7 = arith.constant dense<0xFF800000> : vector<64xf32>
    %9 = vector.multi_reduction <maximumf>, %8, %cst_7 [1] : vector<64x64xf32> to vector<64xf32>
    %10 = vector.shape_cast %9 : vector<64xf32> to vector<64x1xf32>
    %11 = vector.broadcast %10 : vector<64x1xf32> to vector<64x64xf32>
    %12 = arith.subf %8, %11 : vector<64x64xf32>
    %13 = math.exp %12 : vector<64x64xf32>
    %cst_8 = arith.constant dense<0.000000e+00> : vector<64xf32>
    %14 = vector.multi_reduction <add>, %13, %cst_8 [1] : vector<64x64xf32> to vector<64xf32>
    %15 = vector.shape_cast %14 : vector<64xf32> to vector<64x1xf32>
    %cst_9 = arith.constant dense<0.000000e+00> : vector<64x32xf32>
    %16 = tpu.matmul %13, %7, %cst_9 {dimension_numbers = #tpu.dot_dimension_numbers<[1], [0], [0], [1], [0, 0, 1, 1], [], []>} : vector<64x64xf32>, vector<64x32xf32>, vector<64x32xf32> -> vector<64x32xf32>
    %17 = tpu.reciprocal %15 : vector<64x1xf32> -> vector<64x1xf32>
    %18 = vector.broadcast %17 : vector<64x1xf32> to vector<64x32xf32>
    %19 = arith.mulf %16, %18 : vector<64x32xf32>
    %c0_10 = arith.constant 0 : index
    %c0_11 = arith.constant 0 : index
    %c32 = arith.constant 32 : index
    %20 = vector.load %arg1[%c0_10, %c0_11, %c32] : memref<1x64x384xf32, #tpu.memory_space<vmem>>, vector<1x64x32xf32>
    %21 = vector.shape_cast %20 : vector<1x64x32xf32> to vector<64x32xf32>
    %cst_12 = arith.constant 0.176776692 : f32
    %22 = vector.broadcast %cst_12 : f32 to vector<64x32xf32>
    %23 = arith.mulf %21, %22 : vector<64x32xf32>
    %c0_13 = arith.constant 0 : index
    %c0_14 = arith.constant 0 : index
    %c160 = arith.constant 160 : index
    %24 = vector.load %arg1[%c0_13, %c0_14, %c160] : memref<1x64x384xf32, #tpu.memory_space<vmem>>, vector<1x64x32xf32>
    %25 = vector.shape_cast %24 : vector<1x64x32xf32> to vector<64x32xf32>
    %c0_15 = arith.constant 0 : index
    %c0_16 = arith.constant 0 : index
    %c288 = arith.constant 288 : index
    %26 = vector.load %arg1[%c0_15, %c0_16, %c288] : memref<1x64x384xf32, #tpu.memory_space<vmem>>, vector<1x64x32xf32>
    %27 = vector.shape_cast %26 : vector<1x64x32xf32> to vector<64x32xf32>
    %cst_17 = arith.constant dense<0.000000e+00> : vector<64x64xf32>
    %28 = tpu.matmul %23, %25, %cst_17 {dimension_numbers = #tpu.dot_dimension_numbers<[1], [1], [0], [0], [0, 0, 1, 0], [], []>} : vector<64x32xf32>, vector<64x32xf32>, vector<64x64xf32> -> vector<64x64xf32>
    %cst_18 = arith.constant dense<0xFF800000> : vector<64xf32>
    %29 = vector.multi_reduction <maximumf>, %28, %cst_18 [1] : vector<64x64xf32> to vector<64xf32>
    %30 = vector.shape_cast %29 : vector<64xf32> to vector<64x1xf32>
    %31 = vector.broadcast %30 : vector<64x1xf32> to vector<64x64xf32>
    %32 = arith.subf %28, %31 : vector<64x64xf32>
    %33 = math.exp %32 : vector<64x64xf32>
    %cst_19 = arith.constant dense<0.000000e+00> : vector<64xf32>
    %34 = vector.multi_reduction <add>, %33, %cst_19 [1] : vector<64x64xf32> to vector<64xf32>
    %35 = vector.shape_cast %34 : vector<64xf32> to vector<64x1xf32>
    %cst_20 = arith.constant dense<0.000000e+00> : vector<64x32xf32>
    %36 = tpu.matmul %33, %27, %cst_20 {dimension_numbers = #tpu.dot_dimension_numbers<[1], [0], [0], [1], [0, 0, 1, 1], [], []>} : vector<64x64xf32>, vector<64x32xf32>, vector<64x32xf32> -> vector<64x32xf32>
    %37 = tpu.reciprocal %35 : vector<64x1xf32> -> vector<64x1xf32>
    %38 = vector.broadcast %37 : vector<64x1xf32> to vector<64x32xf32>
    %39 = arith.mulf %36, %38 : vector<64x32xf32>
    %c0_21 = arith.constant 0 : index
    %c0_22 = arith.constant 0 : index
    %c64 = arith.constant 64 : index
    %40 = vector.load %arg1[%c0_21, %c0_22, %c64] : memref<1x64x384xf32, #tpu.memory_space<vmem>>, vector<1x64x32xf32>
    %41 = vector.shape_cast %40 : vector<1x64x32xf32> to vector<64x32xf32>
    %cst_23 = arith.constant 0.176776692 : f32
    %42 = vector.broadcast %cst_23 : f32 to vector<64x32xf32>
    %43 = arith.mulf %41, %42 : vector<64x32xf32>
    %c0_24 = arith.constant 0 : index
    %c0_25 = arith.constant 0 : index
    %c192 = arith.constant 192 : index
    %44 = vector.load %arg1[%c0_24, %c0_25, %c192] : memref<1x64x384xf32, #tpu.memory_space<vmem>>, vector<1x64x32xf32>
    %45 = vector.shape_cast %44 : vector<1x64x32xf32> to vector<64x32xf32>
    %c0_26 = arith.constant 0 : index
    %c0_27 = arith.constant 0 : index
    %c320 = arith.constant 320 : index
    %46 = vector.load %arg1[%c0_26, %c0_27, %c320] : memref<1x64x384xf32, #tpu.memory_space<vmem>>, vector<1x64x32xf32>
    %47 = vector.shape_cast %46 : vector<1x64x32xf32> to vector<64x32xf32>
    %cst_28 = arith.constant dense<0.000000e+00> : vector<64x64xf32>
    %48 = tpu.matmul %43, %45, %cst_28 {dimension_numbers = #tpu.dot_dimension_numbers<[1], [1], [0], [0], [0, 0, 1, 0], [], []>} : vector<64x32xf32>, vector<64x32xf32>, vector<64x64xf32> -> vector<64x64xf32>
    %cst_29 = arith.constant dense<0xFF800000> : vector<64xf32>
    %49 = vector.multi_reduction <maximumf>, %48, %cst_29 [1] : vector<64x64xf32> to vector<64xf32>
    %50 = vector.shape_cast %49 : vector<64xf32> to vector<64x1xf32>
    %51 = vector.broadcast %50 : vector<64x1xf32> to vector<64x64xf32>
    %52 = arith.subf %48, %51 : vector<64x64xf32>
    %53 = math.exp %52 : vector<64x64xf32>
    %cst_30 = arith.constant dense<0.000000e+00> : vector<64xf32>
    %54 = vector.multi_reduction <add>, %53, %cst_30 [1] : vector<64x64xf32> to vector<64xf32>
    %55 = vector.shape_cast %54 : vector<64xf32> to vector<64x1xf32>
    %cst_31 = arith.constant dense<0.000000e+00> : vector<64x32xf32>
    %56 = tpu.matmul %53, %47, %cst_31 {dimension_numbers = #tpu.dot_dimension_numbers<[1], [0], [0], [1], [0, 0, 1, 1], [], []>} : vector<64x64xf32>, vector<64x32xf32>, vector<64x32xf32> -> vector<64x32xf32>
    %57 = tpu.reciprocal %55 : vector<64x1xf32> -> vector<64x1xf32>
    %58 = vector.broadcast %57 : vector<64x1xf32> to vector<64x32xf32>
    %59 = arith.mulf %56, %58 : vector<64x32xf32>
    %c0_32 = arith.constant 0 : index
    %c0_33 = arith.constant 0 : index
    %c96 = arith.constant 96 : index
    %60 = vector.load %arg1[%c0_32, %c0_33, %c96] : memref<1x64x384xf32, #tpu.memory_space<vmem>>, vector<1x64x32xf32>
    %61 = vector.shape_cast %60 : vector<1x64x32xf32> to vector<64x32xf32>
    %cst_34 = arith.constant 0.176776692 : f32
    %62 = vector.broadcast %cst_34 : f32 to vector<64x32xf32>
    %63 = arith.mulf %61, %62 : vector<64x32xf32>
    %c0_35 = arith.constant 0 : index
    %c0_36 = arith.constant 0 : index
    %c224 = arith.constant 224 : index
    %64 = vector.load %arg1[%c0_35, %c0_36, %c224] : memref<1x64x384xf32, #tpu.memory_space<vmem>>, vector<1x64x32xf32>
    %65 = vector.shape_cast %64 : vector<1x64x32xf32> to vector<64x32xf32>
    %c0_37 = arith.constant 0 : index
    %c0_38 = arith.constant 0 : index
    %c352 = arith.constant 352 : index
    %66 = vector.load %arg1[%c0_37, %c0_38, %c352] : memref<1x64x384xf32, #tpu.memory_space<vmem>>, vector<1x64x32xf32>
    %67 = vector.shape_cast %66 : vector<1x64x32xf32> to vector<64x32xf32>
    %cst_39 = arith.constant dense<0.000000e+00> : vector<64x64xf32>
    %68 = tpu.matmul %63, %65, %cst_39 {dimension_numbers = #tpu.dot_dimension_numbers<[1], [1], [0], [0], [0, 0, 1, 0], [], []>} : vector<64x32xf32>, vector<64x32xf32>, vector<64x64xf32> -> vector<64x64xf32>
    %cst_40 = arith.constant dense<0xFF800000> : vector<64xf32>
    %69 = vector.multi_reduction <maximumf>, %68, %cst_40 [1] : vector<64x64xf32> to vector<64xf32>
    %70 = vector.shape_cast %69 : vector<64xf32> to vector<64x1xf32>
    %71 = vector.broadcast %70 : vector<64x1xf32> to vector<64x64xf32>
    %72 = arith.subf %68, %71 : vector<64x64xf32>
    %73 = math.exp %72 : vector<64x64xf32>
    %cst_41 = arith.constant dense<0.000000e+00> : vector<64xf32>
    %74 = vector.multi_reduction <add>, %73, %cst_41 [1] : vector<64x64xf32> to vector<64xf32>
    %75 = vector.shape_cast %74 : vector<64xf32> to vector<64x1xf32>
    %cst_42 = arith.constant dense<0.000000e+00> : vector<64x32xf32>
    %76 = tpu.matmul %73, %67, %cst_42 {dimension_numbers = #tpu.dot_dimension_numbers<[1], [0], [0], [1], [0, 0, 1, 1], [], []>} : vector<64x64xf32>, vector<64x32xf32>, vector<64x32xf32> -> vector<64x32xf32>
    %77 = tpu.reciprocal %75 : vector<64x1xf32> -> vector<64x1xf32>
    %78 = vector.broadcast %77 : vector<64x1xf32> to vector<64x32xf32>
    %79 = arith.mulf %76, %78 : vector<64x32xf32>
    %80 = tpu.concatenate %19, %39, %59, %79 in 1 : vector<64x32xf32>, vector<64x32xf32>, vector<64x32xf32>, vector<64x32xf32> -> vector<64x128xf32>
    %c0_43 = arith.constant 0 : index
    %c0_44 = arith.constant 0 : index
    %c0_45 = arith.constant 0 : index
    %81 = vector.load %arg2[%c0_43, %c0_44, %c0_45] : memref<1x64x128xf32, #tpu.memory_space<vmem>>, vector<1x64x128xf32>
    %82 = vector.shape_cast %81 : vector<1x64x128xf32> to vector<64x128xf32>
    %83 = vector.shape_cast %80 : vector<64x128xf32> to vector<1x64x128xf32>
    tpu.vector_store %arg2[%c0_43, %c0_44, %c0_45], %83 {strides = array<i32>} : memref<1x64x128xf32, #tpu.memory_space<vmem>>, vector<1x64x128xf32>,
    return
  }
  func.func @transform_0(%arg0: i32) -> (i32, i32, i32) {
    %c0_i32 = arith.constant 0 : i32
    %c0_i32_0 = arith.constant 0 : i32
    %c0_i32_1 = arith.constant 0 : i32
    return %arg0, %c0_i32, %c0_i32_0 : i32, i32, i32
  }
  func.func @transform_1(%arg0: i32) -> (i32, i32, i32) {
    %c0_i32 = arith.constant 0 : i32
    %c0_i32_0 = arith.constant 0 : i32
    %c0_i32_1 = arith.constant 0 : i32
    return %arg0, %c0_i32, %c0_i32_0 : i32, i32, i32
  }
}

module attributes {stable_mosaic.version = 11 : i64} {
  func.func @_mlp_res_ln_kernel(%arg0: i32, %arg1: i32, %arg2: memref<64x128xf32, #tpu.memory_space<vmem>>, %arg3: memref<128x512xf32, #tpu.memory_space<vmem>>, %arg4: memref<1x512xf32, #tpu.memory_space<vmem>>, %arg5: memref<512x128xf32, #tpu.memory_space<vmem>>, %arg6: memref<1x128xf32, #tpu.memory_space<vmem>>, %arg7: memref<1x128xf32, #tpu.memory_space<vmem>>, %arg8: memref<1x128xf32, #tpu.memory_space<vmem>>, %arg9: memref<64x128xf32, #tpu.memory_space<vmem>>, %arg10: memref<64x128xf32, #tpu.memory_space<vmem>>) attributes {dimension_semantics = [#tpu.dimension_semantics<parallel>, #tpu.dimension_semantics<arbitrary>], iteration_bounds = array<i64: 2, 1>, scalar_prefetch = 0 : i64, scratch_operands = 1 : i64, tpu.core_type = #tpu.core_type<tc>, window_params = [{transform_indices = @transform_0, window_bounds = array<i64: 64, 128>}, {transform_indices = @transform_1, window_bounds = array<i64: 128, 512>}, {transform_indices = @transform_2, window_bounds = array<i64: 1, 512>}, {transform_indices = @transform_3, window_bounds = array<i64: 512, 128>}, {pipeline_mode = #tpu.pipeline_mode<synchronous>, transform_indices = @transform_4, window_bounds = array<i64: 1, 128>}, {pipeline_mode = #tpu.pipeline_mode<synchronous>, transform_indices = @transform_5, window_bounds = array<i64: 1, 128>}, {pipeline_mode = #tpu.pipeline_mode<synchronous>, transform_indices = @transform_6, window_bounds = array<i64: 1, 128>}, {transform_indices = @transform_7, window_bounds = array<i64: 64, 128>}]} {
    %c0_i32 = arith.constant 0 : i32
    %0 = arith.cmpi eq, %arg1, %c0_i32 : i32
    %1 = arith.extui %0 : i1 to i32
    %c0_i32_0 = arith.constant 0 : i32
    %2 = arith.cmpi ne, %1, %c0_i32_0 : i32
    scf.if %2 {
      %cst_18 = arith.constant 0.000000e+00 : f32
      %25 = vector.broadcast %cst_18 : f32 to vector<64x128xf32>
      %c0_19 = arith.constant 0 : index
      %c0_20 = arith.constant 0 : index
      %26 = vector.load %arg10[%c0_19, %c0_20] : memref<64x128xf32, #tpu.memory_space<vmem>>, vector<64x128xf32>
      tpu.vector_store %arg10[%c0_19, %c0_20], %25 {strides = array<i32>} : memref<64x128xf32, #tpu.memory_space<vmem>>, vector<64x128xf32>,
    } else {
    }
    %c0 = arith.constant 0 : index
    %c0_1 = arith.constant 0 : index
    %3 = vector.load %arg2[%c0, %c0_1] : memref<64x128xf32, #tpu.memory_space<vmem>>, vector<64x128xf32>
    %c0_2 = arith.constant 0 : index
    %c0_3 = arith.constant 0 : index
    %4 = vector.load %arg3[%c0_2, %c0_3] : memref<128x512xf32, #tpu.memory_space<vmem>>, vector<128x512xf32>
    %cst = arith.constant dense<0.000000e+00> : vector<64x512xf32>
    %5 = tpu.matmul %3, %4, %cst {dimension_numbers = #tpu.dot_dimension_numbers<[1], [0], [0], [1], [0, 0, 1, 1], [], []>} : vector<64x128xf32>, vector<128x512xf32>, vector<64x512xf32> -> vector<64x512xf32>
    %c0_4 = arith.constant 0 : index
    %c0_5 = arith.constant 0 : index
    %6 = vector.load %arg4[%c0_4, %c0_5] : memref<1x512xf32, #tpu.memory_space<vmem>>, vector<1x512xf32>
    %7 = vector.broadcast %6 : vector<1x512xf32> to vector<64x512xf32>
    %8 = arith.addf %5, %7 : vector<64x512xf32>
    %cst_6 = arith.constant 5.000000e-01 : f32
    %9 = vector.broadcast %cst_6 : f32 to vector<64x512xf32>
    %10 = arith.mulf %9, %8 : vector<64x512xf32>
    %cst_7 = arith.constant 0.707106769 : f32
    %11 = vector.broadcast %cst_7 : f32 to vector<64x512xf32>
    %12 = arith.mulf %8, %11 : vector<64x512xf32>
    %13 = math.erf %12 : vector<64x512xf32>
    %cst_8 = arith.constant 1.000000e+00 : f32
    %14 = vector.broadcast %cst_8 : f32 to vector<64x512xf32>
    %15 = arith.addf %14, %13 : vector<64x512xf32>
    %16 = arith.mulf %10, %15 : vector<64x512xf32>
    %c0_9 = arith.constant 0 : index
    %c0_10 = arith.constant 0 : index
    %17 = vector.load %arg10[%c0_9, %c0_10] : memref<64x128xf32, #tpu.memory_space<vmem>>, vector<64x128xf32>
    %c0_11 = arith.constant 0 : index
    %c0_12 = arith.constant 0 : index
    %18 = vector.load %arg5[%c0_11, %c0_12] : memref<512x128xf32, #tpu.memory_space<vmem>>, vector<512x128xf32>
    %cst_13 = arith.constant dense<0.000000e+00> : vector<64x128xf32>
    %19 = tpu.matmul %16, %18, %cst_13 {dimension_numbers = #tpu.dot_dimension_numbers<[1], [0], [0], [1], [0, 0, 1, 1], [], []>} : vector<64x512xf32>, vector<512x128xf32>, vector<64x128xf32> -> vector<64x128xf32>
    %20 = arith.addf %17, %19 : vector<64x128xf32>
    %c0_14 = arith.constant 0 : index
    %c0_15 = arith.constant 0 : index
    %21 = vector.load %arg10[%c0_14, %c0_15] : memref<64x128xf32, #tpu.memory_space<vmem>>, vector<64x128xf32>
    tpu.vector_store %arg10[%c0_14, %c0_15], %20 {strides = array<i32>} : memref<64x128xf32, #tpu.memory_space<vmem>>, vector<64x128xf32>,
    %c0_i32_16 = arith.constant 0 : i32
    %22 = arith.cmpi eq, %arg1, %c0_i32_16 : i32
    %23 = arith.extui %22 : i1 to i32
    %c0_i32_17 = arith.constant 0 : i32
    %24 = arith.cmpi ne, %23, %c0_i32_17 : i32
    scf.if %24 {
      %c0_18 = arith.constant 0 : index
      %c0_19 = arith.constant 0 : index
      %25 = vector.load %arg10[%c0_18, %c0_19] : memref<64x128xf32, #tpu.memory_space<vmem>>, vector<64x128xf32>
      %c0_20 = arith.constant 0 : index
      %c0_21 = arith.constant 0 : index
      %26 = vector.load %arg6[%c0_20, %c0_21] : memref<1x128xf32, #tpu.memory_space<vmem>>, vector<1x128xf32>
      %27 = vector.broadcast %26 : vector<1x128xf32> to vector<64x128xf32>
      %28 = arith.addf %25, %27 : vector<64x128xf32>
      %c0_22 = arith.constant 0 : index
      %c0_23 = arith.constant 0 : index
      %29 = vector.load %arg2[%c0_22, %c0_23] : memref<64x128xf32, #tpu.memory_space<vmem>>, vector<64x128xf32>
      %30 = arith.addf %28, %29 : vector<64x128xf32>
      %cst_24 = arith.constant dense<0.000000e+00> : vector<64xf32>
      %31 = vector.multi_reduction <add>, %30, %cst_24 [1] : vector<64x128xf32> to vector<64xf32>
      %32 = vector.shape_cast %31 : vector<64xf32> to vector<64x1xf32>
      %cst_25 = arith.constant 1.280000e+02 : f32
      %33 = vector.broadcast %cst_25 : f32 to vector<64x1xf32>
      %34 = arith.divf %32, %33 : vector<64x1xf32>
      %35 = vector.broadcast %34 : vector<64x1xf32> to vector<64x128xf32>
      %36 = arith.subf %30, %35 : vector<64x128xf32>
      %37 = arith.mulf %36, %36 : vector<64x128xf32>
      %cst_26 = arith.constant dense<0.000000e+00> : vector<64xf32>
      %38 = vector.multi_reduction <add>, %37, %cst_26 [1] : vector<64x128xf32> to vector<64xf32>
      %39 = vector.shape_cast %38 : vector<64xf32> to vector<64x1xf32>
      %cst_27 = arith.constant 1.280000e+02 : f32
      %40 = vector.broadcast %cst_27 : f32 to vector<64x1xf32>
      %41 = arith.divf %39, %40 : vector<64x1xf32>
      %cst_28 = arith.constant 9.99999974E-6 : f32
      %42 = vector.broadcast %cst_28 : f32 to vector<64x1xf32>
      %43 = arith.addf %41, %42 : vector<64x1xf32>
      %44 = math.rsqrt %43 : vector<64x1xf32>
      %45 = vector.broadcast %44 : vector<64x1xf32> to vector<64x128xf32>
      %46 = arith.mulf %36, %45 : vector<64x128xf32>
      %c0_29 = arith.constant 0 : index
      %c0_30 = arith.constant 0 : index
      %47 = vector.load %arg7[%c0_29, %c0_30] : memref<1x128xf32, #tpu.memory_space<vmem>>, vector<1x128xf32>
      %48 = vector.broadcast %47 : vector<1x128xf32> to vector<64x128xf32>
      %49 = arith.mulf %46, %48 : vector<64x128xf32>
      %c0_31 = arith.constant 0 : index
      %c0_32 = arith.constant 0 : index
      %50 = vector.load %arg8[%c0_31, %c0_32] : memref<1x128xf32, #tpu.memory_space<vmem>>, vector<1x128xf32>
      %51 = vector.broadcast %50 : vector<1x128xf32> to vector<64x128xf32>
      %52 = arith.addf %49, %51 : vector<64x128xf32>
      %c0_33 = arith.constant 0 : index
      %c0_34 = arith.constant 0 : index
      %53 = vector.load %arg9[%c0_33, %c0_34] : memref<64x128xf32, #tpu.memory_space<vmem>>, vector<64x128xf32>
      tpu.vector_store %arg9[%c0_33, %c0_34], %52 {strides = array<i32>} : memref<64x128xf32, #tpu.memory_space<vmem>>, vector<64x128xf32>,
    } else {
    }
    return
  }
  func.func @transform_0(%arg0: i32, %arg1: i32) -> (i32, i32) {
    %c0_i32 = arith.constant 0 : i32
    %c0_i32_0 = arith.constant 0 : i32
    return %arg0, %c0_i32 : i32, i32
  }
  func.func @transform_1(%arg0: i32, %arg1: i32) -> (i32, i32) {
    %c0_i32 = arith.constant 0 : i32
    %c0_i32_0 = arith.constant 0 : i32
    return %c0_i32, %arg1 : i32, i32
  }
  func.func @transform_2(%arg0: i32, %arg1: i32) -> (i32, i32) {
    %c0_i32 = arith.constant 0 : i32
    %c0_i32_0 = arith.constant 0 : i32
    return %c0_i32, %arg1 : i32, i32
  }
  func.func @transform_3(%arg0: i32, %arg1: i32) -> (i32, i32) {
    %c0_i32 = arith.constant 0 : i32
    %c0_i32_0 = arith.constant 0 : i32
    return %arg1, %c0_i32 : i32, i32
  }
  func.func @transform_4(%arg0: i32, %arg1: i32) -> (i32, i32) {
    %c0_i32 = arith.constant 0 : i32
    %c0_i32_0 = arith.constant 0 : i32
    %c0_i32_1 = arith.constant 0 : i32
    return %c0_i32, %c0_i32_0 : i32, i32
  }
  func.func @transform_5(%arg0: i32, %arg1: i32) -> (i32, i32) {
    %c0_i32 = arith.constant 0 : i32
    %c0_i32_0 = arith.constant 0 : i32
    %c0_i32_1 = arith.constant 0 : i32
    return %c0_i32, %c0_i32_0 : i32, i32
  }
  func.func @transform_6(%arg0: i32, %arg1: i32) -> (i32, i32) {
    %c0_i32 = arith.constant 0 : i32
    %c0_i32_0 = arith.constant 0 : i32
    %c0_i32_1 = arith.constant 0 : i32
    return %c0_i32, %c0_i32_0 : i32, i32
  }
  func.func @transform_7(%arg0: i32, %arg1: i32) -> (i32, i32) {
    %c0_i32 = arith.constant 0 : i32
    %c0_i32_0 = arith.constant 0 : i32
    return %arg0, %c0_i32 : i32, i32
  }
}

</mosaic_0001>

<bundles_post_ra>
// kernel: encoder_layer_forward.6
= control target key start
LH: loop header
LB: loop body
LE: loop exit
PB: predicated region body
PF: predicated region fallthrough
CT: control target
= control target key end

     0   :  { %s739_s18 = smov 0   ;;  %s880_s0 = inlined_call_operand.vmem [shape: f32[128,128], index: 0, kind: input, shape index: {}]   ;;  %s881_s1 = inlined_call_operand.vmem [shape: f32[128,128], index: 1, kind: input, shape index: {}]   ;;  %s882_s2 = inlined_call_operand.vmem [shape: f32[1,128], index: 2, kind: input, shape index: {}]   ;;  %s883_s3 = inlined_call_operand.vmem [shape: f32[1,128], index: 3, kind: input, shape index: {}]   ;;  %s884_s4 = inlined_call_operand.vmem [shape: f32[1,128], index: 4, kind: input, shape index: {}]   ;;  %s885_s5 = inlined_call_operand.vmem [shape: f32[128,128], index: 5, kind: output, shape index: {}]  }
   0x1 LB: > { %s547_s19 = sadd.s32 4294967295, %s707_s18   ;;  %p551_p0 = scmp.ge.s32.totalorder %s707_s18, 1  ;;  %s707_s18 = sphi %s739_s18, %s15_s18  }
   0x2   : > { %p188_p1 = scmp.lt.s32.totalorder %s707_s18, 3 }
   0x4   : > { %p189_p2 = pnand %p551_p0, %p188_p1 }
   0x5   : > { %v236_v0 = vld [vmem:[%s881_s1] sm:$0xff] (!%p189_p2)  ;;  %v237_v1 = vld [vmem:[%s881_s1 + $0x8] sm:$0xff] (!%p189_p2)  ;;  %v238_v2 = vld [vmem:[%s881_s1 + $0x10] sm:$0xff] (!%p189_p2)  ;;  %s552_s26 = sshll.u32 (!%p189_p2), %s547_s19, 3 }
   0x6   : > { %192 = sbr.rel (%p189_p2) target bundleno = 582 (0x246), region = 40  ;;  %v629_v3 = vpack.c.bf16 (!%p189_p2), %v237_v1, %v236_v0  ;;  %v239_v4 = vld [vmem:[%s881_s1 + $0x18] sm:$0xff] (!%p189_p2)  ;;  %p217_p3 = scmp.lt.s32.totalorder (!%p189_p2), %s552_s26, 15  ;;  %v240_v6 = vld [vmem:[%s881_s1 + $0x20] sm:$0xff] (!%p189_p2)  ;;  %v241_v7 = vld [vmem:[%s881_s1 + $0x28] sm:$0xff] (!%p189_p2) }
   0x7   : > { %v633_v5 = vpack.c.bf16 (!%p189_p2), %v239_v4, %v238_v2  ;;  %v637_v8 = vpack.c.bf16 (!%p189_p2), %v241_v7, %v240_v6  ;;  %v242_v9 = vld [vmem:[%s881_s1 + $0x30] sm:$0xff] (!%p189_p2)  ;;  %v243_v10 = vld [vmem:[%s881_s1 + $0x38] sm:$0xff] (!%p189_p2)  ;;  %v244_v14 = vld [vmem:[%s881_s1 + $0x40] sm:$0xff] (!%p189_p2) }
   0x8   : > { %630 = vmatprep.subr.bf16.mxu0 (!%p189_p2), %v629_v3  ;;  %661 = vmatprep.subr.bf16.mxu1 (!%p189_p2), %v629_v3  ;;  %v641_v13 = vpack.c.bf16 (!%p189_p2), %v243_v10, %v242_v9  ;;  %v245_v15 = vld [vmem:[%s881_s1 + $0x48] sm:$0xff] (!%p189_p2)  ;;  %v246_v17 = vld [vmem:[%s881_s1 + $0x50] sm:$0xff] (!%p189_p2)  ;;  %v247_v18 = vld [vmem:[%s881_s1 + $0x58] sm:$0xff] (!%p189_p2) }
   0x9   : > { %632 = vmatpush3.bf16.msra.mxu0 (!%p189_p2), %v629_v3  ;;  %669 = vmatpush3.bf16.msra.mxu1 (!%p189_p2), %v629_v3  ;;  %v645_v16 = vpack.c.bf16 (!%p189_p2), %v245_v15, %v244_v14  ;;  %v649_v19 = vpack.c.bf16 (!%p189_p2), %v247_v18, %v246_v17  ;;  %v248_v20 = vld [vmem:[%s881_s1 + $0x60] sm:$0xff] (!%p189_p2)  ;;  %v249_v21 = vld [vmem:[%s881_s1 + $0x68] sm:$0xff] (!%p189_p2)  ;;  %v250_v23 = vld [vmem:[%s881_s1 + $0x70] sm:$0xff] (!%p189_p2) }
   0xa   : > { %634 = vmatprep.subr.bf16.mxu0 (!%p189_p2), %v633_v5  ;;  %662 = vmatprep.subr.bf16.mxu1 (!%p189_p2), %v633_v5  ;;  %v653_v22 = vpack.c.bf16 (!%p189_p2), %v249_v21, %v248_v20  ;;  %v251_v24 = vld [vmem:[%s881_s1 + $0x78] sm:$0xff] (!%p189_p2)  ;;  %v556_v32 = vld [vmem:[%s882_s2] ss:$0 sm:$0xff] (!%p189_p2) }
   0xb   : > { %v657_v25 = vpack.c.bf16 (!%p189_p2), %v251_v24, %v250_v23 }
   0xd   : > { %s887_s26 = smov (!%p217_p3, %s552_s26), 15  ;;  %636 = vmatpush3.bf16.msra.mxu0 %v633_v5  ;;  %670 = vmatpush3.bf16.msra.mxu1 %v633_v5 }
   0xe   : > { %s553_s8 = sshll.u32 %s887_s26, 3  ;;  %638 = vmatprep.subr.bf16.mxu0 %v637_v8  ;;  %663 = vmatprep.subr.bf16.mxu1 %v637_v8 }
   0xf   : > { %s779_s15 = scalar_lea.vmem %s880_s0, %s553_s8  ;;  %s860_s19 = scalar_lea.vmem %s885_s5, %s553_s8 }
  0x10   : > { %v228_v11 = vld [vmem:[%s779_s15] sm:$0xff]  ;;  %v229_v26 = vld [vmem:[%s779_s15 + $0x8] sm:$0xff]  ;;  %v230_v28 = vld [vmem:[%s779_s15 + $0x10] sm:$0xff] }
  0x11   : > { %v232_v12 = vld [vmem:[%s779_s15 + $0x20] sm:$0xff]  ;;  %617 = vmatprep.mubr.f32.mxu0 %v228_v11  ;;  %640 = vmatpush3.bf16.msra.mxu0 %v637_v8  ;;  %v233_v27 = vld [vmem:[%s779_s15 + $0x28] sm:$0xff]  ;;  %v234_v29 = vld [vmem:[%s779_s15 + $0x30] sm:$0xff] }
  0x12   : > { %623 = vmatprep.mubr.f32.mxu1 %v232_v12  ;;  %671 = vmatpush3.bf16.msra.mxu1 %v637_v8  ;;  %v231_v30 = vld [vmem:[%s779_s15 + $0x18] sm:$0xff] }
  0x13   : > { %642 = vmatprep.subr.bf16.mxu0 %v641_v13  ;;  %664 = vmatprep.subr.bf16.mxu1 %v641_v13  ;;  %v235_v31 = vld [vmem:[%s779_s15 + $0x38] sm:$0xff] }
  0x15   : > { %644 = vmatpush3.bf16.msra.mxu0 %v641_v13 }
  0x16   : > { %672 = vmatpush3.bf16.msra.mxu1 %v641_v13  ;;  %646 = vmatprep.subr.bf16.mxu0 %v645_v16 }
  0x17   : > { %665 = vmatprep.subr.bf16.mxu1 %v645_v16 }
  0x19   : > { %648 = vmatpush3.bf16.msra.mxu0 %v645_v16 }
  0x1a   : > { %673 = vmatpush3.bf16.msra.mxu1 %v645_v16  ;;  %650 = vmatprep.subr.bf16.mxu0 %v649_v19 }
  0x1b   : > { %666 = vmatprep.subr.bf16.mxu1 %v649_v19 }
  0x1d   : > { %652 = vmatpush3.bf16.msra.mxu0 %v649_v19 }
  0x1e   : > { %674 = vmatpush3.bf16.msra.mxu1 %v649_v19  ;;  %654 = vmatprep.subr.bf16.mxu0 %v653_v22 }
  0x1f   : > { %667 = vmatprep.subr.bf16.mxu1 %v653_v22 }
  0x21   : > { %656 = vmatpush3.bf16.msra.mxu0 %v653_v22 }
  0x22   : > { %675 = vmatpush3.bf16.msra.mxu1 %v653_v22  ;;  %658 = vmatprep.subr.bf16.mxu0 %v657_v25 }
  0x23   : > { %668 = vmatprep.subr.bf16.mxu1 %v657_v25 }
  0x25   : > { %660 = vmatpush3.bf16.msra.mxu0 %v657_v25 }
  0x26   : > { %676 = vmatpush3.bf16.msra.mxu1 %v657_v25 }
  0x28   : > { %618 = vmatmul.mubr.f32.vlgmr.msra.gmra.mrb[0].mxu0 %v229_v26 }
  0x29   : > { %624 = vmatmul.mubr.f32.vlgmr.msra.gmra.mrb[0].mxu1 %v233_v27  ;;  %620 = vmatprep.mubr.f32.mxu0 %v230_v28 }
  0x2a   : > { %626 = vmatprep.mubr.f32.mxu1 %v234_v29 }
  0x2c   : > { %621 = vmatmul.mubr.f32.gmra.mrb[2].mxu0 %v231_v30 }
  0x2d   : > { %627 = vmatmul.mubr.f32.gmra.mrb[2].mxu1 %v235_v31 }
  0xfb   : > { %v619_v33 = vpop.f32.mrb[0].mxu0 }
  0xfc   : > { %v625_v34 = vpop.f32.mrb[0].mxu1  ;;  %v331_v35 = vadd.f32 %v619_v33, %v556_v32  ;;  %v325_v37 = vpop.f32.mrb[1].mxu0 }
  0xfd   : > { %v351_v36 = vadd.f32 %v625_v34, %v556_v32  ;;  %v345_v38 = vpop.f32.mrb[1].mxu1  ;;  %v326_v41 = vadd.f32 %v556_v32, %v325_v37  ;;  %v557_v37 = vld [vmem:[%s883_s3] ss:$0 sm:$0xff] }
  0xfe   : > { %366 = vadd.xlane.f32.xlu0 %v331_v35  ;;  %v346_v46 = vadd.f32 %v556_v32, %v345_v38 }
  0xff   : > { %374 = vadd.xlane.f32.xlu1 %v351_v36  ;;  %v622_v39 = vpop.f32.mrb[2].mxu0 }
 0x100   : > { %v628_v40 = vpop.f32.mrb[2].mxu1  ;;  %v341_v42 = vadd.f32 %v622_v39, %v556_v32  ;;  %v335_v43 = vpop.f32.mrb[3].mxu0 }
 0x101   : > { %v355_v44 = vpop.f32.mrb[3].mxu1  ;;  %v336_v45 = vadd.f32 %v556_v32, %v335_v43  ;;  %v361_v47 = vadd.f32 %v628_v40, %v556_v32 }
 0x102   : > { %364 = vadd.xlane.f32.xlu0 %v326_v41  ;;  %v356_v48 = vadd.f32 %v556_v32, %v355_v44 }
 0x103   : > { %370 = vadd.xlane.f32.xlu1 %v341_v42 }
 0x106   : > { %372 = vadd.xlane.f32.xlu0 %v346_v46 }
 0x107   : > { %368 = vadd.xlane.f32.xlu1 %v336_v45 }
 0x10a   : > { %376 = vadd.xlane.f32.xlu0 %v356_v48 }
 0x10b   : > { %378 = vadd.xlane.f32.xlu1 %v361_v47 }
 0x18b   : > { %v367_v50 = vpop.xlane.xlu0 %366 }
 0x18c   : > { %v375_v49 = vpop.xlane.xlu1 %374  ;;  %v382_v52 = vmul.f32 0.0078125, %v367_v50 }
 0x18d   : > { %v386_v51 = vmul.f32 0.0078125, %v375_v49 }
 0x18e   : > { %v816_v53 = vsub.f32 %v331_v35, %v382_v52 }
 0x18f   : > { %v365_v55 = vpop.xlane.xlu0 %364  ;;  %v818_v56 = vsub.f32 %v351_v36, %v386_v51 }
 0x190   : > { %v371_v54 = vpop.xlane.xlu1 %370  ;;  %v381_v58 = vmul.f32 0.0078125, %v365_v55  ;;  %v398_v59 = vmul.f32 %v816_v53, %v816_v53 }
 0x191   : > { %v384_v57 = vmul.f32 0.0078125, %v371_v54  ;;  %v402_v2 = vmul.f32 %v818_v56, %v818_v56 }
 0x192   : > { %v822_v60 = vsub.f32 %v326_v41, %v381_v58  ;;  %407 = vadd.xlane.f32.xlu1 %v398_v59 }
 0x193   : > { %v824_v61 = vsub.f32 %v341_v42, %v384_v57  ;;  %v373_v63 = vpop.xlane.xlu0 %372  ;;  %v558_v42 = vld [vmem:[%s884_s4] ss:$0 sm:$0xff] }
 0x194   : > { %v369_v62 = vpop.xlane.xlu1 %368  ;;  %v385_v1 = vmul.f32 0.0078125, %v373_v63  ;;  %v397_v3 = vmul.f32 %v822_v60, %v822_v60 }
 0x195   : > { %v383_v0 = vmul.f32 0.0078125, %v369_v62  ;;  %v400_v7 = vmul.f32 %v824_v61, %v824_v61 }
 0x196   : > { %v830_v4 = vsub.f32 %v346_v46, %v385_v1  ;;  %415 = vadd.xlane.f32.xlu1 %v402_v2  ;;  %405 = vadd.xlane.f32.xlu0 %v397_v3 }
 0x197   : > { %v377_v6 = vpop.xlane.xlu0 %376  ;;  %v834_v8 = vsub.f32 %v336_v45, %v383_v0 }
 0x198   : > { %v379_v5 = vpop.xlane.xlu1 %378  ;;  %v387_v10 = vmul.f32 0.0078125, %v377_v6  ;;  %v401_v11 = vmul.f32 %v830_v4, %v830_v4 }
 0x199   : > { %v388_v9 = vmul.f32 0.0078125, %v379_v5  ;;  %v399_v15 = vmul.f32 %v834_v8, %v834_v8 }
 0x19a   : > { %411 = vadd.xlane.f32.xlu1 %v400_v7  ;;  %413 = vadd.xlane.f32.xlu0 %v401_v11  ;;  %v840_v13 = vsub.f32 %v356_v48, %v387_v10 }
 0x19b   : > { %v838_v12 = vsub.f32 %v361_v47, %v388_v9 }
 0x19c   : > { %v403_v16 = vmul.f32 %v840_v13, %v840_v13 }
 0x19d   : > { %v404_v14 = vmul.f32 %v838_v12, %v838_v12 }
 0x19e   : > { %409 = vadd.xlane.f32.xlu0 %v399_v15 }
 0x19f   : > { %419 = vadd.xlane.f32.xlu1 %v404_v14 }
 0x1a2   : > { %417 = vadd.xlane.f32.xlu0 %v403_v16 }
 0x21f   : > { %v408_v17 = vpop.xlane.xlu1 %407 }
 0x220   : > { %v422_v18 = vmul.f32 0.0078125, %v408_v17 }
 0x222   : > { %v430_v19 = vadd.f32 1e-05, %v422_v18 }
 0x223   : > { %v416_v20 = vpop.xlane.xlu1 %415  ;;  %v406_v21 = vpop.xlane.xlu0 %405 }
 0x224   : > { %685 = vrsqrt.f32 %v430_v19  ;;  %v426_v22 = vmul.f32 0.0078125, %v416_v20  ;;  %v421_v23 = vmul.f32 0.0078125, %v406_v21 }
 0x226   : > { %v434_v24 = vadd.f32 1e-05, %v426_v22  ;;  %v429_v25 = vadd.f32 1e-05, %v421_v23 }
 0x227   : > { %v412_v26 = vpop.xlane.xlu1 %411  ;;  %v414_v27 = vpop.xlane.xlu0 %413 }
 0x228   : > { %687 = vrsqrt.f32 %v434_v24  ;;  %v424_v28 = vmul.f32 0.0078125, %v412_v26  ;;  %v425_v29 = vmul.f32 0.0078125, %v414_v27 }
 0x229   : > { %689 = vrsqrt.f32 %v429_v25 }
 0x22a   : > { %v432_v30 = vadd.f32 1e-05, %v424_v28  ;;  %v433_v31 = vadd.f32 1e-05, %v425_v29 }
 0x22b   : > { %v410_v33 = vpop.xlane.xlu0 %409 }
 0x22c   : > { %v420_v32 = vpop.xlane.xlu1 %419  ;;  %691 = vrsqrt.f32 %v432_v30  ;;  %v423_v35 = vmul.f32 0.0078125, %v410_v33 }
 0x22d   : > { %v428_v34 = vmul.f32 0.0078125, %v420_v32  ;;  %693 = vrsqrt.f32 %v433_v31 }
 0x22e   : > { %v686_v36 = vpop.eup %685  ;;  %v431_v39 = vadd.f32 1e-05, %v423_v35 }
 0x22f   : > { %v436_v38 = vadd.f32 1e-05, %v428_v34  ;;  %v446_v40 = vmul.f32 %v686_v36, %v816_v53  ;;  %v418_v41 = vpop.xlane.xlu0 %417 }
 0x230   : > { %v427_v43 = vmul.f32 0.0078125, %v418_v41 }
 0x231   : > { %695 = vrsqrt.f32 %v436_v38  ;;  %v461_v44 = vmul.f32 %v557_v37, %v446_v40 }
 0x232   : > { %697 = vrsqrt.f32 %v431_v39  ;;  %v688_v45 = vpop.eup %687  ;;  %v435_v46 = vadd.f32 1e-05, %v427_v43 }
 0x233   : > { %v690_v47 = vpop.eup %689  ;;  %v476_v48 = vadd.f32 %v558_v42, %v461_v44  ;;  %v450_v49 = vmul.f32 %v688_v45, %v818_v56 }
 0x234   : > { %v445_v50 = vmul.f32 %v690_v47, %v822_v60  ;;  %699 = vrsqrt.f32 %v435_v46 }
 0x235   : > { %484 = vst [vmem:[%s860_s19 + $0x8] sm:$0xff] %v476_v48  ;;  %v465_v51 = vmul.f32 %v557_v37, %v450_v49 }
 0x236   : > { %v692_v52 = vpop.eup %691  ;;  %v460_v53 = vmul.f32 %v557_v37, %v445_v50 }
 0x237   : > { %v694_v54 = vpop.eup %693  ;;  %v480_v55 = vadd.f32 %v558_v42, %v465_v51  ;;  %v448_v57 = vmul.f32 %v692_v52, %v824_v61 }
 0x238   : > { %v475_v58 = vadd.f32 %v558_v42, %v460_v53  ;;  %v449_v59 = vmul.f32 %v694_v54, %v830_v4 }
 0x239   : > { %488 = vst [vmem:[%s860_s19 + $0x28] sm:$0xff] %v480_v55  ;;  %v463_v62 = vmul.f32 %v557_v37, %v448_v57 }
 0x23a   : > { %483 = vst [vmem:[%s860_s19] sm:$0xff] %v475_v58  ;;  %v464_v56 = vmul.f32 %v557_v37, %v449_v59 }
 0x23b   : > { %v696_v63 = vpop.eup %695  ;;  %v478_v0 = vadd.f32 %v558_v42, %v463_v62 }
 0x23c   : > { %v698_v60 = vpop.eup %697  ;;  %v452_v1 = vmul.f32 %v696_v63, %v838_v12  ;;  %v479_v2 = vadd.f32 %v558_v42, %v464_v56 }
 0x23d   : > { %v447_v3 = vmul.f32 %v698_v60, %v834_v8  ;;  %486 = vst [vmem:[%s860_s19 + $0x18] sm:$0xff] %v478_v0 }
 0x23e   : > { %v467_v61 = vmul.f32 %v557_v37, %v452_v1  ;;  %v700_v5 = vpop.eup %699  ;;  %487 = vst [vmem:[%s860_s19 + $0x20] sm:$0xff] %v479_v2 }
 0x23f   : > { %v462_v4 = vmul.f32 %v557_v37, %v447_v3  ;;  %v451_v7 = vmul.f32 %v700_v5, %v840_v13 }
 0x240   : > { %v482_v6 = vadd.f32 %v558_v42, %v467_v61 }
 0x241   : > { %v477_v9 = vadd.f32 %v558_v42, %v462_v4  ;;  %v466_v10 = vmul.f32 %v557_v37, %v451_v7 }
 0x242   : > { %490 = vst [vmem:[%s860_s19 + $0x38] sm:$0xff] %v482_v6 }
 0x243   : > { %485 = vst [vmem:[%s860_s19 + $0x10] sm:$0xff] %v477_v9  ;;  %v481_v11 = vadd.f32 %v558_v42, %v466_v10 }
 0x245   : > { %489 = vst [vmem:[%s860_s19 + $0x30] sm:$0xff] %v481_v11 }
 0x246 PF: > { %s15_s18 = sadd.s32 1, %s707_s18  }
 0x247   : > { %p12_p4 = scmp.ge.s32.totalorder %s15_s18, 4  }
 0x249   :  { %14 = sbr.rel (!%p12_p4) target bundleno = 1 (0x1), region = 70 }

// kernel: encoder_layer_forward.4
= control target key start
LH: loop header
LB: loop body
LE: loop exit
PB: predicated region body
PF: predicated region fallthrough
CT: control target
= control target key end

     0   :  { %8 = vsyncpa [#allocation3], 0  ;;  %s1281_s0 = inlined_call_operand.hbm [shape: f32[128,128], index: 0, kind: input, shape index: {}]   ;;  %s1282_s1 = inlined_call_operand.hbm [shape: f32[128,384], index: 1, kind: input, shape index: {}]   ;;  %s1283_s2 = inlined_call_operand.vmem [shape: f32[1,384], index: 2, kind: input, shape index: {}]   ;;  %s1284_s3 = inlined_call_operand.vmem [shape: f32[128,384], index: 3, kind: output, shape index: {}]  }
   0x1   :  { %10 = vsyncpa [#allocation3 + $0x1], 0 }
   0x2   :  { %11 = vsyncpa [#allocation5], 0  ;;  %s1057_s12 = smov 0   ;;  %s1059_s13 = smov 0  }
   0x3   :  { %s1061_s14 = smov 0   ;;  %s1063_s15 = smov 0  }
   0x4   :  { %s1065_s16 = smov 0   ;;  %s1067_s17 = smov 0  }
   0x5 LB: > { %s695_s18 = sadd.s32 4294967295, %s1028_s17   ;;  %p49_p0 = scmp.ne.s32.totalorder %s1012_s13, %s1008_s12  ;;  %s1028_s17 = sphi %s1067_s17, %s17_s17   ;;  %s1024_s16 = sphi %s1065_s16, %s1301_s16   ;;  %s1020_s15 = sphi %s1063_s15, %s1300_s15   ;;  %s1016_s14 = sphi %s1061_s14, %s1299_s14   ;;  %s1012_s13 = sphi %s1059_s13, %s1298_s13   ;;  %s1008_s12 = sphi %s1057_s12, %s1297_s12  }
   0x6   : > { %p1087_p1 = scmp.eq.s32.totalorder %s695_s18, 0  ;;  %p697_p2 = scmp.ge.s32.totalorder %s1028_s17, 1 }
   0x7   : > { %p140_p3 = scmp.lt.s32.totalorder %s1028_s17, 3  ;;  %s1030_s22 = smov [#allocation4]  }
   0x8   : > { %s1289_s19 = scalar_select %p1087_p1, 1, 0 }
   0x9   : > { %p1095_p4 = por %p1087_p1, %p49_p0  ;;  %p1099_p5 = pnand %p697_p2, %p140_p3 }
   0xa   : > { %s155_s23 = sshll.u32 %s1030_s22, 4  ;;  %s29_s25 = sadd.s32 1, %s1024_s16  ;;  %s156_s23 = int_to_ptr.vmem [resolvable:$true] %s155_s23 }
   0xb   : > { %s1290_s20 = scalar_select %p1095_p4, 1, 0 }
   0xc   : > { %s1291_s21 = scalar_select %p1099_p5, 1, 0 }
   0xd   : > { %p851_p6 = pneg %p1099_p5  ;;  %s916_s28 = scalar_lea.hbm %s1282_s1, 6144 }
   0xe   : > { %p917_p8 = scmp.ne.s32.totalorder %s1282_s1, %s916_s28  ;;  %p923_p12 = scmp.lt.u32.totalorder %s916_s28, %s1282_s1 }
   0xf   : > { %p1107_p7 = pnand %p851_p6, %p1087_p1 }
  0x11   : > { %p918_p9 = pneg %p1107_p7 }
  0x13   : > { %p919_p10 = pnand %p918_p9, %p917_p8 }
  0x15   : > { %p920_p11 = pneg %p919_p10 }
  0x17   : > { %p925_p13 = pnand %p923_p12, %p920_p11 }
  0x19   : > { %928 = shalt.err (!%p925_p13)
}
  0x1a   : > { %s929_s6 = scalar_lea.vmem %s156_s23, 6144  ;;  %p937_p6 = scmp.lt.s32.totalorder %s156_s23, %s156_s23 }
  0x1b   : > { %p930_p0 = scmp.ne.s32.totalorder %s156_s23, %s929_s6  ;;  %p938_p1 = scmp.lt.s32.totalorder %s929_s6, %s929_s6 }
  0x1d   : > { %p932_p2 = pnand %p930_p0, %p918_p9  ;;  %p939_p4 = por %p938_p1, %p937_p6 }
  0x1f   : > { %p933_p3 = pneg %p932_p2 }
  0x21   : > { %p940_p5 = pnand %p939_p4, %p933_p3 }
  0x23   : > { %943 = shalt.err (!%p940_p5)
}
  0x24   : > { %s1031_s7 = smov 384   ;;  %s1032_s8 = smov 24  }
  0x25   : > { %854 = dma.hbm_to_vmem [thread:$0]  (!%p1107_p7), %s1282_s1, 6144, %s156_s23, [#allocation5], %s1031_s7, %s1031_s7, %s1032_s8  }
  0x26   : > { %p31_p1 = scmp.ge.s32.totalorder %s29_s25, 2  ;;  %s36_s11 = sadd.s32 1, %s1016_s14 }
  0x27   : > { %p43_p4 = scmp.ne.s32.totalorder %s1016_s14, %s1012_s13  ;;  %p44_p5 = scmp.eq.s32.totalorder %s1028_s17, 0 }
  0x28   : > { %s1303_s25 = smov (%p31_p1, %s29_s25), 0  ;;  %p860_p9 = scmp.lt.s32.totalorder %s1028_s17, 2 }
  0x29   : > { %p45_p8 = por %p44_p5, %p43_p4  ;;  %s33_s12 = ssub.s32 %s1024_s16, %s1303_s25 }
  0x2a   : > { %s177_s18 = sand.u32 1, %s1016_s14   ;;  %p34_p10 = scmp.eq.s32.totalorder %s33_s12, 0 }
  0x2b   : > { %s701_s22 = sshll.u32 %s177_s18, 6  ;;  %s711_s26 = sshll.u32 %s1024_s16, 10 }
  0x2c   : > { %s1140_s27 = scalar_select %p34_p10, %s1016_s14, %s36_s11  }
  0x2d   : > { %s1145_s23 = scalar_lea.hbm %s1281_s0, %s711_s26  ;;  %s181_s29 = scalar_lea.vmem [#allocation2], %s701_s22 }
  0x2e   : > { %s188_s30 = sshll.u32 %s181_s29, 4  ;;  %p1147_p7 = pnand %p860_p9, %p45_p8  ;;  %s1151_s30 = int_to_ptr.vmem [resolvable:$true] %s188_s30 }
  0x2f   : > { %s1153_s5 = scalar_lea.sflag [#allocation3], %s177_s18  ;;  %s944_s6 = scalar_lea.hbm %s1145_s23, 1024 }
  0x30   : > { %p945_p11 = scmp.ne.s32.totalorder %s1145_s23, %s944_s6  ;;  %p946_p12 = pneg %p1147_p7 }
  0x31   : > { %s949_s9 = scalar_lea.hbm %s1281_s0, 2048  ;;  %p950_p2 = scmp.lt.u32.totalorder %s1145_s23, %s1281_s0 }
  0x32   : > { %p947_p13 = pnand %p946_p12, %p945_p11  ;;  %p951_p3 = scmp.lt.u32.totalorder %s949_s9, %s944_s6 }
  0x33   : > { %p953_p1 = scmp.lt.u32.totalorder %s944_s6, %s1145_s23 }
  0x34   : > { %p948_p0 = pneg %p947_p13  ;;  %p952_p6 = por %p951_p3, %p950_p2 }
  0x36   : > { %p954_p4 = por %p953_p1, %p952_p6 }
  0x38   : > { %p955_p5 = pnand %p954_p4, %p948_p0 }
  0x3a   : > { %958 = shalt.err (!%p955_p5)
}
  0x3b   : > { %s959_s12 = scalar_lea.vmem %s1151_s30, 1024  ;;  %s1033_s18 = smov [#allocation2]  }
  0x3c   : > { %p960_p8 = scmp.ne.s32.totalorder %s1151_s30, %s959_s12  ;;  %s964_s22 = sshll.u32 %s1033_s18, 4  ;;  %s965_s22 = int_to_ptr.vmem [resolvable:$false] %s964_s22 }
  0x3d   : > { %s966_s26 = scalar_lea.vmem %s965_s22, 2048  ;;  %p967_p11 = scmp.lt.s32.totalorder %s1151_s30, %s965_s22 }
  0x3e   : > { %p962_p9 = pnand %p960_p8, %p946_p12  ;;  %p968_p13 = scmp.lt.s32.totalorder %s966_s26, %s959_s12 }
  0x40   : > { %p963_p10 = pneg %p962_p9  ;;  %p969_p2 = por %p968_p13, %p967_p11 }
  0x42   : > { %p970_p3 = pnand %p969_p2, %p963_p10 }
  0x44   : > { %973 = shalt.err (!%p970_p3)
}
  0x45   : > { %s1034_s24 = smov 128   ;;  %s1035_s28 = smov 8  }
  0x46   : > { %858 = dma.hbm_to_vmem [thread:$0]  (!%p1147_p7), %s1145_s23, 1024, %s1151_s30, %s1153_s5, %s1034_s24, %s1034_s24, %s1035_s28  }
  0x47   : > { %p1294_p12 = scmp.ne.s32.totalorder %s1291_s21, 0 }
  0x48   : > { %s202_s29 = sand.u32 (!%p1294_p12), 1, %s1012_s13   ;;  %p1295_p0 = scmp.ne.s32.totalorder (!%p1294_p12), %s1290_s20, 0 }
  0x49   : > { %200 = sbr.rel (%p1294_p12) target bundleno = 363 (0x16b), region = 32  ;;  %s705_s6 = sshll.u32 (!%p1294_p12), %s202_s29, 6 }
  0x4a   : > { %s203_s7 = scalar_lea.sflag (!%p1294_p12), [#allocation3], %s202_s29  ;;  %s1184_s8 = scalar_lea.vmem (!%p1294_p12), [#allocation2], %s705_s6 }
  0x50   : > { %999 = dma.done.wait (%p1295_p0), %s203_s7, 1024  }
  0x51   : > { %1001 = vsyncadd (%p1295_p0), %s203_s7, 4294966272  ;;  %p1296_p6 = scmp.ne.s32.totalorder %s1289_s19, 0 }
  0x53   : > { %1003 = dma.done.wait (%p1296_p6), [#allocation5], 6144  }
  0x54   : > { %1005 = vsyncadd (%p1296_p6), [#allocation5], 4294961152  ;;  %v1036_v0 = vmov 0.0   ;;  %v270_v1 = vld [vmem:[#allocation4 + $0x8] sm:$0xff]  ;;  %v273_v2 = vld [vmem:[#allocation4 + $0x20] sm:$0xff]  ;;  %s707_s19 = sshll.u32 %s1020_s15, 3 }
  0x55   : > { %398 = vmatprep.mubr.f32.mxu0 %v1036_v0  ;;  %v269_v3 = vld [vmem:[#allocation4] sm:$0xff]  ;;  %v780_v4 = vpack.c.bf16 %v273_v2, %v270_v1  ;;  %v272_v5 = vld [vmem:[#allocation4 + $0x18] sm:$0xff]  ;;  %v279_v7 = vld [vmem:[#allocation4 + $0x50] sm:$0xff]  ;;  %p251_p7 = scmp.lt.s32.totalorder %s707_s19, 15 }
  0x56   : > { %v276_v6 = vld [vmem:[#allocation4 + $0x38] sm:$0xff]  ;;  %v782_v8 = vpack.c.bf16 %v272_v5, %v269_v3  ;;  %v275_v10 = vld [vmem:[#allocation4 + $0x30] sm:$0xff]  ;;  %v278_v11 = vld [vmem:[#allocation4 + $0x48] sm:$0xff] }
  0x57   : > { %v784_v9 = vpack.c.bf16 %v279_v7, %v276_v6  ;;  %v282_v12 = vld [vmem:[#allocation4 + $0x68] sm:$0xff]  ;;  %781 = vmatprep.subr.bf16.mxu0 %v780_v4  ;;  %v285_v13 = vld [vmem:[#allocation4 + $0x80] sm:$0xff]  ;;  %v786_v14 = vpack.c.bf16 %v278_v11, %v275_v10  ;;  %v284_v17 = vld [vmem:[#allocation4 + $0x78] sm:$0xff]  ;;  %s1305_s19 = smov (!%p251_p7, %s707_s19), 15 }
  0x58   : > { %783 = vmatpush1.bf16.msra.mxu0 %v782_v8  ;;  %v281_v15 = vld [vmem:[#allocation4 + $0x60] sm:$0xff]  ;;  %v788_v16 = vpack.c.bf16 %v285_v13, %v282_v12  ;;  %v271_v18 = vld [vmem:[#allocation4 + $0x10] sm:$0xff]  ;;  %v274_v19 = vld [vmem:[#allocation4 + $0x28] sm:$0xff]  ;;  %s844_s23 = smul.u32 24, %s1305_s19 }
  0x59   : > { %785 = vmatprep.subr.bf16.mxu0 %v784_v9  ;;  %v288_v20 = vld [vmem:[#allocation4 + $0x98] sm:$0xff]  ;;  %v291_v21 = vld [vmem:[#allocation4 + $0xb0] sm:$0xff]  ;;  %v812_v22 = vpack.c.bf16 %v274_v19, %v271_v18  ;;  %v277_v23 = vld [vmem:[#allocation4 + $0x40] sm:$0xff]  ;;  %v790_v25 = vpack.c.bf16 %v284_v17, %v281_v15  ;;  %v319_v18 = vlaneseq }
  0x5a   : > { %v280_v24 = vld [vmem:[#allocation4 + $0x58] sm:$0xff]  ;;  %v287_v26 = vld [vmem:[#allocation4 + $0x90] sm:$0xff]  ;;  %v792_v28 = vpack.c.bf16 %v291_v21, %v288_v20  ;;  %v290_v29 = vld [vmem:[#allocation4 + $0xa8] sm:$0xff]  ;;  %s1221_s15 = scalar_lea.vmem %s1284_s3, %s844_s23 }
  0x5b   : > { %813 = vmatprep.subr.bf16.mxu1 %v812_v22  ;;  %v816_v27 = vpack.c.bf16 %v280_v24, %v277_v23  ;;  %v283_v30 = vld [vmem:[#allocation4 + $0x70] sm:$0xff]  ;;  %v286_v31 = vld [vmem:[#allocation4 + $0x88] sm:$0xff]  ;;  %v297_v33 = vld [vmem:[#allocation4 + $0xe0] sm:$0xff]  ;;  %v794_v37 = vpack.c.bf16 %v290_v29, %v287_v26  ;;  %v320_v19 = vshrl.u32 %v319_v18, 7 }
  0x5c   : > { %787 = vmatpush1.bf16.msra.mxu0 %v786_v14  ;;  %815 = vmatpush3.bf16.msra.mxu1 %v812_v22  ;;  %v294_v32 = vld [vmem:[#allocation4 + $0xc8] sm:$0xff]  ;;  %v820_v34 = vpack.c.bf16 %v286_v31, %v283_v30  ;;  %v289_v35 = vld [vmem:[#allocation4 + $0xa0] sm:$0xff]  ;;  %v292_v36 = vld [vmem:[#allocation4 + $0xb8] sm:$0xff] }
  0x5d   : > { %789 = vmatprep.subr.bf16.mxu0 %v788_v16  ;;  %817 = vmatprep.subr.bf16.mxu1 %v816_v27  ;;  %v796_v38 = vpack.c.bf16 %v297_v33, %v294_v32  ;;  %v293_v39 = vld [vmem:[#allocation4 + $0xc0] sm:$0xff]  ;;  %v296_v40 = vld [vmem:[#allocation4 + $0xd8] sm:$0xff]  ;;  %v303_v42 = vld [vmem:[#allocation4 + $0x110] sm:$0xff]  ;;  %v824_v43 = vpack.c.bf16 %v292_v36, %v289_v35  ;;  %v321_v20 = vsub.s32 0, %v320_v19  ;;  %v325_v22 = vsub.s32 1, %v320_v19 }
  0x5e   : > { %v300_v41 = vld [vmem:[#allocation4 + $0xf8] sm:$0xff]  ;;  %v261_v44 = vld [vmem:[%s1184_s8] sm:$0xff]  ;;  %v295_v45 = vld [vmem:[#allocation4 + $0xd0] sm:$0xff]  ;;  %v798_v47 = vpack.c.bf16 %v296_v40, %v293_v39 }
  0x5f   : > { %v298_v46 = vld [vmem:[#allocation4 + $0xe8] sm:$0xff]  ;;  %768 = vmatprep.mubr.f32.mxu1 %v261_v44  ;;  %v800_v48 = vpack.c.bf16 %v303_v42, %v300_v41  ;;  %v299_v49 = vld [vmem:[#allocation4 + $0xf0] sm:$0xff]  ;;  %v309_v52 = vld [vmem:[#allocation4 + $0x140] sm:$0xff] }
  0x60   : > { %791 = vmatpush1.bf16.msra.mxu0 %v790_v25  ;;  %819 = vmatpush3.bf16.msra.mxu1 %v816_v27  ;;  %v302_v50 = vld [vmem:[#allocation4 + $0x108] sm:$0xff]  ;;  %v828_v53 = vpack.c.bf16 %v298_v46, %v295_v45  ;;  %v301_v54 = vld [vmem:[#allocation4 + $0x100] sm:$0xff]  ;;  %v304_v55 = vld [vmem:[#allocation4 + $0x118] sm:$0xff]  ;;  %v329_v25 = vsub.s32 2, %v320_v19 }
  0x61   : > { %793 = vmatprep.subr.bf16.mxu0 %v792_v28  ;;  %821 = vmatprep.subr.bf16.mxu1 %v820_v34  ;;  %v306_v51 = vld [vmem:[#allocation4 + $0x128] sm:$0xff]  ;;  %v802_v56 = vpack.c.bf16 %v302_v50, %v299_v49  ;;  %v305_v58 = vld [vmem:[#allocation4 + $0x120] sm:$0xff]  ;;  %v308_v59 = vld [vmem:[#allocation4 + $0x138] sm:$0xff]  ;;  %v832_v62 = vpack.c.bf16 %v304_v55, %v301_v54 }
  0x62   : > { %v804_v57 = vpack.c.bf16 %v309_v52, %v306_v51  ;;  %v312_v60 = vld [vmem:[#allocation4 + $0x158] sm:$0xff]  ;;  %v315_v61 = vld [vmem:[#allocation4 + $0x170] sm:$0xff]  ;;  %v310_v1 = vld [vmem:[#allocation4 + $0x148] sm:$0xff]  ;;  %v806_v2 = vpack.c.bf16 %v308_v59, %v305_v58 }
  0x63   : > { %v307_v63 = vld [vmem:[#allocation4 + $0x130] sm:$0xff]  ;;  %v808_v3 = vpack.c.bf16 %v315_v61, %v312_v60  ;;  %v314_v5 = vld [vmem:[#allocation4 + $0x168] sm:$0xff]  ;;  %v313_v7 = vld [vmem:[#allocation4 + $0x160] sm:$0xff] }
  0x64   : > { %795 = vmatpush1.bf16.msra.mxu0 %v794_v37  ;;  %823 = vmatpush3.bf16.msra.mxu1 %v820_v34  ;;  %v311_v4 = vld [vmem:[#allocation4 + $0x150] sm:$0xff]  ;;  %v836_v6 = vpack.c.bf16 %v310_v1, %v307_v63  ;;  %v316_v8 = vld [vmem:[#allocation4 + $0x178] sm:$0xff]  ;;  %v262_v11 = vld [vmem:[%s1184_s8 + $0x8] sm:$0xff] }
  0x65   : > { %797 = vmatprep.subr.bf16.mxu0 %v796_v38  ;;  %825 = vmatprep.subr.bf16.mxu1 %v824_v43  ;;  %v810_v9 = vpack.c.bf16 %v314_v5, %v311_v4  ;;  %v840_v10 = vpack.c.bf16 %v316_v8, %v313_v7  ;;  %v263_v12 = vld [vmem:[%s1184_s8 + $0x10] sm:$0xff]  ;;  %v264_v13 = vld [vmem:[%s1184_s8 + $0x18] sm:$0xff]  ;;  %v265_v14 = vld [vmem:[%s1184_s8 + $0x20] sm:$0xff] }
  0x66   : > { %v266_v15 = vld [vmem:[%s1184_s8 + $0x28] sm:$0xff]  ;;  %v267_v16 = vld [vmem:[%s1184_s8 + $0x30] sm:$0xff]  ;;  %v268_v17 = vld [vmem:[%s1184_s8 + $0x38] sm:$0xff] }
  0x67   : > { %v317_v21 = vld [vmem:[%s1283_s2] sm:$0x7] }
  0x68   : > { %799 = vmatpush1.bf16.msra.mxu0 %v798_v47  ;;  %827 = vmatpush3.bf16.msra.mxu1 %v824_v43  ;;  %v1214_v23 = vrot.slane %v317_v21, %v321_v20  ;;  %v1216_v24 = vrot.slane %v317_v21, %v325_v22  ;;  %v330_v29 = vrot.slane %v317_v21, %v329_v25 }
  0x69   : > { %801 = vmatprep.subr.bf16.mxu0 %v800_v48  ;;  %829 = vmatprep.subr.bf16.mxu1 %v828_v53 }
  0x6c   : > { %803 = vmatpush1.bf16.msra.mxu0 %v802_v56  ;;  %831 = vmatpush3.bf16.msra.mxu1 %v828_v53 }
  0x6d   : > { %805 = vmatprep.subr.bf16.mxu0 %v804_v57  ;;  %833 = vmatprep.subr.bf16.mxu1 %v832_v62 }
  0x70   : > { %807 = vmatpush1.bf16.msra.mxu0 %v806_v2  ;;  %835 = vmatpush3.bf16.msra.mxu1 %v832_v62 }
  0x71   : > { %809 = vmatprep.subr.bf16.mxu0 %v808_v3  ;;  %837 = vmatprep.subr.bf16.mxu1 %v836_v6 }
  0x74   : > { %811 = vmatpush1.bf16.msra.mxu0 %v810_v9  ;;  %839 = vmatpush3.bf16.msra.mxu1 %v836_v6 }
  0x75   : > { %841 = vmatprep.subr.bf16.mxu1 %v840_v10 }
  0x77   : > { %399 = vmatmul.mubr.f32.vlgmr.msra.gmra.mrb[0].mxu0 %v261_v44 }
  0x78   : > { %404 = vmatprep.mubr.f32.mxu0 %v1036_v0  ;;  %843 = vmatpush3.bf16.msra.mxu1 %v840_v10 }
  0x7b   : > { %405 = vmatmul.mubr.f32.gmra.mrb[2].mxu0 %v262_v11  ;;  %769 = vmatmul.mubr.f32.vlgmr.msra.gmra.mrb[0].mxu1 %v262_v11 }
  0x7c   : > { %410 = vmatprep.mubr.f32.mxu0 %v1036_v0  ;;  %771 = vmatprep.mubr.f32.mxu1 %v263_v12 }
  0x7f   : > { %411 = vmatmul.mubr.f32.gmra.mrb[4].mxu0 %v263_v12  ;;  %772 = vmatmul.mubr.f32.gmra.mrb[2].mxu1 %v264_v13 }
  0x80   : > { %416 = vmatprep.mubr.f32.mxu0 %v1036_v0  ;;  %774 = vmatprep.mubr.f32.mxu1 %v265_v14 }
  0x83   : > { %417 = vmatmul.mubr.f32.gmra.mrb[6].mxu0 %v264_v13  ;;  %775 = vmatmul.mubr.f32.gmra.mrb[4].mxu1 %v266_v15 }
  0x84   : > { %422 = vmatprep.mubr.f32.mxu0 %v1036_v0  ;;  %777 = vmatprep.mubr.f32.mxu1 %v267_v16 }
  0x87   : > { %423 = vmatmul.mubr.f32.gmra.mrb[8].mxu0 %v265_v14  ;;  %778 = vmatmul.mubr.f32.gmra.mrb[6].mxu1 %v268_v17 }
  0x88   : > { %428 = vmatprep.mubr.f32.mxu0 %v1036_v0 }
  0x8b   : > { %429 = vmatmul.mubr.f32.gmra.mrb[10].mxu0 %v266_v15 }
  0x8c   : > { %434 = vmatprep.mubr.f32.mxu0 %v1036_v0 }
  0x8f   : > { %435 = vmatmul.mubr.f32.gmra.mrb[12].mxu0 %v267_v16 }
  0x90   : > { %440 = vmatprep.mubr.f32.mxu0 %v1036_v0 }
  0x93   : > { %441 = vmatmul.mubr.f32.gmra.mrb[14].mxu0 %v268_v17 }
 0x14a   : > { %v400_v0 = vpop.f32.mrb[0].mxu0 }
 0x14b   : > { %v401_v26 = vadd.f32 %v400_v0, %v1214_v23  ;;  %v402_v27 = vpop.f32.mrb[1].mxu0 }
 0x14c   : > { %v403_v28 = vadd.f32 %v402_v27, %v1216_v24 }
 0x14d   : > { %552 = vst [vmem:[%s1221_s15] sm:$0xff] %v401_v26 }
 0x14e   : > { %553 = vst [vmem:[%s1221_s15 + $0x8] sm:$0xff] %v403_v28  ;;  %v406_v30 = vpop.f32.mrb[2].mxu0  ;;  %v770_v33 = vpop.f32.mrb[0].mxu1 }
 0x14f   : > { %v407_v31 = vadd.f32 %v406_v30, %v1214_v23  ;;  %v408_v32 = vpop.f32.mrb[3].mxu0  ;;  %v519_v35 = vadd.f32 %v770_v33, %v330_v29  ;;  %v513_v36 = vpop.f32.mrb[1].mxu1 }
 0x150   : > { %v409_v34 = vadd.f32 %v408_v32, %v1216_v24  ;;  %v514_v37 = vadd.f32 %v513_v36, %v330_v29 }
 0x151   : > { %555 = vst [vmem:[%s1221_s15 + $0x18] sm:$0xff] %v407_v31  ;;  %557 = vst [vmem:[%s1221_s15 + $0x28] sm:$0xff] %v519_v35 }
 0x152   : > { %556 = vst [vmem:[%s1221_s15 + $0x20] sm:$0xff] %v409_v34  ;;  %v412_v38 = vpop.f32.mrb[4].mxu0  ;;  %554 = vst [vmem:[%s1221_s15 + $0x10] sm:$0xff] %v514_v37  ;;  %v773_v41 = vpop.f32.mrb[2].mxu1 }
 0x153   : > { %v413_v39 = vadd.f32 %v412_v38, %v1214_v23  ;;  %v414_v40 = vpop.f32.mrb[5].mxu0  ;;  %v529_v43 = vadd.f32 %v773_v41, %v330_v29  ;;  %v523_v44 = vpop.f32.mrb[3].mxu1 }
 0x154   : > { %v415_v42 = vadd.f32 %v414_v40, %v1216_v24  ;;  %v524_v45 = vadd.f32 %v523_v44, %v330_v29 }
 0x155   : > { %558 = vst [vmem:[%s1221_s15 + $0x30] sm:$0xff] %v413_v39  ;;  %563 = vst [vmem:[%s1221_s15 + $0x58] sm:$0xff] %v529_v43 }
 0x156   : > { %559 = vst [vmem:[%s1221_s15 + $0x38] sm:$0xff] %v415_v42  ;;  %v418_v46 = vpop.f32.mrb[6].mxu0  ;;  %560 = vst [vmem:[%s1221_s15 + $0x40] sm:$0xff] %v524_v45  ;;  %v776_v49 = vpop.f32.mrb[4].mxu1 }
 0x157   : > { %v419_v47 = vadd.f32 %v418_v46, %v1214_v23  ;;  %v420_v48 = vpop.f32.mrb[7].mxu0  ;;  %v539_v51 = vadd.f32 %v776_v49, %v330_v29  ;;  %v533_v52 = vpop.f32.mrb[5].mxu1 }
 0x158   : > { %v421_v50 = vadd.f32 %v420_v48, %v1216_v24  ;;  %v534_v53 = vadd.f32 %v533_v52, %v330_v29 }
 0x159   : > { %561 = vst [vmem:[%s1221_s15 + $0x48] sm:$0xff] %v419_v47  ;;  %569 = vst [vmem:[%s1221_s15 + $0x88] sm:$0xff] %v539_v51 }
 0x15a   : > { %562 = vst [vmem:[%s1221_s15 + $0x50] sm:$0xff] %v421_v50  ;;  %v424_v54 = vpop.f32.mrb[8].mxu0  ;;  %566 = vst [vmem:[%s1221_s15 + $0x70] sm:$0xff] %v534_v53  ;;  %v779_v57 = vpop.f32.mrb[6].mxu1 }
 0x15b   : > { %v425_v55 = vadd.f32 %v424_v54, %v1214_v23  ;;  %v426_v56 = vpop.f32.mrb[9].mxu0  ;;  %v549_v59 = vadd.f32 %v779_v57, %v330_v29  ;;  %v543_v60 = vpop.f32.mrb[7].mxu1 }
 0x15c   : > { %v427_v58 = vadd.f32 %v426_v56, %v1216_v24  ;;  %v544_v61 = vadd.f32 %v543_v60, %v330_v29 }
 0x15d   : > { %564 = vst [vmem:[%s1221_s15 + $0x60] sm:$0xff] %v425_v55  ;;  %575 = vst [vmem:[%s1221_s15 + $0xb8] sm:$0xff] %v549_v59 }
 0x15e   : > { %565 = vst [vmem:[%s1221_s15 + $0x68] sm:$0xff] %v427_v58  ;;  %v430_v62 = vpop.f32.mrb[10].mxu0  ;;  %572 = vst [vmem:[%s1221_s15 + $0xa0] sm:$0xff] %v544_v61 }
 0x15f   : > { %v431_v63 = vadd.f32 %v430_v62, %v1214_v23  ;;  %v432_v1 = vpop.f32.mrb[11].mxu0 }
 0x160   : > { %v433_v2 = vadd.f32 %v432_v1, %v1216_v24 }
 0x161   : > { %567 = vst [vmem:[%s1221_s15 + $0x78] sm:$0xff] %v431_v63 }
 0x162   : > { %568 = vst [vmem:[%s1221_s15 + $0x80] sm:$0xff] %v433_v2  ;;  %v436_v3 = vpop.f32.mrb[12].mxu0 }
 0x163   : > { %v437_v4 = vadd.f32 %v436_v3, %v1214_v23  ;;  %v438_v5 = vpop.f32.mrb[13].mxu0 }
 0x164   : > { %v439_v6 = vadd.f32 %v438_v5, %v1216_v24 }
 0x165   : > { %570 = vst [vmem:[%s1221_s15 + $0x90] sm:$0xff] %v437_v4 }
 0x166   : > { %571 = vst [vmem:[%s1221_s15 + $0x98] sm:$0xff] %v439_v6  ;;  %v442_v7 = vpop.f32.mrb[14].mxu0 }
 0x167   : > { %v443_v8 = vadd.f32 %v442_v7, %v1214_v23  ;;  %v444_v9 = vpop.f32.mrb[15].mxu0 }
 0x168   : > { %v445_v10 = vadd.f32 %v444_v9, %v1216_v24 }
 0x169   : > { %573 = vst [vmem:[%s1221_s15 + $0xa8] sm:$0xff] %v443_v8 }
 0x16a   : > { %574 = vst [vmem:[%s1221_s15 + $0xb0] sm:$0xff] %v445_v10 }
 0x16b PF: > { %s17_s17 = sadd.s32 1, %s1028_s17   ;;  %s1297_s12 = smov %s1012_s13 }
 0x16c   : > { %p14_p1 = scmp.ge.s32.totalorder %s17_s17, 4   ;;  %s1298_s13 = smov %s1016_s14 }
 0x16d   : > { %s1299_s14 = smov %s1140_s27  ;;  %s1300_s15 = smov %s1024_s16 }
 0x16e   : > { %s1301_s16 = smov %s1303_s25  ;;  %16 = sbr.rel (!%p14_p1) target bundleno = 5 (0x5), region = 80 }
 0x175   :  { %609 = vsyncpa [#allocation3], 1 }
 0x176   :  { %611 = vsyncpa [#allocation3 + $0x1], 1 }
 0x177   :  { %612 = vsyncpa [#allocation5], 1 }

// kernel: encoder_layer_forward.5
= control target key start
LH: loop header
LB: loop body
LE: loop exit
PB: predicated region body
PF: predicated region fallthrough
CT: control target
= control target key end

     0   :  { %s2849_s6 = smov 0   ;;  %s3577_s0 = inlined_call_operand.vmem [shape: f32[2,64,384], index: 0, kind: input, shape index: {}]   ;;  %s3578_s1 = inlined_call_operand.vmem [shape: f32[2,64,128], index: 1, kind: output, shape index: {}]  }
   0x1 LB: > { %s1943_s7 = sadd.s32 4294967295, %s2834_s6   ;;  %p1947_p0 = scmp.ge.s32.totalorder %s2834_s6, 1  ;;  %s2834_s6 = sphi %s2849_s6, %s11_s6  }
   0x2   : > { %p87_p1 = scmp.lt.s32.totalorder %s2834_s6, 3 }
   0x4   : > { %p88_p2 = pnand %p1947_p0, %p87_p1 }
   0x6   : > { %91 = sbr.rel (%p88_p2) target bundleno = 2072 (0x818), region = 24 }
   0xd   : > { %p107_p3 = scmp.lt.s32.totalorder %s1943_s7, 1  ;;  %vm149_vm0 = vcmask 261120   ;;  %s2836_s12 = smov 96   ;;  %vm303_vm2 = vcmask 523264   ;;  %vm1871_vm3 = vcmask 785408  }
   0xe   : > { %vm2867_vm1 = vmpackc.low %vm149_vm0, %vm149_vm0  ;;  %s2837_s13 = smov 64   ;;  %s2838_s14 = smov 32  }
   0xf   : > { %s3588_s7 = smov (!%p107_p3, %s1943_s7), 1 }
  0x10   : > { %s2562_s8 = smul.u32 192, %s3588_s7  ;;  %s2049_s15 = sshll.u32 %s3588_s7, 6 }
  0x11   : > { %s3533_s18 = scalar_lea.vmem %s3578_s1, %s2049_s15 }
  0x12   : > { %s2863_s11 = scalar_lea.vmem %s3577_s0, %s2562_s8 }
  0x13   : > { %v133_v1 = vld [vmem:[%s2863_s11 + $0x8] sm:$0xff]  ;;  %v134_v2 = vld [vmem:[%s2863_s11 + $0x20] sm:$0xff]  ;;  %v2874_v3 = vld [vmem:[%s2863_s11 + $0x38] sm:$0xff] }
  0x14   : > { %v2402_v4 = vpack.c.bf16 %v134_v2, %v133_v1  ;;  %v2877_v5 = vld [vmem:[%s2863_s11 + $0x50] sm:$0xff]  ;;  %v2879_v6 = vpack.i.bf16 %v134_v2, %v133_v1  ;;  %v117_v8 = vld [vmem:[%s2863_s11] sm:$0xff]  ;;  %v2897_v10 = vld [vmem:[%s2863_s11 + $0x68] sm:$0xff] }
  0x15   : > { %v2408_v7 = vpack.c.bf16 %v2877_v5, %v2874_v3  ;;  %v2886_v9 = vmul.f32 0.17677669, %v117_v8  ;;  %v2900_v11 = vld [vmem:[%s2863_s11 + $0x80] sm:$0xff]  ;;  %v2909_v13 = vld [vmem:[%s2863_s11 + $0x98] sm:$0xff]  ;;  %v2912_v14 = vld [vmem:[%s2863_s11 + $0xb0] sm:$0xff]  ;;  %v3001_v1 = vpack.i.bf16 %v2877_v5, %v2874_v3 }
  0x16   : > { %2404 = vmatprep.subr.msk.bf16.mxu0 %vm2867_vm1, %v2402_v4  ;;  %2575 = vrot.lane.b32.xlu1 %v2879_v6, %s2836_s12  ;;  %v2414_v12 = vpack.c.bf16 %v2900_v11, %v2897_v10  ;;  %v2420_v15 = vpack.c.bf16 %v2912_v14, %v2909_v13  ;;  %v118_v16 = vld [vmem:[%s2863_s11 + $0x18] sm:$0xff]  ;;  %v119_v17 = vld [vmem:[%s2863_s11 + $0x30] sm:$0xff]  ;;  %v120_v20 = vld [vmem:[%s2863_s11 + $0x48] sm:$0xff]  ;;  %v2989_v62 = vpack.i.bf16 %v2900_v11, %v2897_v10 }
  0x17   : > { %2407 = vmatpush3.bf16.xpose.msk.msra.mxu0 %vm2867_vm1, %v2402_v4  ;;  %2194 = vmatprep.mubr.msk.f32.mxu0 %vm149_vm0, %v2886_v9  ;;  %v2924_v18 = vmul.f32 0.17677669, %v118_v16  ;;  %v2926_v19 = vmul.f32 0.17677669, %v119_v17  ;;  %v121_v21 = vld [vmem:[%s2863_s11 + $0x60] sm:$0xff]  ;;  %v122_v24 = vld [vmem:[%s2863_s11 + $0x78] sm:$0xff]  ;;  %v2995_v63 = vpack.i.bf16 %v2912_v14, %v2909_v13 }
  0x18   : > { %2410 = vmatprep.subr.msk.bf16.mxu0 %vm2867_vm1, %v2408_v7  ;;  %v2932_v22 = vmul.f32 0.17677669, %v120_v20  ;;  %v2936_v23 = vmul.f32 0.17677669, %v121_v21  ;;  %v123_v25 = vld [vmem:[%s2863_s11 + $0x90] sm:$0xff]  ;;  %v124_v28 = vld [vmem:[%s2863_s11 + $0xa8] sm:$0xff] }
  0x19   : > { %v2942_v26 = vmul.f32 0.17677669, %v122_v24  ;;  %v2946_v27 = vmul.f32 0.17677669, %v123_v25  ;;  %v2951_v29 = vmul.f32 0.17677669, %v124_v28 }
  0x1a   : > { %v2958_v30 = vld [vmem:[%s2863_s11 + $0x10] sm:$0xff]  ;;  %v2961_v31 = vld [vmem:[%s2863_s11 + $0x28] sm:$0xff]  ;;  %v2964_v32 = vld [vmem:[%s2863_s11 + $0x40] sm:$0xff] }
  0x1b   : > { %v2426_v33 = vpack.c.bf16 %v2961_v31, %v2958_v30  ;;  %v144_v34 = vld [vmem:[%s2863_s11 + $0x58] sm:$0xff]  ;;  %v145_v36 = vld [vmem:[%s2863_s11 + $0x70] sm:$0xff]  ;;  %v146_v37 = vld [vmem:[%s2863_s11 + $0x88] sm:$0xff]  ;;  %v3023_v2 = vpack.i.bf16 %v2961_v31, %v2958_v30 }
  0x1c   : > { %v2430_v35 = vpack.c.bf16 %v144_v34, %v2964_v32  ;;  %v2434_v38 = vpack.c.bf16 %v146_v37, %v145_v36  ;;  %v147_v40 = vld [vmem:[%s2863_s11 + $0xa0] sm:$0xff]  ;;  %v148_v41 = vld [vmem:[%s2863_s11 + $0xb8] sm:$0xff]  ;;  %v3026_v3 = vpack.i.bf16 %v144_v34, %v2964_v32  ;;  %v3032_v4 = vpack.i.bf16 %v146_v37, %v145_v36 }
  0x1d   : > { %2427 = vmatprep.subr.bf16.mxu1 %v2426_v33  ;;  %v2438_v44 = vpack.c.bf16 %v148_v41, %v147_v40  ;;  %v3034_v5 = vpack.i.bf16 %v148_v41, %v147_v40 }
  0x1e   : > { %2429 = vmatpush3.bf16.msra.mxu1 %v2426_v33 }
  0x1f   : > { %2413 = vmatpush3.bf16.xpose.msk.msra.mxu0 %vm2867_vm1, %v2408_v7  ;;  %2431 = vmatprep.subr.bf16.mxu1 %v2430_v35 }
  0x20   : > { %2416 = vmatprep.subr.msk.bf16.mxu0 %vm2867_vm1, %v2414_v12 }
  0x22   : > { %2433 = vmatpush3.bf16.msra.mxu1 %v2430_v35 }
  0x23   : > { %2435 = vmatprep.subr.bf16.mxu1 %v2434_v38 }
  0x26   : > { %2437 = vmatpush3.bf16.msra.mxu1 %v2434_v38 }
  0x27   : > { %2419 = vmatpush3.bf16.xpose.msk.msra.mxu0 %vm2867_vm1, %v2414_v12  ;;  %2439 = vmatprep.subr.bf16.mxu1 %v2438_v44 }
  0x28   : > { %2422 = vmatprep.subr.msk.bf16.mxu0 %vm2867_vm1, %v2420_v15 }
  0x2a   : > { %2441 = vmatpush3.bf16.msra.mxu1 %v2438_v44 }
  0x2f   : > { %2425 = vmatpush3.bf16.xpose.msk.msra.mxu0 %vm2867_vm1, %v2420_v15 }
  0x36   : > { %2195 = vmatmul.mubr.msk.f32.vlgmr.msra.gmra.mrb[0].mxu0 %vm149_vm0, %v2924_v18 }
  0x37   : > { %2197 = vmatprep.mubr.msk.f32.mxu0 %vm149_vm0, %v2926_v19 }
  0x3a   : > { %2198 = vmatmul.mubr.msk.f32.gmra.mrb[2].mxu0 %vm149_vm0, %v2932_v22 }
  0x3b   : > { %2200 = vmatprep.mubr.msk.f32.mxu0 %vm149_vm0, %v2936_v23 }
  0x3e   : > { %2201 = vmatmul.mubr.msk.f32.gmra.mrb[4].mxu0 %vm149_vm0, %v2942_v26 }
  0x3f   : > { %2203 = vmatprep.mubr.msk.f32.mxu0 %vm149_vm0, %v2946_v27 }
  0x42   : > { %2204 = vmatmul.mubr.msk.f32.gmra.mrb[6].mxu0 %vm149_vm0, %v2951_v29 }
  0x88   : > { %v2576_v39 = vpop.permute.xlu1 %2575 }
  0x89   : > { %v2578_v42 = vunpack.i.h.bf16 %v2576_v39  ;;  %v2577_v43 = vunpack.i.l.bf16 %v2576_v39 }
  0x8b   : > { %v2974_v45 = vpack.c.bf16 %v2578_v42, %v2577_v43 }
  0x8d   : > { %2444 = vmatprep.subr.msk.bf16.mxu1 %vm2867_vm1, %v2974_v45 }
 0x109   : > { %v2196_v46 = vpop.f32.mrb[0].mxu0 }
 0x10a   : > { %v264_v47 = vpop.f32.mrb[1].mxu0  ;;  %v307_v48 = vsel %vm303_vm2, %v2196_v46, -inf }
 0x10b   : > { %308 = vmax.xlane.f32.xlu0 %v307_v48  ;;  %v304_v50 = vsel %vm303_vm2, %v264_v47, -inf }
 0x10d   : > { %v2199_v49 = vpop.f32.mrb[2].mxu0 }
 0x10e   : > { %v313_v51 = vsel %vm303_vm2, %v2199_v49, -inf  ;;  %v274_v52 = vpop.f32.mrb[3].mxu0 }
 0x10f   : > { %305 = vmax.xlane.f32.xlu0 %v304_v50  ;;  %314 = vmax.xlane.f32.xlu1 %v313_v51  ;;  %v310_v55 = vsel %vm303_vm2, %v274_v52, -inf }
 0x111   : > { %v2202_v53 = vpop.f32.mrb[4].mxu0 }
 0x112   : > { %v284_v54 = vpop.f32.mrb[5].mxu0  ;;  %v319_v58 = vsel %vm303_vm2, %v2202_v53, -inf }
 0x113   : > { %311 = vmax.xlane.f32.xlu1 %v310_v55  ;;  %v316_v56 = vsel %vm303_vm2, %v284_v54, -inf }
 0x114   : > { %317 = vmax.xlane.f32.xlu0 %v316_v56 }
 0x115   : > { %v2205_v57 = vpop.f32.mrb[6].mxu0 }
 0x116   : > { %v325_v59 = vsel %vm303_vm2, %v2205_v57, -inf  ;;  %v294_v60 = vpop.f32.mrb[7].mxu0 }
 0x117   : > { %320 = vmax.xlane.f32.xlu1 %v319_v58  ;;  %v322_v61 = vsel %vm303_vm2, %v294_v60, -inf }
 0x118   : > { %326 = vmax.xlane.f32.xlu0 %v325_v59 }
 0x11c   : > { %323 = vmax.xlane.f32.xlu0 %v322_v61 }
 0x128   : > { %2585 = vrot.lane.b32.xlu1 %v2989_v62, %s2836_s12 }
 0x12c   : > { %2590 = vrot.lane.b32.xlu1 %v2995_v63, %s2836_s12 }
 0x130   : > { %521 = vrot.lane.b32.xlu1 %v2886_v9, %s2836_s12 }
 0x132   : > { %2580 = vrot.lane.b32.xlu0 %v3001_v1, %s2836_s12 }
 0x134   : > { %523 = vrot.lane.b32.xlu1 %v2924_v18, %s2836_s12 }
 0x136   : > { %525 = vrot.lane.b32.xlu0 %v2926_v19, %s2836_s12 }
 0x138   : > { %527 = vrot.lane.b32.xlu1 %v2932_v22, %s2836_s12 }
 0x13a   : > { %529 = vrot.lane.b32.xlu0 %v2936_v23, %s2836_s12 }
 0x13c   : > { %531 = vrot.lane.b32.xlu1 %v2942_v26, %s2836_s12 }
 0x13e   : > { %533 = vrot.lane.b32.xlu0 %v2946_v27, %s2836_s12 }
 0x140   : > { %535 = vrot.lane.b32.xlu1 %v2951_v29, %s2836_s12 }
 0x142   : > { %2595 = vrot.lane.b32.xlu0 %v3023_v2, %s2836_s12 }
 0x144   : > { %2600 = vrot.lane.b32.xlu1 %v3026_v3, %s2836_s12 }
 0x146   : > { %2605 = vrot.lane.b32.xlu0 %v3032_v4, %s2836_s12 }
 0x148   : > { %2610 = vrot.lane.b32.xlu1 %v3034_v5, %s2836_s12 }
 0x198   : > { %v309_v7 = vpop.xlane.xlu0 %308 }
 0x199   : > { %v329_v8 = vsub.f32 %v2196_v46, %v309_v7 }
 0x19b   : > { %v338_v14 = vmul.f32 1.442695, %v329_v8 }
 0x19c   : > { %v306_v10 = vpop.xlane.xlu0 %305  ;;  %v315_v11 = vpop.xlane.xlu1 %314 }
 0x19d   : > { %v328_v12 = vsub.f32 %v264_v47, %v306_v10  ;;  %v331_v13 = vsub.f32 %v2199_v49, %v315_v11 }
 0x19f   : > { %v336_v15 = vmul.f32 1.442695, %v328_v12  ;;  %v342_v16 = vmul.f32 1.442695, %v331_v13 }
 0x1a0   : > { %v312_v17 = vpop.xlane.xlu1 %311 }
 0x1a1   : > { %2694 = vpow2.f32 %v336_v15  ;;  %v330_v20 = vsub.f32 %v274_v52, %v312_v17  ;;  %v318_v21 = vpop.xlane.xlu0 %317 }
 0x1a2   : > { %2696 = vpow2.f32 %v338_v14  ;;  %v332_v24 = vsub.f32 %v284_v54, %v318_v21 }
 0x1a3   : > { %v340_v25 = vmul.f32 1.442695, %v330_v20  ;;  %2698 = vpow2.f32 %v342_v16 }
 0x1a4   : > { %v344_v28 = vmul.f32 1.442695, %v332_v24  ;;  %v321_v30 = vpop.xlane.xlu1 %320 }
 0x1a5   : > { %2700 = vpow2.f32 %v340_v25  ;;  %v333_v31 = vsub.f32 %v2202_v53, %v321_v30  ;;  %v327_v32 = vpop.xlane.xlu0 %326 }
 0x1a6   : > { %2702 = vpow2.f32 %v344_v28  ;;  %v335_v34 = vsub.f32 %v2205_v57, %v327_v32 }
 0x1a7   : > { %v346_v33 = vmul.f32 1.442695, %v333_v31 }
 0x1a8   : > { %v350_v38 = vmul.f32 1.442695, %v335_v34  ;;  %v2586_v41 = vpop.permute.xlu1 %2585 }
 0x1a9   : > { %2704 = vpow2.f32 %v346_v33  ;;  %v324_v35 = vpop.xlane.xlu0 %323  ;;  %v2588_v48 = vunpack.i.h.bf16 %v2586_v41  ;;  %v2587_v49 = vunpack.i.l.bf16 %v2586_v41 }
 0x1aa   : > { %v334_v36 = vsub.f32 %v294_v60, %v324_v35 }
 0x1ab   : > { %v3040_v37 = vpop.eup %2694  ;;  %v2454_v52 = vpack.c.bf16 %v2588_v48, %v2587_v49 }
 0x1ac   : > { %v3042_v39 = vpop.eup %2696  ;;  %v348_v40 = vmul.f32 1.442695, %v334_v36  ;;  %2222 = vmatprep.mubr.msk.f32.mxu1 %vm303_vm2, %v3040_v37  ;;  %v2591_v53 = vpop.permute.xlu1 %2590 }
 0x1ad   : > { %2223 = vmatmul.mubr.msk.f32.vlgmr.msra.gmra.mrb[0].mxu1 %vm303_vm2, %v3042_v39  ;;  %v2581_v42 = vpop.permute.xlu0 %2580  ;;  %v3048_v43 = vpop.eup %2698  ;;  %v2593_v54 = vunpack.i.h.bf16 %v2591_v53  ;;  %v2592_v55 = vunpack.i.l.bf16 %v2591_v53 }
 0x1ae   : > { %2706 = vpow2.f32 %v348_v40  ;;  %2447 = vmatpush3.bf16.xpose.msk.msra.mxu1 %vm2867_vm1, %v2974_v45  ;;  %v2583_v44 = vunpack.i.h.bf16 %v2581_v42  ;;  %v2582_v46 = vunpack.i.l.bf16 %v2581_v42 }
 0x1af   : > { %v3053_v47 = vpop.eup %2700  ;;  %2708 = vpow2.f32 %v350_v38  ;;  %v2460_v59 = vpack.c.bf16 %v2593_v54, %v2592_v55 }
 0x1b0   : > { %v3055_v50 = vpop.eup %2702  ;;  %v2448_v51 = vpack.c.bf16 %v2583_v44, %v2582_v46  ;;  %2225 = vmatprep.mubr.msk.f32.mxu1 %vm303_vm2, %v3053_v47  ;;  %v522_v57 = vpop.permute.xlu1 %521 }
 0x1b1   : > { %2226 = vmatmul.mubr.msk.f32.gmra.mrb[2].mxu1 %vm303_vm2, %v3048_v43  ;;  %v526_v61 = vpop.permute.xlu0 %525 }
 0x1b2   : > { %2228 = vmatprep.mubr.msk.f32.mxu1 %vm303_vm2, %v3055_v50  ;;  %2450 = vmatprep.subr.msk.bf16.mxu1 %vm2867_vm1, %v2448_v51 }
 0x1b3   : > { %v3065_v45 = vpop.eup %2704 }
 0x1b4   : > { %v524_v60 = vpop.permute.xlu1 %523 }
 0x1b5   : > { %2229 = vmatmul.mubr.msk.f32.gmra.mrb[4].mxu1 %vm303_vm2, %v3065_v45  ;;  %v530_v8 = vpop.permute.xlu0 %529 }
 0x1b6   : > { %2453 = vmatpush3.bf16.xpose.msk.msra.mxu1 %vm2867_vm1, %v2448_v51 }
 0x1b7   : > { %2456 = vmatprep.subr.msk.bf16.mxu1 %vm2867_vm1, %v2454_v52 }
 0x1b8   : > { %v3073_v56 = vpop.eup %2706  ;;  %v528_v7 = vpop.permute.xlu1 %527 }
 0x1b9   : > { %v3075_v58 = vpop.eup %2708  ;;  %2231 = vmatprep.mubr.msk.f32.mxu1 %vm303_vm2, %v3073_v56  ;;  %v534_v11 = vpop.permute.xlu0 %533 }
 0x1ba   : > { %2232 = vmatmul.mubr.msk.f32.gmra.mrb[6].mxu1 %vm303_vm2, %v3075_v58 }
 0x1bb   : > { %2250 = vmatprep.mubr.msk.f32.mxu1 %vm149_vm0, %v522_v57 }
 0x1bc   : > { %v532_v10 = vpop.permute.xlu1 %531 }
 0x1bd   : > { %v2596_v13 = vpop.permute.xlu0 %2595 }
 0x1be   : > { %2459 = vmatpush3.bf16.xpose.msk.msra.mxu1 %vm2867_vm1, %v2454_v52  ;;  %v2598_v15 = vunpack.i.h.bf16 %v2596_v13  ;;  %v2597_v16 = vunpack.i.l.bf16 %v2596_v13 }
 0x1bf   : > { %2462 = vmatprep.subr.msk.bf16.mxu1 %vm2867_vm1, %v2460_v59 }
 0x1c0   : > { %v536_v12 = vpop.permute.xlu1 %535  ;;  %v2466_v21 = vpack.c.bf16 %v2598_v15, %v2597_v16 }
 0x1c1   : > { %v2606_v25 = vpop.permute.xlu0 %2605 }
 0x1c2   : > { %2467 = vmatprep.subr.bf16.mxu0 %v2466_v21  ;;  %v2608_v30 = vunpack.i.h.bf16 %v2606_v25  ;;  %v2607_v31 = vunpack.i.l.bf16 %v2606_v25 }
 0x1c3   : > { %2469 = vmatpush3.bf16.msra.mxu0 %v2466_v21 }
 0x1c4   : > { %v2601_v14 = vpop.permute.xlu1 %2600  ;;  %v2474_v34 = vpack.c.bf16 %v2608_v30, %v2607_v31 }
 0x1c5   : > { %v2603_v17 = vunpack.i.h.bf16 %v2601_v14  ;;  %v2602_v20 = vunpack.i.l.bf16 %v2601_v14 }
 0x1c6   : > { %2465 = vmatpush3.bf16.xpose.msk.msra.mxu1 %vm2867_vm1, %v2460_v59 }
 0x1c7   : > { %v2470_v24 = vpack.c.bf16 %v2603_v17, %v2602_v20 }
 0x1c8   : > { %v2611_v28 = vpop.permute.xlu1 %2610 }
 0x1c9   : > { %2471 = vmatprep.subr.bf16.mxu0 %v2470_v24  ;;  %v2613_v32 = vunpack.i.h.bf16 %v2611_v28  ;;  %v2612_v33 = vunpack.i.l.bf16 %v2611_v28 }
 0x1ca   : > { %2473 = vmatpush3.bf16.msra.mxu0 %v2470_v24 }
 0x1cb   : > { %2475 = vmatprep.subr.bf16.mxu0 %v2474_v34  ;;  %v2478_v35 = vpack.c.bf16 %v2613_v32, %v2612_v33 }
 0x1cd   : > { %2251 = vmatmul.mubr.msk.f32.vlgmr.msra.gmra.mrb[8].mxu1 %vm149_vm0, %v524_v60 }
 0x1ce   : > { %2253 = vmatprep.mubr.msk.f32.mxu1 %vm149_vm0, %v526_v61  ;;  %2477 = vmatpush3.bf16.msra.mxu0 %v2474_v34 }
 0x1cf   : > { %2479 = vmatprep.subr.bf16.mxu0 %v2478_v35 }
 0x1d1   : > { %2254 = vmatmul.mubr.msk.f32.gmra.mrb[10].mxu1 %vm149_vm0, %v528_v7 }
 0x1d2   : > { %2256 = vmatprep.mubr.msk.f32.mxu1 %vm149_vm0, %v530_v8  ;;  %2481 = vmatpush3.bf16.msra.mxu0 %v2478_v35 }
 0x1d5   : > { %2257 = vmatmul.mubr.msk.f32.gmra.mrb[12].mxu1 %vm149_vm0, %v532_v10 }
 0x1d6   : > { %2259 = vmatprep.mubr.msk.f32.mxu1 %vm149_vm0, %v534_v11 }
 0x1d9   : > { %2260 = vmatmul.mubr.msk.f32.gmra.mrb[14].mxu1 %vm149_vm0, %v536_v12 }
 0x280   : > { %v3095_v36 = vpop.f32.mrb[0].mxu1 }
 0x281   : > { %v3097_v38 = vpop.f32.mrb[1].mxu1 }
 0x284   : > { %v3099_v40 = vpop.f32.mrb[2].mxu1 }
 0x285   : > { %v3101_v41 = vpop.f32.mrb[3].mxu1 }
 0x288   : > { %v3103_v42 = vpop.f32.mrb[4].mxu1 }
 0x289   : > { %v3105_v44 = vpop.f32.mrb[5].mxu1 }
 0x28a   : > { %3581 = vst [vmem:[#allocation2_spill] sm:$0xff] %v3105_v44 }
 0x28d   : > { %v3107_v46 = vpop.f32.mrb[6].mxu1 }
 0x28e   : > { %3582 = vst [vmem:[#allocation3_spill] sm:$0xff] %v3107_v46  ;;  %v3109_v48 = vpop.f32.mrb[7].mxu1  ;;  %v2826_v46 = vld [vmem:[%s2863_s11 + $0x40] sm:$0xff] }
 0x28f   : > { %3583 = vst [vmem:[#allocation4_spill] sm:$0xff] %v3109_v48 }
 0x2a0   : > { %v2252_v49 = vpop.f32.mrb[8].mxu1 }
 0x2a1   : > { %v651_v51 = vpop.f32.mrb[9].mxu1  ;;  %v693_v52 = vsel %vm303_vm2, %v2252_v49, -inf }
 0x2a2   : > { %694 = vmax.xlane.f32.xlu1 %v693_v52  ;;  %v690_v53 = vsel %vm303_vm2, %v651_v51, -inf }
 0x2a3   : > { %691 = vmax.xlane.f32.xlu0 %v690_v53 }
 0x2a4   : > { %v3113_v54 = vpop.f32.mrb[10].mxu1 }
 0x2a5   : > { %v661_v55 = vpop.f32.mrb[11].mxu1  ;;  %v699_v13 = vsel %vm303_vm2, %v3113_v54, -inf }
 0x2a6   : > { %v696_v57 = vsel %vm303_vm2, %v661_v55, -inf }
 0x2a7   : > { %697 = vmax.xlane.f32.xlu0 %v696_v57 }
 0x2a8   : > { %v3116_v59 = vpop.f32.mrb[12].mxu1 }
 0x2a9   : > { %v705_v60 = vsel %vm303_vm2, %v3116_v59, -inf  ;;  %v3120_v61 = vpop.f32.mrb[13].mxu1 }
 0x2aa   : > { %v702_v7 = vsel %vm303_vm2, %v3120_v61, -inf }
 0x2ab   : > { %706 = vmax.xlane.f32.xlu0 %v705_v60 }
 0x2ac   : > { %v3124_v8 = vpop.f32.mrb[14].mxu1 }
 0x2ad   : > { %v3126_v10 = vpop.f32.mrb[15].mxu1  ;;  %v711_v11 = vsel %vm303_vm2, %v3124_v8, -inf }
 0x2ae   : > { %v708_v12 = vsel %vm303_vm2, %v3126_v10, -inf }
 0x2af   : > { %703 = vmax.xlane.f32.xlu0 %v702_v7 }
 0x2b3   : > { %2615 = vrot.lane.b32.xlu1 %v2879_v6, %s2837_s13  ;;  %712 = vmax.xlane.f32.xlu0 %v711_v11 }
 0x2b7   : > { %709 = vmax.xlane.f32.xlu0 %v708_v12 }
 0x2cd   : > { %2620 = vrot.lane.b32.xlu0 %v3001_v1, %s2837_s13 }
 0x2d1   : > { %943 = vrot.lane.b32.xlu0 %v2926_v19, %s2837_s13 }
 0x2d5   : > { %947 = vrot.lane.b32.xlu0 %v2936_v23, %s2837_s13 }
 0x2d7   : > { %700 = vmax.xlane.f32.xlu1 %v699_v13 }
 0x2d9   : > { %951 = vrot.lane.b32.xlu0 %v2946_v27, %s2837_s13 }
 0x2dd   : > { %2635 = vrot.lane.b32.xlu0 %v3023_v2, %s2837_s13 }
 0x2e1   : > { %2645 = vrot.lane.b32.xlu0 %v3032_v4, %s2837_s13 }
 0x2e8   : > { %2625 = vrot.lane.b32.xlu1 %v2989_v62, %s2837_s13 }
 0x2ec   : > { %2630 = vrot.lane.b32.xlu1 %v2995_v63, %s2837_s13 }
 0x2f0   : > { %939 = vrot.lane.b32.xlu1 %v2886_v9, %s2837_s13 }
 0x2f4   : > { %941 = vrot.lane.b32.xlu1 %v2924_v18, %s2837_s13 }
 0x2f8   : > { %945 = vrot.lane.b32.xlu1 %v2932_v22, %s2837_s13 }
 0x2fc   : > { %949 = vrot.lane.b32.xlu1 %v2942_v26, %s2837_s13 }
 0x300   : > { %953 = vrot.lane.b32.xlu1 %v2951_v29, %s2837_s13 }
 0x304   : > { %2640 = vrot.lane.b32.xlu1 %v3026_v3, %s2837_s13 }
 0x308   : > { %2650 = vrot.lane.b32.xlu1 %v3034_v5, %s2837_s13 }
 0x32f   : > { %v695_v14 = vpop.xlane.xlu1 %694 }
 0x330   : > { %v715_v15 = vsub.f32 %v2252_v49, %v695_v14  ;;  %v692_v16 = vpop.xlane.xlu0 %691 }
 0x331   : > { %v714_v17 = vsub.f32 %v651_v51, %v692_v16 }
 0x332   : > { %v724_v20 = vmul.f32 1.442695, %v715_v15 }
 0x333   : > { %v722_v21 = vmul.f32 1.442695, %v714_v17  ;;  %v2616_v24 = vpop.permute.xlu1 %2615 }
 0x334   : > { %v2618_v25 = vunpack.i.h.bf16 %v2616_v24  ;;  %v2617_v28 = vunpack.i.l.bf16 %v2616_v24  ;;  %v698_v30 = vpop.xlane.xlu0 %697 }
 0x335   : > { %2710 = vpow2.f32 %v722_v21  ;;  %v716_v31 = vsub.f32 %v661_v55, %v698_v30 }
 0x336   : > { %2712 = vpow2.f32 %v724_v20  ;;  %v2482_v32 = vpack.c.bf16 %v2618_v25, %v2617_v28 }
 0x337   : > { %v726_v33 = vmul.f32 1.442695, %v716_v31 }
 0x338   : > { %2484 = vmatprep.subr.msk.bf16.mxu0 %vm2867_vm1, %v2482_v32  ;;  %v707_v34 = vpop.xlane.xlu0 %706 }
 0x339   : > { %2714 = vpow2.f32 %v726_v33  ;;  %v719_v13 = vsub.f32 %v3116_v59, %v707_v34 }
 0x33b   : > { %v732_v21 = vmul.f32 1.442695, %v719_v13 }
 0x33c   : > { %v704_v35 = vpop.xlane.xlu0 %703 }
 0x33d   : > { %v718_v12 = vsub.f32 %v3120_v61, %v704_v35 }
 0x33f   : > { %v3160_v49 = vpop.eup %2710  ;;  %v730_v16 = vmul.f32 1.442695, %v718_v12 }
 0x340   : > { %v3162_v51 = vpop.eup %2712  ;;  %2278 = vmatprep.mubr.msk.f32.mxu0 %vm303_vm2, %v3160_v49  ;;  %v713_v52 = vpop.xlane.xlu0 %712 }
 0x341   : > { %2279 = vmatmul.mubr.msk.f32.vlgmr.msra.gmra.mrb[8].mxu0 %vm303_vm2, %v3162_v51  ;;  %v721_v25 = vsub.f32 %v3124_v8, %v713_v52 }
 0x342   : > { %2487 = vmatpush3.bf16.xpose.msk.msra.mxu0 %vm2867_vm1, %v2482_v32 }
 0x343   : > { %v3170_v53 = vpop.eup %2714  ;;  %v736_v59 = vmul.f32 1.442695, %v721_v25 }
 0x344   : > { %2281 = vmatprep.mubr.msk.f32.mxu0 %vm303_vm2, %v3170_v53  ;;  %v710_v55 = vpop.xlane.xlu0 %709 }
 0x345   : > { %v720_v17 = vsub.f32 %v3126_v10, %v710_v55 }
 0x347   : > { %v734_v31 = vmul.f32 1.442695, %v720_v17 }
 0x348   : > { %v2621_v57 = vpop.permute.xlu0 %2620 }
 0x349   : > { %v2623_v60 = vunpack.i.h.bf16 %v2621_v57  ;;  %v2622_v7 = vunpack.i.l.bf16 %v2621_v57 }
 0x34b   : > { %v2488_v11 = vpack.c.bf16 %v2623_v60, %v2622_v7 }
 0x34c   : > { %v944_v7 = vpop.permute.xlu0 %943 }
 0x34d   : > { %2490 = vmatprep.subr.msk.bf16.mxu0 %vm2867_vm1, %v2488_v11 }
 0x34e   : > { %2493 = vmatpush3.bf16.xpose.msk.msra.mxu0 %vm2867_vm1, %v2488_v11 }
 0x350   : > { %v948_v12 = vpop.permute.xlu0 %947 }
 0x364   : > { %v701_v14 = vpop.xlane.xlu1 %700 }
 0x365   : > { %v717_v15 = vsub.f32 %v3113_v54, %v701_v14  ;;  %v952_v14 = vpop.permute.xlu0 %951 }
 0x367   : > { %v728_v20 = vmul.f32 1.442695, %v717_v15 }
 0x368   : > { %v2626_v24 = vpop.permute.xlu1 %2625 }
 0x369   : > { %2716 = vpow2.f32 %v728_v20  ;;  %v2628_v28 = vunpack.i.h.bf16 %v2626_v24  ;;  %v2627_v30 = vunpack.i.l.bf16 %v2626_v24 }
 0x36a   : > { %2718 = vpow2.f32 %v730_v16  ;;  %v2636_v16 = vpop.permute.xlu0 %2635 }
 0x36b   : > { %v2494_v32 = vpack.c.bf16 %v2628_v28, %v2627_v30  ;;  %2720 = vpow2.f32 %v732_v21  ;;  %v2638_v20 = vunpack.i.h.bf16 %v2636_v16  ;;  %v2637_v21 = vunpack.i.l.bf16 %v2636_v16 }
 0x36c   : > { %v2631_v61 = vpop.permute.xlu1 %2630  ;;  %2722 = vpow2.f32 %v734_v31 }
 0x36d   : > { %2496 = vmatprep.subr.msk.bf16.mxu0 %vm2867_vm1, %v2494_v32  ;;  %v2633_v54 = vunpack.i.h.bf16 %v2631_v61  ;;  %v2632_v33 = vunpack.i.l.bf16 %v2631_v61  ;;  %2724 = vpow2.f32 %v736_v59  ;;  %v2506_v28 = vpack.c.bf16 %v2638_v20, %v2637_v21 }
 0x36e   : > { %2499 = vmatpush3.bf16.xpose.msk.msra.mxu0 %vm2867_vm1, %v2494_v32  ;;  %v2646_v31 = vpop.permute.xlu0 %2645 }
 0x36f   : > { %v2500_v10 = vpack.c.bf16 %v2633_v54, %v2632_v33  ;;  %2507 = vmatprep.subr.bf16.mxu1 %v2506_v28  ;;  %v2648_v61 = vunpack.i.h.bf16 %v2646_v31  ;;  %v2647_v59 = vunpack.i.l.bf16 %v2646_v31 }
 0x370   : > { %v940_v34 = vpop.permute.xlu1 %939  ;;  %2509 = vmatpush3.bf16.msra.mxu1 %v2506_v28 }
 0x371   : > { %2502 = vmatprep.subr.msk.bf16.mxu0 %vm2867_vm1, %v2500_v10  ;;  %v2514_v3 = vpack.c.bf16 %v2648_v61, %v2647_v59 }
 0x373   : > { %v3189_v8 = vpop.eup %2716 }
 0x374   : > { %v3191_v35 = vpop.eup %2718  ;;  %2282 = vmatmul.mubr.msk.f32.gmra.mrb[10].mxu0 %vm303_vm2, %v3189_v8  ;;  %v942_v57 = vpop.permute.xlu1 %941 }
 0x375   : > { %2284 = vmatprep.mubr.msk.f32.mxu0 %vm303_vm2, %v3191_v35  ;;  %v3199_v52 = vpop.eup %2720 }
 0x376   : > { %2505 = vmatpush3.bf16.xpose.msk.msra.mxu0 %vm2867_vm1, %v2500_v10  ;;  %v3201_v55 = vpop.eup %2722 }
 0x377   : > { %v3207_v60 = vpop.eup %2724 }
 0x378   : > { %2285 = vmatmul.mubr.msk.f32.gmra.mrb[12].mxu0 %vm303_vm2, %v3199_v52  ;;  %v946_v11 = vpop.permute.xlu1 %945 }
 0x379   : > { %2287 = vmatprep.mubr.msk.f32.mxu0 %vm303_vm2, %v3201_v55 }
 0x37c   : > { %2288 = vmatmul.mubr.msk.f32.gmra.mrb[14].mxu0 %vm303_vm2, %v3207_v60  ;;  %v950_v13 = vpop.permute.xlu1 %949 }
 0x37d   : > { %2306 = vmatprep.mubr.msk.f32.mxu0 %vm149_vm0, %v940_v34 }
 0x380   : > { %2307 = vmatmul.mubr.msk.f32.vlgmr.msra.gmra.mrb[16].mxu0 %vm149_vm0, %v942_v57  ;;  %v954_v15 = vpop.permute.xlu1 %953 }
 0x381   : > { %2309 = vmatprep.mubr.msk.f32.mxu0 %vm149_vm0, %v944_v7 }
 0x384   : > { %2310 = vmatmul.mubr.msk.f32.gmra.mrb[18].mxu0 %vm149_vm0, %v946_v11  ;;  %v2641_v17 = vpop.permute.xlu1 %2640 }
 0x385   : > { %2312 = vmatprep.mubr.msk.f32.mxu0 %vm149_vm0, %v948_v12  ;;  %v2643_v24 = vunpack.i.h.bf16 %v2641_v17  ;;  %v2642_v25 = vunpack.i.l.bf16 %v2641_v17 }
 0x387   : > { %v2510_v30 = vpack.c.bf16 %v2643_v24, %v2642_v25 }
 0x388   : > { %2313 = vmatmul.mubr.msk.f32.gmra.mrb[20].mxu0 %vm149_vm0, %v950_v13  ;;  %v2651_v32 = vpop.permute.xlu1 %2650 }
 0x389   : > { %2315 = vmatprep.mubr.msk.f32.mxu0 %vm149_vm0, %v952_v14  ;;  %2511 = vmatprep.subr.bf16.mxu1 %v2510_v30  ;;  %v2653_v4 = vunpack.i.h.bf16 %v2651_v32  ;;  %v2652_v54 = vunpack.i.l.bf16 %v2651_v32 }
 0x38a   : > { %2513 = vmatpush3.bf16.msra.mxu1 %v2510_v30 }
 0x38b   : > { %v2518_v10 = vpack.c.bf16 %v2653_v4, %v2652_v54  ;;  %2515 = vmatprep.subr.bf16.mxu1 %v2514_v3 }
 0x38c   : > { %2316 = vmatmul.mubr.msk.f32.gmra.mrb[22].mxu0 %vm149_vm0, %v954_v15 }
 0x38e   : > { %2517 = vmatpush3.bf16.msra.mxu1 %v2514_v3 }
 0x38f   : > { %2519 = vmatprep.subr.bf16.mxu1 %v2518_v10 }
 0x392   : > { %2521 = vmatpush3.bf16.msra.mxu1 %v2518_v10 }
 0x414   : > { %v3227_v33 = vpop.f32.mrb[8].mxu0 }
 0x415   : > { %v3229_v5 = vpop.f32.mrb[9].mxu0 }
 0x447   : > { %v3231_v34 = vpop.f32.mrb[10].mxu0 }
 0x448   : > { %v3233_v57 = vpop.f32.mrb[11].mxu0 }
 0x44b   : > { %v3235_v7 = vpop.f32.mrb[12].mxu0 }
 0x44c   : > { %v3237_v11 = vpop.f32.mrb[13].mxu0 }
 0x44f   : > { %v3239_v12 = vpop.f32.mrb[14].mxu0 }
 0x450   : > { %v3241_v13 = vpop.f32.mrb[15].mxu0 }
 0x453   : > { %v2308_v14 = vpop.f32.mrb[16].mxu0 }
 0x454   : > { %v1069_v15 = vpop.f32.mrb[17].mxu0  ;;  %v1111_v16 = vsel %vm303_vm2, %v2308_v14, -inf }
 0x455   : > { %1112 = vmax.xlane.f32.xlu1 %v1111_v16  ;;  %v1108_v17 = vsel %vm303_vm2, %v1069_v15, -inf }
 0x456   : > { %1109 = vmax.xlane.f32.xlu0 %v1108_v17 }
 0x457   : > { %v3245_v20 = vpop.f32.mrb[18].mxu0 }
 0x458   : > { %v1079_v21 = vpop.f32.mrb[19].mxu0  ;;  %v1117_v4 = vsel %vm303_vm2, %v3245_v20, -inf }
 0x459   : > { %v1114_v24 = vsel %vm303_vm2, %v1079_v21, -inf }
 0x45a   : > { %1115 = vmax.xlane.f32.xlu0 %v1114_v24 }
 0x45b   : > { %v3248_v25 = vpop.f32.mrb[20].mxu0 }
 0x45c   : > { %v1123_v28 = vsel %vm303_vm2, %v3248_v25, -inf  ;;  %v3252_v30 = vpop.f32.mrb[21].mxu0 }
 0x45d   : > { %v1120_v31 = vsel %vm303_vm2, %v3252_v30, -inf }
 0x45e   : > { %1124 = vmax.xlane.f32.xlu0 %v1123_v28 }
 0x45f   : > { %v3256_v32 = vpop.f32.mrb[22].mxu0 }
 0x460   : > { %v3258_v61 = vpop.f32.mrb[23].mxu0  ;;  %v1129_v59 = vsel %vm303_vm2, %v3256_v32, -inf }
 0x461   : > { %v1126_v3 = vsel %vm303_vm2, %v3258_v61, -inf }
 0x462   : > { %1121 = vmax.xlane.f32.xlu0 %v1120_v31 }
 0x466   : > { %2655 = vrot.lane.b32.xlu1 %v2879_v6, %s2838_s14  ;;  %1130 = vmax.xlane.f32.xlu0 %v1129_v59 }
 0x46a   : > { %1127 = vmax.xlane.f32.xlu0 %v1126_v3 }
 0x480   : > { %2660 = vrot.lane.b32.xlu0 %v3001_v1, %s2838_s14 }
 0x484   : > { %1353 = vrot.lane.b32.xlu0 %v2926_v19, %s2838_s14 }
 0x488   : > { %1357 = vrot.lane.b32.xlu0 %v2936_v23, %s2838_s14 }
 0x48a   : > { %1118 = vmax.xlane.f32.xlu1 %v1117_v4 }
 0x48c   : > { %1361 = vrot.lane.b32.xlu0 %v2946_v27, %s2838_s14 }
 0x49b   : > { %2665 = vrot.lane.b32.xlu1 %v2989_v62, %s2838_s14 }
 0x49f   : > { %2670 = vrot.lane.b32.xlu1 %v2995_v63, %s2838_s14 }
 0x4a3   : > { %1349 = vrot.lane.b32.xlu1 %v2886_v9, %s2838_s14 }
 0x4a7   : > { %1351 = vrot.lane.b32.xlu1 %v2924_v18, %s2838_s14 }
 0x4ab   : > { %1355 = vrot.lane.b32.xlu1 %v2932_v22, %s2838_s14 }
 0x4af   : > { %1359 = vrot.lane.b32.xlu1 %v2942_v26, %s2838_s14 }
 0x4b3   : > { %1363 = vrot.lane.b32.xlu1 %v2951_v29, %s2838_s14 }
 0x4b7   : > { %2675 = vrot.lane.b32.xlu1 %v3023_v2, %s2838_s14 }
 0x4e2   : > { %v1113_v6 = vpop.xlane.xlu1 %1112 }
 0x4e3   : > { %v1133_v19 = vsub.f32 %v2308_v14, %v1113_v6  ;;  %v1110_v23 = vpop.xlane.xlu0 %1109 }
 0x4e4   : > { %v1132_v27 = vsub.f32 %v1069_v15, %v1110_v23 }
 0x4e5   : > { %v1142_v62 = vmul.f32 1.442695, %v1133_v19 }
 0x4e6   : > { %v1140_v63 = vmul.f32 1.442695, %v1132_v27  ;;  %v2656_v1 = vpop.permute.xlu1 %2655 }
 0x4e7   : > { %v2658_v9 = vunpack.i.h.bf16 %v2656_v1  ;;  %v2657_v54 = vunpack.i.l.bf16 %v2656_v1  ;;  %v1116_v10 = vpop.xlane.xlu0 %1115 }
 0x4e8   : > { %2726 = vpow2.f32 %v1140_v63  ;;  %v1134_v18 = vsub.f32 %v1079_v21, %v1116_v10 }
 0x4e9   : > { %2728 = vpow2.f32 %v1142_v62  ;;  %v2522_v22 = vpack.c.bf16 %v2658_v9, %v2657_v54 }
 0x4ea   : > { %v1144_v16 = vmul.f32 1.442695, %v1134_v18 }
 0x4eb   : > { %2524 = vmatprep.subr.msk.bf16.mxu1 %vm2867_vm1, %v2522_v22  ;;  %v1125_v26 = vpop.xlane.xlu0 %1124 }
 0x4ec   : > { %2730 = vpow2.f32 %v1144_v16  ;;  %v1137_v6 = vsub.f32 %v3248_v25, %v1125_v26 }
 0x4ee   : > { %v1150_v1 = vmul.f32 1.442695, %v1137_v6 }
 0x4ef   : > { %v1122_v29 = vpop.xlane.xlu0 %1121 }
 0x4f0   : > { %v1136_v4 = vsub.f32 %v3252_v30, %v1122_v29 }
 0x4f2   : > { %v3292_v14 = vpop.eup %2726  ;;  %v1148_v27 = vmul.f32 1.442695, %v1136_v4 }
 0x4f3   : > { %v3294_v15 = vpop.eup %2728  ;;  %2334 = vmatprep.mubr.msk.f32.mxu1 %vm303_vm2, %v3292_v14  ;;  %v1131_v17 = vpop.xlane.xlu0 %1130 }
 0x4f4   : > { %2335 = vmatmul.mubr.msk.f32.vlgmr.msra.gmra.mrb[16].mxu1 %vm303_vm2, %v3294_v15  ;;  %v1139_v54 = vsub.f32 %v3256_v32, %v1131_v17 }
 0x4f5   : > { %2527 = vmatpush3.bf16.xpose.msk.msra.mxu1 %vm2867_vm1, %v2522_v22 }
 0x4f6   : > { %v3302_v21 = vpop.eup %2730  ;;  %v1154_v25 = vmul.f32 1.442695, %v1139_v54 }
 0x4f7   : > { %2337 = vmatprep.mubr.msk.f32.mxu1 %vm303_vm2, %v3302_v21  ;;  %v1128_v24 = vpop.xlane.xlu0 %1127 }
 0x4f8   : > { %v1138_v62 = vsub.f32 %v3258_v61, %v1128_v24 }
 0x4fa   : > { %v1152_v22 = vmul.f32 1.442695, %v1138_v62 }
 0x4fb   : > { %v2661_v28 = vpop.permute.xlu0 %2660 }
 0x4fc   : > { %v2663_v31 = vunpack.i.h.bf16 %v2661_v28  ;;  %v2662_v59 = vunpack.i.l.bf16 %v2661_v28 }
 0x4fe   : > { %v2528_v3 = vpack.c.bf16 %v2663_v31, %v2662_v59 }
 0x500   : > { %2530 = vmatprep.subr.msk.bf16.mxu1 %vm2867_vm1, %v2528_v3 }
 0x501   : > { %2533 = vmatpush3.bf16.xpose.msk.msra.mxu1 %vm2867_vm1, %v2528_v3  ;;  %v1354_v3 = vpop.permute.xlu0 %1353 }
 0x505   : > { %v1358_v4 = vpop.permute.xlu0 %1357 }
 0x517   : > { %v1119_v19 = vpop.xlane.xlu1 %1118 }
 0x518   : > { %v1135_v23 = vsub.f32 %v3245_v20, %v1119_v19  ;;  %v1362_v19 = vpop.permute.xlu0 %1361 }
 0x51a   : > { %v1146_v63 = vmul.f32 1.442695, %v1135_v23 }
 0x51b   : > { %v2666_v9 = vpop.permute.xlu1 %2665 }
 0x51c   : > { %2732 = vpow2.f32 %v1146_v63  ;;  %v2668_v10 = vunpack.i.h.bf16 %v2666_v9  ;;  %v2667_v18 = vunpack.i.l.bf16 %v2666_v9 }
 0x51d   : > { %2734 = vpow2.f32 %v1148_v27 }
 0x51e   : > { %v2534_v16 = vpack.c.bf16 %v2668_v10, %v2667_v18  ;;  %2736 = vpow2.f32 %v1150_v1 }
 0x51f   : > { %v2671_v30 = vpop.permute.xlu1 %2670  ;;  %2738 = vpow2.f32 %v1152_v22 }
 0x520   : > { %2536 = vmatprep.subr.msk.bf16.mxu1 %vm2867_vm1, %v2534_v16  ;;  %v2673_v20 = vunpack.i.h.bf16 %v2671_v30  ;;  %v2672_v26 = vunpack.i.l.bf16 %v2671_v30  ;;  %2740 = vpow2.f32 %v1154_v25 }
 0x521   : > { %2539 = vmatpush3.bf16.xpose.msk.msra.mxu1 %vm2867_vm1, %v2534_v16 }
 0x522   : > { %v2540_v61 = vpack.c.bf16 %v2673_v20, %v2672_v26 }
 0x523   : > { %v1350_v29 = vpop.permute.xlu1 %1349 }
 0x524   : > { %2542 = vmatprep.subr.msk.bf16.mxu1 %vm2867_vm1, %v2540_v61 }
 0x526   : > { %v3321_v32 = vpop.eup %2732 }
 0x527   : > { %v3323_v17 = vpop.eup %2734  ;;  %2338 = vmatmul.mubr.msk.f32.gmra.mrb[18].mxu1 %vm303_vm2, %v3321_v32  ;;  %v1352_v31 = vpop.permute.xlu1 %1351 }
 0x528   : > { %2340 = vmatprep.mubr.msk.f32.mxu1 %vm303_vm2, %v3323_v17  ;;  %v3331_v24 = vpop.eup %2736 }
 0x529   : > { %2545 = vmatpush3.bf16.xpose.msk.msra.mxu1 %vm2867_vm1, %v2540_v61  ;;  %v3333_v28 = vpop.eup %2738 }
 0x52a   : > { %v3339_v59 = vpop.eup %2740 }
 0x52b   : > { %2341 = vmatmul.mubr.msk.f32.gmra.mrb[20].mxu1 %vm303_vm2, %v3331_v24  ;;  %v1356_v0 = vpop.permute.xlu1 %1355 }
 0x52c   : > { %2343 = vmatprep.mubr.msk.f32.mxu1 %vm303_vm2, %v3333_v28 }
 0x52f   : > { %2344 = vmatmul.mubr.msk.f32.gmra.mrb[22].mxu1 %vm303_vm2, %v3339_v59  ;;  %v1360_v6 = vpop.permute.xlu1 %1359 }
 0x530   : > { %2362 = vmatprep.mubr.msk.f32.mxu1 %vm149_vm0, %v1350_v29 }
 0x533   : > { %2363 = vmatmul.mubr.msk.f32.vlgmr.msra.gmra.mrb[24].mxu1 %vm149_vm0, %v1352_v31  ;;  %v1364_v23 = vpop.permute.xlu1 %1363 }
 0x534   : > { %2365 = vmatprep.mubr.msk.f32.mxu1 %vm149_vm0, %v1354_v3 }
 0x537   : > { %2366 = vmatmul.mubr.msk.f32.gmra.mrb[26].mxu1 %vm149_vm0, %v1356_v0  ;;  %v2676_v63 = vpop.permute.xlu1 %2675 }
 0x538   : > { %2368 = vmatprep.mubr.msk.f32.mxu1 %vm149_vm0, %v1358_v4  ;;  %v2678_v1 = vunpack.i.h.bf16 %v2676_v63  ;;  %v2677_v9 = vunpack.i.l.bf16 %v2676_v63 }
 0x53a   : > { %v2546_v54 = vpack.c.bf16 %v2678_v1, %v2677_v9 }
 0x53b   : > { %2369 = vmatmul.mubr.msk.f32.gmra.mrb[28].mxu1 %vm149_vm0, %v1360_v6 }
 0x53c   : > { %2371 = vmatprep.mubr.msk.f32.mxu1 %vm149_vm0, %v1362_v19  ;;  %2547 = vmatprep.subr.bf16.mxu0 %v2546_v54 }
 0x53d   : > { %2549 = vmatpush3.bf16.msra.mxu0 %v2546_v54 }
 0x53f   : > { %2372 = vmatmul.mubr.msk.f32.gmra.mrb[30].mxu1 %vm149_vm0, %v1364_v23 }
 0x5c7   : > { %v3353_v27 = vpop.f32.mrb[16].mxu1 }
 0x5c8   : > { %v3355_v62 = vpop.f32.mrb[17].mxu1 }
 0x5fa   : > { %v3357_v10 = vpop.f32.mrb[18].mxu1 }
 0x5fb   : > { %v3359_v18 = vpop.f32.mrb[19].mxu1 }
 0x5fe   : > { %v3361_v22 = vpop.f32.mrb[20].mxu1 }
 0x5ff   : > { %v3363_v16 = vpop.f32.mrb[21].mxu1 }
 0x602   : > { %v3365_v30 = vpop.f32.mrb[22].mxu1 }
 0x603   : > { %v3367_v2 = vpop.f32.mrb[23].mxu1 }
 0x606   : > { %v3369_v25 = vpop.f32.mrb[24].mxu1 }
 0x607   : > { %v3371_v20 = vpop.f32.mrb[25].mxu1  ;;  %v1521_v26 = vsel %vm303_vm2, %v3369_v25, -inf }
 0x608   : > { %1522 = vmax.xlane.f32.xlu1 %v1521_v26  ;;  %v1518_v61 = vsel %vm303_vm2, %v3371_v20, -inf  ;;  %v2822_v26 = vld [vmem:[%s2863_s11 + $0x70] sm:$0xff] }
 0x609   : > { %1519 = vmax.xlane.f32.xlu0 %v1518_v61  ;;  %v2823_v61 = vld [vmem:[%s2863_s11 + $0x88] sm:$0xff] }
 0x60a   : > { %v3377_v29 = vpop.f32.mrb[26].mxu1 }
 0x60b   : > { %v3379_v31 = vpop.f32.mrb[27].mxu1  ;;  %v1527_v3 = vsel %vm303_vm2, %v3377_v29, -inf }
 0x60c   : > { %v1524_v19 = vsel %vm303_vm2, %v3379_v31, -inf }
 0x60d   : > { %1528 = vmax.xlane.f32.xlu0 %v1527_v3  ;;  %v2684_v3 = vpack.i.bf16 %v2823_v61, %v2822_v26  ;;  %v753_v26 = vsel %vm303_vm2, %v3199_v52, 0.0  ;;  %v756_v52 = vsel %vm303_vm2, %v3201_v55, 0.0  ;;  %v1168_v55 = vsel %vm303_vm2, %v3323_v17, 0.0 }
 0x60e   : > { %v3383_v0 = vpop.f32.mrb[28].mxu1 }
 0x60f   : > { %v1533_v4 = vsel %vm303_vm2, %v3383_v0, -inf  ;;  %v3387_v6 = vpop.f32.mrb[29].mxu1 }
 0x610   : > { %1534 = vmax.xlane.f32.xlu1 %v1533_v4  ;;  %v1530_v23 = vsel %vm303_vm2, %v3387_v6, -inf  ;;  %v2824_v4 = vld [vmem:[%s2863_s11 + $0xa0] sm:$0xff] }
 0x611   : > { %1525 = vmax.xlane.f32.xlu0 %v1524_v19  ;;  %v2825_v19 = vld [vmem:[%s2863_s11 + $0xb8] sm:$0xff] }
 0x612   : > { %v3393_v63 = vpop.f32.mrb[30].mxu1  ;;  %v2689_v48 = vpack.i.bf16 %v2825_v19, %v2824_v4 }
 0x613   : > { %v3395_v1 = vpop.f32.mrb[31].mxu1  ;;  %v1539_v9 = vsel %vm303_vm2, %v3393_v63, -inf }
 0x614   : > { %v1536_v54 = vsel %vm303_vm2, %v3395_v1, -inf }
 0x615   : > { %1531 = vmax.xlane.f32.xlu0 %v1530_v23  ;;  %v2827_v23 = vld [vmem:[%s2863_s11 + $0x58] sm:$0xff] }
 0x616   : > { %v2679_v44 = vpack.i.bf16 %v2827_v23, %v2826_v46  ;;  %v759_v46 = vsel %vm303_vm2, %v3207_v60, 0.0  ;;  %v1156_v60 = vsel %vm303_vm2, %v3292_v14, 0.0 }
 0x619   : > { %1540 = vmax.xlane.f32.xlu0 %v1539_v9  ;;  %v738_v9 = vsel %vm303_vm2, %v3160_v49, 0.0  ;;  %v1159_v49 = vsel %vm303_vm2, %v3294_v15, 0.0  ;;  %v1162_v15 = vsel %vm303_vm2, %v3302_v21, 0.0 }
 0x61d   : > { %1537 = vmax.xlane.f32.xlu0 %v1536_v54  ;;  %v747_v54 = vsel %vm303_vm2, %v3189_v8, 0.0  ;;  %v750_v8 = vsel %vm303_vm2, %v3191_v35, 0.0  ;;  %v1177_v35 = vsel %vm303_vm2, %v3339_v59, 0.0 }
 0x621   : > { %2685 = vrot.lane.b32.xlu1 %v2684_v3, %s2838_s14 }
 0x625   : > { %2690 = vrot.lane.b32.xlu1 %v2689_v48, %s2838_s14  ;;  %v741_v48 = vsel %vm303_vm2, %v3162_v51, 0.0  ;;  %v1165_v51 = vsel %vm303_vm2, %v3321_v32, 0.0  ;;  %v1174_v32 = vsel %vm303_vm2, %v3333_v28, 0.0 }
 0x633   : > { %2680 = vrot.lane.b32.xlu0 %v2679_v44, %s2838_s14  ;;  %v744_v44 = vsel %vm303_vm2, %v3170_v53, 0.0  ;;  %v1171_v53 = vsel %vm303_vm2, %v3331_v24, 0.0 }
 0x649   : > { %739 = vadd.xlane.f32.xlu1 %v738_v9 }
 0x64d   : > { %748 = vadd.xlane.f32.xlu1 %v747_v54 }
 0x651   : > { %754 = vadd.xlane.f32.xlu1 %v753_v26 }
 0x652   : > { %742 = vadd.xlane.f32.xlu0 %v741_v48 }
 0x655   : > { %760 = vadd.xlane.f32.xlu1 %v759_v46 }
 0x656   : > { %745 = vadd.xlane.f32.xlu0 %v744_v44 }
 0x659   : > { %1160 = vadd.xlane.f32.xlu1 %v1159_v49 }
 0x65a   : > { %751 = vadd.xlane.f32.xlu0 %v750_v8 }
 0x65d   : > { %1166 = vadd.xlane.f32.xlu1 %v1165_v51 }
 0x65e   : > { %757 = vadd.xlane.f32.xlu0 %v756_v52 }
 0x661   : > { %1172 = vadd.xlane.f32.xlu1 %v1171_v53 }
 0x662   : > { %1157 = vadd.xlane.f32.xlu0 %v1156_v60 }
 0x665   : > { %1178 = vadd.xlane.f32.xlu1 %v1177_v35 }
 0x666   : > { %1163 = vadd.xlane.f32.xlu0 %v1162_v15 }
 0x66a   : > { %1169 = vadd.xlane.f32.xlu0 %v1168_v55 }
 0x66e   : > { %1175 = vadd.xlane.f32.xlu0 %v1174_v32 }
 0x695   : > { %v1523_v24 = vpop.xlane.xlu1 %1522 }
 0x696   : > { %v1543_v14 = vsub.f32 %v3369_v25, %v1523_v24  ;;  %v1520_v61 = vpop.xlane.xlu0 %1519 }
 0x697   : > { %v1542_v3 = vsub.f32 %v3371_v20, %v1520_v61 }
 0x698   : > { %v1552_v59 = vmul.f32 1.442695, %v1543_v14 }
 0x699   : > { %v1550_v4 = vmul.f32 1.442695, %v1542_v3 }
 0x69a   : > { %2742 = vpow2.f32 %v1552_v59  ;;  %v1529_v19 = vpop.xlane.xlu0 %1528 }
 0x69b   : > { %2744 = vpow2.f32 %v1550_v4  ;;  %v1545_v21 = vsub.f32 %v3377_v29, %v1529_v19 }
 0x69d   : > { %v1556_v23 = vmul.f32 1.442695, %v1545_v21  ;;  %v1535_v17 = vpop.xlane.xlu1 %1534 }
 0x69e   : > { %v1547_v9 = vsub.f32 %v3383_v0, %v1535_v17  ;;  %v1526_v54 = vpop.xlane.xlu0 %1525 }
 0x69f   : > { %2746 = vpow2.f32 %v1556_v23  ;;  %v1544_v28 = vsub.f32 %v3379_v31, %v1526_v54 }
 0x6a0   : > { %v1560_v26 = vmul.f32 1.442695, %v1547_v9 }
 0x6a1   : > { %v1554_v25 = vmul.f32 1.442695, %v1544_v28  ;;  %v2686_v51 = vpop.permute.xlu1 %2685 }
 0x6a2   : > { %2748 = vpow2.f32 %v1560_v26  ;;  %v1532_v48 = vpop.xlane.xlu0 %1531  ;;  %v2688_v14 = vunpack.i.h.bf16 %v2686_v51  ;;  %v2687_v61 = vunpack.i.l.bf16 %v2686_v51 }
 0x6a3   : > { %2750 = vpow2.f32 %v1554_v25  ;;  %v1546_v20 = vsub.f32 %v3387_v6, %v1532_v48 }
 0x6a4   : > { %v2743_v46 = vpop.eup %2742 }
 0x6a5   : > { %v2745_v44 = vpop.eup %2744  ;;  %v1558_v49 = vmul.f32 1.442695, %v1546_v20  ;;  %v1569_v29 = vsel %vm303_vm2, %v2743_v46, 0.0  ;;  %v2691_v59 = vpop.permute.xlu1 %2690  ;;  %v355_v20 = vsel %vm303_vm2, %v3042_v39, 0.0  ;;  %v367_v39 = vsel %vm303_vm2, %v3065_v45, 0.0 }
 0x6a6   : > { %2390 = vmatprep.mubr.msk.f32.mxu0 %vm303_vm2, %v2745_v44  ;;  %1570 = vadd.xlane.f32.xlu1 %v1569_v29  ;;  %v1541_v0 = vpop.xlane.xlu0 %1540  ;;  %v1566_v8 = vsel %vm303_vm2, %v2745_v44, 0.0  ;;  %v2693_v17 = vunpack.i.h.bf16 %v2691_v59  ;;  %v2692_v9 = vunpack.i.l.bf16 %v2691_v59  ;;  %v352_v29 = vsel %vm303_vm2, %v3040_v37, 0.0 }
 0x6a7   : > { %2752 = vpow2.f32 %v1558_v49  ;;  %v1549_v31 = vsub.f32 %v3393_v63, %v1541_v0  ;;  %1567 = vadd.xlane.f32.xlu0 %v1566_v8  ;;  %v361_v49 = vsel %vm303_vm2, %v3048_v43, 0.0  ;;  %v358_v0 = vsel %vm303_vm2, %v3053_v47, 0.0 }
 0x6a8   : > { %v2558_v26 = vpack.c.bf16 %v2693_v17, %v2692_v9  ;;  %v373_v37 = vsel %vm303_vm2, %v3075_v58, 0.0  ;;  %v364_v43 = vsel %vm303_vm2, %v3055_v50, 0.0  ;;  %v370_v47 = vsel %vm303_vm2, %v3073_v56, 0.0 }
 0x6a9   : > { %v2747_v52 = vpop.eup %2746  ;;  %v1564_v53 = vmul.f32 1.442695, %v1549_v31 }
 0x6aa   : > { %v1538_v60 = vpop.xlane.xlu0 %1537  ;;  %v1575_v6 = vsel %vm303_vm2, %v2747_v52, 0.0 }
 0x6ab   : > { %2754 = vpow2.f32 %v1564_v53  ;;  %v1548_v35 = vsub.f32 %v3395_v1, %v1538_v60  ;;  %1576 = vadd.xlane.f32.xlu1 %v1575_v6  ;;  %v2554_v1 = vpack.c.bf16 %v2688_v14, %v2687_v61 }
 0x6ac   : > { %v2749_v15 = vpop.eup %2748 }
 0x6ad   : > { %v2751_v55 = vpop.eup %2750  ;;  %v1562_v32 = vmul.f32 1.442695, %v1548_v35  ;;  %v1581_v24 = vsel %vm303_vm2, %v2749_v15, 0.0 }
 0x6ae   : > { %v2681_v3 = vpop.permute.xlu0 %2680  ;;  %v1572_v63 = vsel %vm303_vm2, %v2751_v55, 0.0 }
 0x6af   : > { %2756 = vpow2.f32 %v1562_v32  ;;  %v2683_v4 = vunpack.i.h.bf16 %v2681_v3  ;;  %v2682_v19 = vunpack.i.l.bf16 %v2681_v3  ;;  %1582 = vadd.xlane.f32.xlu1 %v1581_v24  ;;  %1573 = vadd.xlane.f32.xlu0 %v1572_v63 }
 0x6b1   : > { %v2753_v21 = vpop.eup %2752  ;;  %v2550_v23 = vpack.c.bf16 %v2683_v4, %v2682_v19 }
 0x6b2   : > { %v1578_v54 = vsel %vm303_vm2, %v2753_v21, 0.0 }
 0x6b3   : > { %1579 = vadd.xlane.f32.xlu0 %v1578_v54  ;;  %2551 = vmatprep.subr.bf16.mxu0 %v2550_v23 }
 0x6b4   : > { %2553 = vmatpush3.bf16.msra.mxu0 %v2550_v23 }
 0x6b5   : > { %v2755_v28 = vpop.eup %2754  ;;  %2555 = vmatprep.subr.bf16.mxu0 %v2554_v1 }
 0x6b6   : > { %v1587_v25 = vsel %vm303_vm2, %v2755_v28, 0.0 }
 0x6b7   : > { %1588 = vadd.xlane.f32.xlu1 %v1587_v25 }
 0x6b8   : > { %2557 = vmatpush3.bf16.msra.mxu0 %v2554_v1 }
 0x6b9   : > { %v2757_v48 = vpop.eup %2756  ;;  %2559 = vmatprep.subr.bf16.mxu0 %v2558_v26 }
 0x6ba   : > { %v1584_v44 = vsel %vm303_vm2, %v2757_v48, 0.0 }
 0x6bb   : > { %356 = vadd.xlane.f32.xlu1 %v355_v20  ;;  %1585 = vadd.xlane.f32.xlu0 %v1584_v44 }
 0x6bc   : > { %2561 = vmatpush3.bf16.msra.mxu0 %v2558_v26 }
 0x6bf   : > { %362 = vadd.xlane.f32.xlu1 %v361_v49  ;;  %353 = vadd.xlane.f32.xlu0 %v352_v29 }
 0x6c0   : > { %2391 = vmatmul.mubr.msk.f32.vlgmr.msra.gmra.mrb[24].mxu0 %vm303_vm2, %v2743_v46 }
 0x6c1   : > { %2393 = vmatprep.mubr.msk.f32.mxu0 %vm303_vm2, %v2751_v55 }
 0x6c3   : > { %368 = vadd.xlane.f32.xlu1 %v367_v39  ;;  %359 = vadd.xlane.f32.xlu0 %v358_v0 }
 0x6c4   : > { %2394 = vmatmul.mubr.msk.f32.gmra.mrb[26].mxu0 %vm303_vm2, %v2747_v52 }
 0x6c5   : > { %2396 = vmatprep.mubr.msk.f32.mxu0 %vm303_vm2, %v2753_v21 }
 0x6c7   : > { %374 = vadd.xlane.f32.xlu1 %v373_v37  ;;  %365 = vadd.xlane.f32.xlu0 %v364_v43 }
 0x6c8   : > { %2397 = vmatmul.mubr.msk.f32.gmra.mrb[28].mxu0 %vm303_vm2, %v2749_v15 }
 0x6c9   : > { %2399 = vmatprep.mubr.msk.f32.mxu0 %vm303_vm2, %v2757_v48 }
 0x6cb   : > { %371 = vadd.xlane.f32.xlu0 %v370_v47 }
 0x6cc   : > { %2400 = vmatmul.mubr.msk.f32.gmra.mrb[30].mxu0 %vm303_vm2, %v2755_v28 }
 0x6d6   : > { %v740_v45 = vpop.xlane.xlu1 %739 }
 0x6d7   : > { %2758 = vrcp.f32 %v740_v45 }
 0x6da   : > { %v749_v46 = vpop.xlane.xlu1 %748 }
 0x6de   : > { %v755_v8 = vpop.xlane.xlu1 %754 }
 0x6df   : > { %v743_v58 = vpop.xlane.xlu0 %742 }
 0x6e0   : > { %2760 = vrcp.f32 %v743_v58 }
 0x6e1   : > { %v2759_v31 = vpop.eup %2758 }
 0x6e2   : > { %v931_v50 = vmul.f32 %v2759_v31, %v3229_v5  ;;  %v761_v51 = vpop.xlane.xlu1 %760 }
 0x6e3   : > { %v746_v52 = vpop.xlane.xlu0 %745 }
 0x6e4   : > { %2762 = vrcp.f32 %v746_v52  ;;  %1767 = vrot.lane.b32.xlu0 %v931_v50, %s2838_s14 }
 0x6e5   : > { %2764 = vrcp.f32 %v749_v46 }
 0x6e6   : > { %v1161_v56 = vpop.xlane.xlu1 %1160 }
 0x6e7   : > { %v752_v53 = vpop.xlane.xlu0 %751 }
 0x6e8   : > { %2766 = vrcp.f32 %v752_v53 }
 0x6e9   : > { %2768 = vrcp.f32 %v755_v8 }
 0x6ea   : > { %v2761_v60 = vpop.eup %2760  ;;  %v1167_v5 = vpop.xlane.xlu1 %1166 }
 0x6eb   : > { %v758_v6 = vpop.xlane.xlu0 %757  ;;  %v932_v35 = vmul.f32 %v2761_v60, %v3227_v33 }
 0x6ec   : > { %2770 = vrcp.f32 %v758_v6 }
 0x6ed   : > { %1769 = vrot.lane.b32.xlu1 %v932_v35, %s2838_s14  ;;  %2772 = vrcp.f32 %v761_v51 }
 0x6ee   : > { %v2763_v15 = vpop.eup %2762  ;;  %v1173_v59 = vpop.xlane.xlu1 %1172 }
 0x6ef   : > { %v1158_v55 = vpop.xlane.xlu0 %1157  ;;  %v933_v32 = vmul.f32 %v2763_v15, %v3233_v57  ;;  %v2765_v24 = vpop.eup %2764 }
 0x6f0   : > { %2774 = vrcp.f32 %v1158_v55  ;;  %v934_v3 = vmul.f32 %v2765_v24, %v3231_v34 }
 0x6f1   : > { %1771 = vrot.lane.b32.xlu1 %v933_v32, %s2838_s14  ;;  %2776 = vrcp.f32 %v1161_v56 }
 0x6f2   : > { %v2767_v14 = vpop.eup %2766 }
 0x6f3   : > { %v1164_v61 = vpop.xlane.xlu0 %1163  ;;  %v935_v33 = vmul.f32 %v2767_v14, %v3237_v11  ;;  %v2769_v63 = vpop.eup %2768 }
 0x6f4   : > { %2778 = vrcp.f32 %v1164_v61  ;;  %v936_v19 = vmul.f32 %v2769_v63, %v3235_v7  ;;  %v1179_v11 = vpop.xlane.xlu1 %1178 }
 0x6f5   : > { %1773 = vrot.lane.b32.xlu1 %v934_v3, %s2838_s14  ;;  %1775 = vrot.lane.b32.xlu0 %v935_v33, %s2838_s14  ;;  %2780 = vrcp.f32 %v1167_v5 }
 0x6f6   : > { %v2771_v4 = vpop.eup %2770 }
 0x6f7   : > { %v1170_v57 = vpop.xlane.xlu0 %1169  ;;  %v937_v21 = vmul.f32 %v2771_v4, %v3241_v13  ;;  %v2773_v23 = vpop.eup %2772 }
 0x6f8   : > { %2782 = vrcp.f32 %v1170_v57  ;;  %v938_v17 = vmul.f32 %v2773_v23, %v3239_v12 }
 0x6f9   : > { %1777 = vrot.lane.b32.xlu1 %v936_v19, %s2838_s14  ;;  %1779 = vrot.lane.b32.xlu0 %v937_v21, %s2838_s14  ;;  %2784 = vrcp.f32 %v1173_v59 }
 0x6fa   : > { %v2775_v34 = vpop.eup %2774 }
 0x6fb   : > { %v1176_v1 = vpop.xlane.xlu0 %1175  ;;  %v1341_v9 = vmul.f32 %v2775_v34, %v3355_v62  ;;  %v2777_v54 = vpop.eup %2776 }
 0x6fc   : > { %2786 = vrcp.f32 %v1176_v1  ;;  %v1342_v13 = vmul.f32 %v2777_v54, %v3353_v27 }
 0x6fd   : > { %1781 = vrot.lane.b32.xlu1 %v938_v17, %s2838_s14  ;;  %1799 = vrot.lane.b32.xlu0 %v1341_v9, %s2837_s13  ;;  %2788 = vrcp.f32 %v1179_v11 }
 0x6fe   : > { %v2779_v7 = vpop.eup %2778 }
 0x6ff   : > { %v1343_v28 = vmul.f32 %v2779_v7, %v3359_v18  ;;  %v2781_v26 = vpop.eup %2780 }
 0x700   : > { %v1344_v62 = vmul.f32 %v2781_v26, %v3357_v10 }
 0x701   : > { %1801 = vrot.lane.b32.xlu1 %v1342_v13, %s2837_s13  ;;  %1803 = vrot.lane.b32.xlu0 %v1343_v28, %s2837_s13 }
 0x702   : > { %v2783_v12 = vpop.eup %2782 }
 0x703   : > { %v1345_v25 = vmul.f32 %v2783_v12, %v3363_v16  ;;  %v2785_v48 = vpop.eup %2784 }
 0x704   : > { %v1346_v27 = vmul.f32 %v2785_v48, %v3361_v22 }
 0x705   : > { %1805 = vrot.lane.b32.xlu1 %v1344_v62, %s2837_s13  ;;  %1807 = vrot.lane.b32.xlu0 %v1345_v25, %s2837_s13 }
 0x706   : > { %v2787_v20 = vpop.eup %2786 }
 0x707   : > { %v1347_v18 = vmul.f32 %v2787_v20, %v3367_v2  ;;  %v2789_v44 = vpop.eup %2788 }
 0x708   : > { %v1348_v49 = vmul.f32 %v2789_v44, %v3365_v30 }
 0x709   : > { %1809 = vrot.lane.b32.xlu1 %v1346_v27, %s2837_s13  ;;  %1811 = vrot.lane.b32.xlu0 %v1347_v18, %s2837_s13 }
 0x70d   : > { %1813 = vrot.lane.b32.xlu1 %v1348_v49, %s2837_s13 }
 0x733   : > { %v1571_v10 = vpop.xlane.xlu1 %1570 }
 0x734   : > { %v1568_v16 = vpop.xlane.xlu0 %1567  ;;  %2790 = vrcp.f32 %v1571_v10 }
 0x735   : > { %2792 = vrcp.f32 %v1568_v16 }
 0x738   : > { %v1577_v29 = vpop.xlane.xlu1 %1576 }
 0x739   : > { %2794 = vrcp.f32 %v1577_v29 }
 0x73c   : > { %v1574_v39 = vpop.xlane.xlu0 %1573  ;;  %v1583_v0 = vpop.xlane.xlu1 %1582 }
 0x73d   : > { %2796 = vrcp.f32 %v1574_v39 }
 0x73e   : > { %2798 = vrcp.f32 %v1583_v0  ;;  %v2791_v37 = vpop.eup %2790 }
 0x73f   : > { %v2793_v45 = vpop.eup %2792 }
 0x740   : > { %v1580_v22 = vpop.xlane.xlu0 %1579 }
 0x741   : > { %2800 = vrcp.f32 %v1580_v22 }
 0x743   : > { %v2795_v58 = vpop.eup %2794 }
 0x744   : > { %v1589_v2 = vpop.xlane.xlu1 %1588 }
 0x745   : > { %2802 = vrcp.f32 %v1589_v2 }
 0x747   : > { %v2797_v50 = vpop.eup %2796 }
 0x748   : > { %v1586_v43 = vpop.xlane.xlu0 %1585  ;;  %v2799_v56 = vpop.eup %2798 }
 0x749   : > { %2804 = vrcp.f32 %v1586_v43  ;;  %v357_v33 = vpop.xlane.xlu1 %356 }
 0x74a   : > { %2806 = vrcp.f32 %v357_v33  ;;  %v3586_v33 = vld [vmem:[#allocation4_spill] sm:$0xff] }
 0x74b   : > { %v2801_v6 = vpop.eup %2800 }
 0x74c   : > { %v354_v4 = vpop.xlane.xlu0 %353 }
 0x74d   : > { %v363_v63 = vpop.xlane.xlu1 %362  ;;  %2808 = vrcp.f32 %v354_v4 }
 0x74e   : > { %2810 = vrcp.f32 %v363_v63 }
 0x74f   : > { %v2803_v55 = vpop.eup %2802 }
 0x750   : > { %v360_v19 = vpop.xlane.xlu0 %359 }
 0x751   : > { %v369_v59 = vpop.xlane.xlu1 %368  ;;  %2812 = vrcp.f32 %v360_v19 }
 0x752   : > { %2814 = vrcp.f32 %v369_v59 }
 0x753   : > { %v2805_v24 = vpop.eup %2804 }
 0x754   : > { %v366_v23 = vpop.xlane.xlu0 %365  ;;  %v2807_v20 = vpop.eup %2806 }
 0x755   : > { %v375_v57 = vpop.xlane.xlu1 %374  ;;  %2816 = vrcp.f32 %v366_v23  ;;  %v514_v44 = vmul.f32 %v2807_v20, %v3095_v36 }
 0x756   : > { %2818 = vrcp.f32 %v375_v57 }
 0x757   : > { %v2809_v27 = vpop.eup %2808 }
 0x758   : > { %v372_v11 = vpop.xlane.xlu0 %371  ;;  %v2811_v10 = vpop.eup %2810  ;;  %v513_v16 = vmul.f32 %v2809_v27, %v3097_v38 }
 0x759   : > { %2820 = vrcp.f32 %v372_v11  ;;  %v516_v2 = vmul.f32 %v2811_v10, %v3099_v40 }
 0x75b   : > { %v2813_v29 = vpop.eup %2812 }
 0x75c   : > { %v1768_v17 = vpop.permute.xlu0 %1767 }
 0x75d   : > { %v1855_v0 = vsel %vm149_vm0, %v513_v16, %v1768_v17 }
 0x75f   : > { %v1770_v21 = vpop.permute.xlu1 %1769 }
 0x760   : > { %v1856_v39 = vsel %vm149_vm0, %v514_v44, %v1770_v21 }
 0x763   : > { %v1772_v34 = vpop.permute.xlu1 %1771 }
 0x767   : > { %v1774_v1 = vpop.permute.xlu1 %1773  ;;  %v1776_v54 = vpop.permute.xlu0 %1775 }
 0x76b   : > { %v1778_v9 = vpop.permute.xlu1 %1777  ;;  %v3524_v13 = vpop.permute.xlu0 %1779 }
 0x76f   : > { %v3522_v7 = vpop.permute.xlu1 %1781  ;;  %v1800_v26 = vpop.permute.xlu0 %1799 }
 0x770   : > { %v1863_v38 = vsel %vm303_vm2, %v1855_v0, %v1800_v26 }
 0x773   : > { %v1802_v28 = vpop.permute.xlu1 %1801  ;;  %v1804_v62 = vpop.permute.xlu0 %1803 }
 0x774   : > { %v1864_v22 = vsel %vm303_vm2, %v1856_v39, %v1802_v28 }
 0x777   : > { %v1806_v12 = vpop.permute.xlu1 %1805  ;;  %v1808_v48 = vpop.permute.xlu0 %1807 }
 0x77b   : > { %v1810_v25 = vpop.permute.xlu1 %1809  ;;  %v1812_v49 = vpop.permute.xlu0 %1811 }
 0x77f   : > { %v1814_v18 = vpop.permute.xlu1 %1813 }
 0x793   : > { %v2392_v47 = vpop.f32.mrb[24].mxu0 }
 0x794   : > { %v1752_v30 = vmul.f32 %v2791_v37, %v2392_v47  ;;  %v1704_v46 = vpop.f32.mrb[25].mxu0  ;;  %v2815_v47 = vpop.eup %2814 }
 0x795   : > { %v1751_v8 = vmul.f32 %v2793_v45, %v1704_v46  ;;  %v515_v45 = vmul.f32 %v2813_v29, %v3101_v41  ;;  %v2817_v46 = vpop.eup %2816 }
 0x796   : > { %1833 = vrot.lane.b32.xlu1 %v1752_v30, %s2836_s12 }
 0x797   : > { %1831 = vrot.lane.b32.xlu0 %v1751_v8, %s2836_s12  ;;  %v2395_v31 = vpop.f32.mrb[26].mxu0  ;;  %v1858_v8 = vsel %vm149_vm0, %v516_v2, %v1774_v1 }
 0x798   : > { %v1754_v51 = vmul.f32 %v2795_v58, %v2395_v31  ;;  %v1714_v52 = vpop.f32.mrb[27].mxu0  ;;  %v1857_v58 = vsel %vm149_vm0, %v515_v45, %v1772_v34  ;;  %v1866_v40 = vsel %vm303_vm2, %v1858_v8, %v1806_v12 }
 0x799   : > { %v1753_v53 = vmul.f32 %v2797_v50, %v1714_v52  ;;  %v518_v50 = vmul.f32 %v2815_v47, %v3103_v42 }
 0x79a   : > { %1837 = vrot.lane.b32.xlu1 %v1754_v51, %s2836_s12  ;;  %v1865_v51 = vsel %vm303_vm2, %v1857_v58, %v1804_v62 }
 0x79b   : > { %1835 = vrot.lane.b32.xlu0 %v1753_v53, %s2836_s12  ;;  %v2398_v60 = vpop.f32.mrb[28].mxu0  ;;  %v2819_v53 = vpop.eup %2818 }
 0x79c   : > { %v1756_v35 = vmul.f32 %v2799_v56, %v2398_v60  ;;  %v1724_v15 = vpop.f32.mrb[29].mxu0  ;;  %v3584_v56 = vld [vmem:[#allocation2_spill] sm:$0xff] }
 0x79d   : > { %v1755_v5 = vmul.f32 %v2801_v6, %v1724_v15  ;;  %v517_v60 = vmul.f32 %v2817_v46, %v3584_v56  ;;  %v1860_v15 = vsel %vm149_vm0, %v518_v50, %v1778_v9 }
 0x79e   : > { %1841 = vrot.lane.b32.xlu1 %v1756_v35, %s2836_s12  ;;  %v2821_v35 = vpop.eup %2820  ;;  %v1868_v42 = vsel %vm303_vm2, %v1860_v15, %v1810_v25 }
 0x79f   : > { %1839 = vrot.lane.b32.xlu0 %v1755_v5, %s2836_s12  ;;  %v2401_v32 = vpop.f32.mrb[30].mxu0  ;;  %v1859_v5 = vsel %vm149_vm0, %v517_v60, %v1776_v54  ;;  %v519_v63 = vmul.f32 %v2821_v35, %v3586_v33 }
 0x7a0   : > { %v1758_v14 = vmul.f32 %v2803_v55, %v2401_v32  ;;  %v1734_v61 = vpop.f32.mrb[31].mxu0  ;;  %v3585_v32 = vld [vmem:[#allocation3_spill] sm:$0xff] }
 0x7a1   : > { %v1757_v3 = vmul.f32 %v2805_v24, %v1734_v61  ;;  %v520_v24 = vmul.f32 %v2819_v53, %v3585_v32  ;;  %v1861_v57 = vsel %vm149_vm0, %v519_v63, %v3524_v13 }
 0x7a2   : > { %1845 = vrot.lane.b32.xlu1 %v1758_v14, %s2836_s12  ;;  %v1867_v14 = vsel %vm303_vm2, %v1859_v5, %v1808_v48  ;;  %v1869_v23 = vsel %vm303_vm2, %v1861_v57, %v1812_v49 }
 0x7a3   : > { %1843 = vrot.lane.b32.xlu0 %v1757_v3, %s2836_s12  ;;  %v1862_v4 = vsel %vm149_vm0, %v520_v24, %v3522_v7 }
 0x7a4   : > { %v1870_v19 = vsel %vm303_vm2, %v1862_v4, %v1814_v18 }
 0x808   : > { %v1834_v36 = vpop.permute.xlu1 %1833 }
 0x809   : > { %v1873_v37 = vsel %vm1871_vm3, %v1864_v22, %v1834_v36  ;;  %v1832_v43 = vpop.permute.xlu0 %1831 }
 0x80a   : > { %1881 = vst [vmem:[%s3533_s18 + $0x8] sm:$0xff] %v1873_v37  ;;  %v1872_v30 = vsel %vm1871_vm3, %v1863_v38, %v1832_v43 }
 0x80b   : > { %1880 = vst [vmem:[%s3533_s18] sm:$0xff] %v1872_v30 }
 0x80c   : > { %v1838_v31 = vpop.permute.xlu1 %1837 }
 0x80d   : > { %v1875_v52 = vsel %vm1871_vm3, %v1866_v40, %v1838_v31  ;;  %v1836_v41 = vpop.permute.xlu0 %1835 }
 0x80e   : > { %1883 = vst [vmem:[%s3533_s18 + $0x18] sm:$0xff] %v1875_v52  ;;  %v1874_v6 = vsel %vm1871_vm3, %v1865_v51, %v1836_v41 }
 0x80f   : > { %1882 = vst [vmem:[%s3533_s18 + $0x10] sm:$0xff] %v1874_v6 }
 0x810   : > { %v1842_v55 = vpop.permute.xlu1 %1841 }
 0x811   : > { %v1877_v61 = vsel %vm1871_vm3, %v1868_v42, %v1842_v55  ;;  %v1840_v3 = vpop.permute.xlu0 %1839 }
 0x812   : > { %1885 = vst [vmem:[%s3533_s18 + $0x28] sm:$0xff] %v1877_v61  ;;  %v1876_v59 = vsel %vm1871_vm3, %v1867_v14, %v1840_v3 }
 0x813   : > { %1884 = vst [vmem:[%s3533_s18 + $0x20] sm:$0xff] %v1876_v59 }
 0x814   : > { %v1846_v21 = vpop.permute.xlu1 %1845 }
 0x815   : > { %v1879_v34 = vsel %vm1871_vm3, %v1870_v19, %v1846_v21  ;;  %v1844_v11 = vpop.permute.xlu0 %1843 }
 0x816   : > { %1887 = vst [vmem:[%s3533_s18 + $0x38] sm:$0xff] %v1879_v34  ;;  %v1878_v1 = vsel %vm1871_vm3, %v1869_v23, %v1844_v11 }
 0x817   : > { %1886 = vst [vmem:[%s3533_s18 + $0x30] sm:$0xff] %v1878_v1 }
 0x818 PF: > { %s11_s6 = sadd.s32 1, %s2834_s6  }
 0x819   : > { %p8_p4 = scmp.ge.s32.totalorder %s11_s6, 4  }
 0x81b   :  { %10 = sbr.rel (!%p8_p4) target bundleno = 1 (0x1), region = 54 }

// kernel: encoder_layer_forward.7
= control target key start
LH: loop header
LB: loop body
LE: loop exit
PB: predicated region body
PF: predicated region fallthrough
CT: control target
= control target key end

     0   :  { %12 = vsyncpa [#allocation4], 0  ;;  %s2775_s0 = inlined_call_operand.vmem [shape: f32[128,128], index: 0, kind: input, shape index: {}]   ;;  %s2776_s1 = inlined_call_operand.vmem [shape: f32[128,512], index: 1, kind: input, shape index: {}]   ;;  %s2777_s2 = inlined_call_operand.vmem [shape: f32[1,512], index: 2, kind: input, shape index: {}]   ;;  %s2778_s3 = inlined_call_operand.vmem [shape: f32[512,128], index: 3, kind: input, shape index: {}]   ;;  %s2779_s4 = inlined_call_operand.vmem [shape: f32[1,128], index: 4, kind: input, shape index: {}]   ;;  %s2780_s5 = inlined_call_operand.vmem [shape: f32[1,128], index: 5, kind: input, shape index: {}]   ;;  %s2781_s6 = inlined_call_operand.vmem [shape: f32[1,128], index: 6, kind: input, shape index: {}]   ;;  %s2782_s7 = inlined_call_operand.hbm [shape: f32[128,128], index: 7, kind: output, shape index: {}]  }
   0x1   :  { %14 = vsyncpa [#allocation4 + $0x1], 0  ;;  %s1962_s24 = smov 0   ;;  %s1964_s25 = smov 0  }
   0x2   :  { %s1966_s26 = smov 0   ;;  %s1968_s27 = smov 0  }
   0x3   :  { %s1970_s28 = smov 0   ;;  %s1972_s29 = smov 0  }
   0x4 LB: > { %s1440_s30 = sadd.s32 4294967295, %s1916_s29   ;;  %s1441_s8 = sadd.s32 4294967294, %s1916_s29   ;;  %s1916_s29 = sphi %s1972_s29, %s20_s29   ;;  %s1912_s28 = sphi %s1970_s28, %s2790_s28   ;;  %s1908_s27 = sphi %s1968_s27, %s2789_s27   ;;  %s1904_s26 = sphi %s1966_s26, %s2788_s26   ;;  %s1900_s25 = sphi %s1964_s25, %s2787_s25   ;;  %s1896_s24 = sphi %s1962_s24, %s2786_s24  }
   0x5   : > { %s32_s9 = sadd.s32 1, %s1912_s28  ;;  %s206_s10 = sadd.s32 1, %s1904_s26 }
   0x6   : > { %p34_p0 = scmp.ge.s32.totalorder %s32_s9, 2  ;;  %p216_p1 = scmp.ne.s32.totalorder %s1904_s26, %s1900_s25 }
   0x7   : > { %p217_p2 = scmp.eq.s32.totalorder %s1440_s30, 1  ;;  %p222_p3 = scmp.ne.s32.totalorder %s1900_s25, %s1896_s24 }
   0x8   : > { %s2792_s9 = smov (%p34_p0, %s32_s9), 0  ;;  %p223_p5 = scmp.eq.s32.totalorder %s1441_s8, 1 }
   0x9   : > { %p2002_p4 = por %p217_p2, %p216_p1  ;;  %s203_s12 = ssub.s32 %s1912_s28, %s2792_s9 }
   0xa   : > { %p1447_p6 = scmp.ge.s32.totalorder %s1916_s29, 1  ;;  %p204_p7 = scmp.eq.s32.totalorder %s203_s12, 0 }
   0xb   : > { %p2009_p8 = por %p223_p5, %p222_p3  ;;  %p285_p9 = scmp.lt.s32.totalorder %s1916_s29, 3 }
   0xc   : > { %s2015_s14 = scalar_select %p204_p7, %s1904_s26, %s206_s10  }
   0xd   : > { %p286_p10 = pnand %p1447_p6, %p285_p9 }
   0xe   : > { %v376_v0 = vld [vmem:[%s2776_s1 + $0x8] sm:$0xff] (!%p286_p10)  ;;  %v378_v2 = vld [vmem:[%s2776_s1 + $0x18] sm:$0xff] (!%p286_p10)  ;;  %v375_v5 = vld [vmem:[%s2776_s1] sm:$0xff] (!%p286_p10)  ;;  %v1918_v7 = vmov (!%p286_p10), 0.0   ;;  %s1449_s8 = sshll.u32 (!%p286_p10), %s1908_s27, 3  ;;  %s1459_s23 = sshll.u32 (!%p286_p10), %s1908_s27, 10 }
   0xf   : > { %289 = sbr.rel (%p286_p10) target bundleno = 867 (0x363), region = 48  ;;  %v380_v1 = vld [vmem:[%s2776_s1 + $0x28] sm:$0xff] (!%p286_p10)  ;;  %v382_v4 = vld [vmem:[%s2776_s1 + $0x38] sm:$0xff] (!%p286_p10)  ;;  %v379_v6 = vld [vmem:[%s2776_s1 + $0x20] sm:$0xff] (!%p286_p10)  ;;  %525 = vmatprep.mubr.f32.mxu0 (!%p286_p10), %v1918_v7  ;;  %638 = vmatprep.mubr.f32.mxu1 (!%p286_p10), %v1918_v7  ;;  %p2172_p11 = scmp.lt.s32.totalorder (!%p286_p10), %s1449_s8, 15 }
  0x10   : > { %v1572_v3 = vpack.c.bf16 (!%p286_p10), %v380_v1, %v376_v0  ;;  %v1604_v8 = vpack.c.bf16 (!%p286_p10), %v382_v4, %v378_v2  ;;  %v1574_v9 = vpack.c.bf16 (!%p286_p10), %v379_v6, %v375_v5  ;;  %v377_v10 = vld [vmem:[%s2776_s1 + $0x10] sm:$0xff] (!%p286_p10)  ;;  %v384_v12 = vld [vmem:[%s2776_s1 + $0x48] sm:$0xff] (!%p286_p10)  ;;  %v386_v15 = vld [vmem:[%s2776_s1 + $0x58] sm:$0xff] (!%p286_p10) }
  0x11   : > { %v381_v11 = vld [vmem:[%s2776_s1 + $0x30] sm:$0xff] (!%p286_p10)  ;;  %v388_v14 = vld [vmem:[%s2776_s1 + $0x68] sm:$0xff] (!%p286_p10)  ;;  %v390_v16 = vld [vmem:[%s2776_s1 + $0x78] sm:$0xff] (!%p286_p10) }
  0x12   : > { %1573 = vmatprep.subr.bf16.mxu0 (!%p286_p10), %v1572_v3  ;;  %v1606_v13 = vpack.c.bf16 (!%p286_p10), %v381_v11, %v377_v10  ;;  %1605 = vmatprep.subr.bf16.mxu1 (!%p286_p10), %v1604_v8  ;;  %v1576_v17 = vpack.c.bf16 (!%p286_p10), %v388_v14, %v384_v12  ;;  %v1608_v18 = vpack.c.bf16 (!%p286_p10), %v390_v16, %v386_v15  ;;  %v383_v19 = vld [vmem:[%s2776_s1 + $0x40] sm:$0xff] (!%p286_p10)  ;;  %v385_v21 = vld [vmem:[%s2776_s1 + $0x50] sm:$0xff] (!%p286_p10)  ;;  %v392_v24 = vld [vmem:[%s2776_s1 + $0x88] sm:$0xff] (!%p286_p10) }
  0x13   : > { %1575 = vmatpush1.bf16.msra.mxu0 (!%p286_p10), %v1574_v9  ;;  %v387_v20 = vld [vmem:[%s2776_s1 + $0x60] sm:$0xff] (!%p286_p10)  ;;  %v389_v23 = vld [vmem:[%s2776_s1 + $0x70] sm:$0xff] (!%p286_p10)  ;;  %v396_v25 = vld [vmem:[%s2776_s1 + $0xa8] sm:$0xff] (!%p286_p10) }
  0x14   : > { %1607 = vmatpush1.bf16.msra.mxu1 (!%p286_p10), %v1606_v13  ;;  %v1578_v22 = vpack.c.bf16 (!%p286_p10), %v387_v20, %v383_v19  ;;  %1577 = vmatprep.subr.bf16.mxu0 (!%p286_p10), %v1576_v17  ;;  %v1610_v26 = vpack.c.bf16 (!%p286_p10), %v389_v23, %v385_v21  ;;  %v1580_v27 = vpack.c.bf16 (!%p286_p10), %v396_v25, %v392_v24  ;;  %v394_v28 = vld [vmem:[%s2776_s1 + $0x98] sm:$0xff] (!%p286_p10)  ;;  %v391_v30 = vld [vmem:[%s2776_s1 + $0x80] sm:$0xff] (!%p286_p10)  ;;  %v393_v33 = vld [vmem:[%s2776_s1 + $0x90] sm:$0xff] (!%p286_p10) }
  0x15   : > { %1609 = vmatprep.subr.bf16.mxu1 (!%p286_p10), %v1608_v18  ;;  %v398_v29 = vld [vmem:[%s2776_s1 + $0xb8] sm:$0xff] (!%p286_p10)  ;;  %v395_v32 = vld [vmem:[%s2776_s1 + $0xa0] sm:$0xff] (!%p286_p10)  ;;  %v397_v34 = vld [vmem:[%s2776_s1 + $0xb0] sm:$0xff] (!%p286_p10) }
  0x16   : > { %v1612_v31 = vpack.c.bf16 %v398_v29, %v394_v28  ;;  %v1582_v35 = vpack.c.bf16 %v395_v32, %v391_v30  ;;  %v400_v36 = vld [vmem:[%s2776_s1 + $0xc8] sm:$0xff]  ;;  %v402_v38 = vld [vmem:[%s2776_s1 + $0xd8] sm:$0xff]  ;;  %v1614_v39 = vpack.c.bf16 %v397_v34, %v393_v33  ;;  %v399_v42 = vld [vmem:[%s2776_s1 + $0xc0] sm:$0xff]  ;;  %s2794_s8 = smov (!%p2172_p11, %s1449_s8), 15 }
  0x17   : > { %1579 = vmatpush1.bf16.msra.mxu0 %v1578_v22  ;;  %v404_v37 = vld [vmem:[%s2776_s1 + $0xe8] sm:$0xff]  ;;  %v406_v41 = vld [vmem:[%s2776_s1 + $0xf8] sm:$0xff]  ;;  %v403_v43 = vld [vmem:[%s2776_s1 + $0xe0] sm:$0xff]  ;;  %s1450_s19 = sshll.u32 %s2794_s8, 3  ;;  %s1919_s8 = smov [#allocation3]  }
  0x18   : > { %1611 = vmatpush1.bf16.msra.mxu1 %v1610_v26  ;;  %1581 = vmatprep.subr.bf16.mxu0 %v1580_v27  ;;  %v1584_v40 = vpack.c.bf16 %v404_v37, %v400_v36  ;;  %v1616_v44 = vpack.c.bf16 %v406_v41, %v402_v38  ;;  %v401_v45 = vld [vmem:[%s2776_s1 + $0xd0] sm:$0xff]  ;;  %v408_v47 = vld [vmem:[%s2776_s1 + $0x108] sm:$0xff]  ;;  %v410_v49 = vld [vmem:[%s2776_s1 + $0x118] sm:$0xff]  ;;  %v1586_v51 = vpack.c.bf16 %v403_v43, %v399_v42  ;;  %s2237_s17 = scalar_lea.vmem %s2775_s0, %s1450_s19  ;;  %s2722_s19 = scalar_lea.hbm %s2782_s7, %s1459_s23 }
  0x19   : > { %1613 = vmatprep.subr.bf16.mxu1 %v1612_v31  ;;  %v405_v46 = vld [vmem:[%s2776_s1 + $0xf0] sm:$0xff]  ;;  %v412_v48 = vld [vmem:[%s2776_s1 + $0x128] sm:$0xff]  ;;  %v414_v50 = vld [vmem:[%s2776_s1 + $0x138] sm:$0xff]  ;;  %s1842_s16 = sshll.u32 %s1919_s8, 4  ;;  %s1843_s16 = int_to_ptr.vmem [resolvable:$false] %s1842_s16 }
  0x1a   : > { %v1618_v52 = vpack.c.bf16 %v405_v46, %v401_v45  ;;  %v1588_v53 = vpack.c.bf16 %v412_v48, %v408_v47  ;;  %v407_v54 = vld [vmem:[%s2776_s1 + $0x100] sm:$0xff]  ;;  %v409_v56 = vld [vmem:[%s2776_s1 + $0x110] sm:$0xff]  ;;  %v1620_v57 = vpack.c.bf16 %v414_v50, %v410_v49  ;;  %v416_v59 = vld [vmem:[%s2776_s1 + $0x148] sm:$0xff] }
  0x1b   : > { %1583 = vmatpush1.bf16.msra.mxu0 %v1582_v35  ;;  %v411_v55 = vld [vmem:[%s2776_s1 + $0x120] sm:$0xff]  ;;  %v413_v58 = vld [vmem:[%s2776_s1 + $0x130] sm:$0xff]  ;;  %v420_v60 = vld [vmem:[%s2776_s1 + $0x168] sm:$0xff] }
  0x1c   : > { %1615 = vmatpush1.bf16.msra.mxu1 %v1614_v39  ;;  %1585 = vmatprep.subr.bf16.mxu0 %v1584_v40  ;;  %v418_v61 = vld [vmem:[%s2776_s1 + $0x158] sm:$0xff]  ;;  %v1590_v63 = vpack.c.bf16 %v411_v55, %v407_v54  ;;  %v1622_v0 = vpack.c.bf16 %v413_v58, %v409_v56  ;;  %v1592_v1 = vpack.c.bf16 %v420_v60, %v416_v59  ;;  %v415_v2 = vld [vmem:[%s2776_s1 + $0x140] sm:$0xff]  ;;  %v417_v4 = vld [vmem:[%s2776_s1 + $0x150] sm:$0xff] }
  0x1d   : > { %1617 = vmatprep.subr.bf16.mxu1 %v1616_v44  ;;  %v422_v62 = vld [vmem:[%s2776_s1 + $0x178] sm:$0xff]  ;;  %v419_v3 = vld [vmem:[%s2776_s1 + $0x160] sm:$0xff]  ;;  %v421_v6 = vld [vmem:[%s2776_s1 + $0x170] sm:$0xff] }
  0x1e   : > { %v1624_v5 = vpack.c.bf16 %v422_v62, %v418_v61  ;;  %v424_v8 = vld [vmem:[%s2776_s1 + $0x188] sm:$0xff]  ;;  %v426_v10 = vld [vmem:[%s2776_s1 + $0x198] sm:$0xff]  ;;  %v1594_v12 = vpack.c.bf16 %v419_v3, %v415_v2  ;;  %v1626_v13 = vpack.c.bf16 %v421_v6, %v417_v4  ;;  %v423_v15 = vld [vmem:[%s2776_s1 + $0x180] sm:$0xff] }
  0x1f   : > { %1587 = vmatpush1.bf16.msra.mxu0 %v1586_v51  ;;  %v428_v9 = vld [vmem:[%s2776_s1 + $0x1a8] sm:$0xff]  ;;  %v430_v11 = vld [vmem:[%s2776_s1 + $0x1b8] sm:$0xff]  ;;  %v427_v16 = vld [vmem:[%s2776_s1 + $0x1a0] sm:$0xff] }
  0x20   : > { %1619 = vmatpush1.bf16.msra.mxu1 %v1618_v52  ;;  %1589 = vmatprep.subr.bf16.mxu0 %v1588_v53  ;;  %v1596_v14 = vpack.c.bf16 %v428_v9, %v424_v8  ;;  %v425_v17 = vld [vmem:[%s2776_s1 + $0x190] sm:$0xff]  ;;  %v1628_v18 = vpack.c.bf16 %v430_v11, %v426_v10  ;;  %v432_v20 = vld [vmem:[%s2776_s1 + $0x1c8] sm:$0xff]  ;;  %v434_v22 = vld [vmem:[%s2776_s1 + $0x1d8] sm:$0xff]  ;;  %v1598_v24 = vpack.c.bf16 %v427_v16, %v423_v15 }
  0x21   : > { %1621 = vmatprep.subr.bf16.mxu1 %v1620_v57  ;;  %v429_v19 = vld [vmem:[%s2776_s1 + $0x1b0] sm:$0xff]  ;;  %v436_v21 = vld [vmem:[%s2776_s1 + $0x1e8] sm:$0xff]  ;;  %v438_v23 = vld [vmem:[%s2776_s1 + $0x1f8] sm:$0xff] }
  0x22   : > { %v1630_v25 = vpack.c.bf16 %v429_v19, %v425_v17  ;;  %v1600_v26 = vpack.c.bf16 %v436_v21, %v432_v20  ;;  %v431_v27 = vld [vmem:[%s2776_s1 + $0x1c0] sm:$0xff]  ;;  %v433_v29 = vld [vmem:[%s2776_s1 + $0x1d0] sm:$0xff]  ;;  %v1632_v30 = vpack.c.bf16 %v438_v23, %v434_v22  ;;  %v872_v33 = vld [vmem:[%s2778_s3 + $0x88] sm:$0xff] }
  0x23   : > { %1591 = vmatpush1.bf16.msra.mxu0 %v1590_v63  ;;  %v435_v28 = vld [vmem:[%s2776_s1 + $0x1e0] sm:$0xff]  ;;  %v437_v31 = vld [vmem:[%s2776_s1 + $0x1f0] sm:$0xff]  ;;  %v904_v35 = vld [vmem:[%s2778_s3 + $0x188] sm:$0xff] }
  0x24   : > { %1623 = vmatpush1.bf16.msra.mxu1 %v1622_v0  ;;  %1593 = vmatprep.subr.bf16.mxu0 %v1592_v1  ;;  %v871_v32 = vld [vmem:[%s2778_s3 + $0x80] sm:$0xff]  ;;  %v1602_v36 = vpack.c.bf16 %v435_v28, %v431_v27  ;;  %v1634_v37 = vpack.c.bf16 %v437_v31, %v433_v29  ;;  %v856_v41 = vld [vmem:[%s2778_s3 + $0x8] sm:$0xff]  ;;  %v873_v44 = vld [vmem:[%s2778_s3 + $0x90] sm:$0xff] }
  0x25   : > { %1625 = vmatprep.subr.bf16.mxu1 %v1624_v5  ;;  %v903_v34 = vld [vmem:[%s2778_s3 + $0x180] sm:$0xff]  ;;  %v1636_v38 = vpack.c.bf16 %v872_v33, %v871_v32  ;;  %v888_v43 = vld [vmem:[%s2778_s3 + $0x108] sm:$0xff]  ;;  %v874_v45 = vld [vmem:[%s2778_s3 + $0x98] sm:$0xff] }
  0x26   : > { %v1668_v39 = vpack.c.bf16 %v904_v35, %v903_v34  ;;  %v855_v40 = vld [vmem:[%s2778_s3] sm:$0xff]  ;;  %v905_v47 = vld [vmem:[%s2778_s3 + $0x190] sm:$0xff]  ;;  %v906_v48 = vld [vmem:[%s2778_s3 + $0x198] sm:$0xff]  ;;  %v1640_v51 = vpack.c.bf16 %v874_v45, %v873_v44 }
  0x27   : > { %1595 = vmatpush1.bf16.msra.mxu0 %v1594_v12  ;;  %v887_v42 = vld [vmem:[%s2778_s3 + $0x100] sm:$0xff]  ;;  %v1638_v49 = vpack.c.bf16 %v856_v41, %v855_v40  ;;  %v857_v52 = vld [vmem:[%s2778_s3 + $0x10] sm:$0xff]  ;;  %v858_v53 = vld [vmem:[%s2778_s3 + $0x18] sm:$0xff]  ;;  %v1672_v55 = vpack.c.bf16 %v906_v48, %v905_v47 }
  0x28   : > { %1627 = vmatpush1.bf16.msra.mxu1 %v1626_v13  ;;  %1597 = vmatprep.subr.bf16.mxu0 %v1596_v14  ;;  %v2258_v46 = vld [vmem:[%s2237_s17] sm:$0xff]  ;;  %v1670_v50 = vpack.c.bf16 %v888_v43, %v887_v42  ;;  %v889_v54 = vld [vmem:[%s2778_s3 + $0x110] sm:$0xff]  ;;  %v890_v56 = vld [vmem:[%s2778_s3 + $0x118] sm:$0xff]  ;;  %v1642_v62 = vpack.c.bf16 %v858_v53, %v857_v52 }
  0x29   : > { %1629 = vmatprep.subr.bf16.mxu1 %v1628_v18  ;;  %v875_v57 = vld [vmem:[%s2778_s3 + $0xa0] sm:$0xff]  ;;  %v876_v58 = vld [vmem:[%s2778_s3 + $0xa8] sm:$0xff]  ;;  %v1674_v63 = vpack.c.bf16 %v890_v56, %v889_v54  ;;  %v2313_v6 = vld [vmem:[%s2237_s17 + $0x10] sm:$0xff] }
  0x2a   : > { %v2288_v59 = vld [vmem:[%s2237_s17 + $0x8] sm:$0xff]  ;;  %v907_v60 = vld [vmem:[%s2778_s3 + $0x1a0] sm:$0xff]  ;;  %v1644_v0 = vpack.c.bf16 %v876_v58, %v875_v57  ;;  %v2320_v10 = vld [vmem:[%s2237_s17 + $0x18] sm:$0xff] }
  0x2b   : > { %1599 = vmatpush1.bf16.msra.mxu0 %v1598_v24  ;;  %v908_v61 = vld [vmem:[%s2778_s3 + $0x1a8] sm:$0xff]  ;;  %v859_v1 = vld [vmem:[%s2778_s3 + $0x20] sm:$0xff]  ;;  %v2341_v13 = vld [vmem:[%s2237_s17 + $0x30] sm:$0xff] }
  0x2c   : > { %1631 = vmatpush1.bf16.msra.mxu1 %v1630_v25  ;;  %1601 = vmatprep.subr.bf16.mxu0 %v1600_v26  ;;  %v860_v2 = vld [vmem:[%s2778_s3 + $0x28] sm:$0xff]  ;;  %v1676_v3 = vpack.c.bf16 %v908_v61, %v907_v60  ;;  %v891_v4 = vld [vmem:[%s2778_s3 + $0x120] sm:$0xff]  ;;  %v2348_v14 = vld [vmem:[%s2237_s17 + $0x38] sm:$0xff] }
  0x2d   : > { %1633 = vmatprep.subr.bf16.mxu1 %v1632_v30  ;;  %v892_v5 = vld [vmem:[%s2778_s3 + $0x128] sm:$0xff]  ;;  %v1646_v8 = vpack.c.bf16 %v860_v2, %v859_v1  ;;  %v2327_v11 = vld [vmem:[%s2237_s17 + $0x20] sm:$0xff]  ;;  %v877_v15 = vld [vmem:[%s2778_s3 + $0xb0] sm:$0xff] }
  0x2e   : > { %v1678_v9 = vpack.c.bf16 %v892_v5, %v891_v4  ;;  %v2334_v12 = vld [vmem:[%s2237_s17 + $0x28] sm:$0xff]  ;;  %v878_v16 = vld [vmem:[%s2778_s3 + $0xb8] sm:$0xff]  ;;  %v909_v17 = vld [vmem:[%s2778_s3 + $0x1b0] sm:$0xff]  ;;  %s328_s17 = sand.u32 1, %s1900_s25  }
  0x2f   : > { %1603 = vmatpush1.bf16.msra.mxu0 %v1602_v36  ;;  %v1648_v18 = vpack.c.bf16 %v878_v16, %v877_v15  ;;  %v861_v19 = vld [vmem:[%s2778_s3 + $0x30] sm:$0xff]  ;;  %v862_v20 = vld [vmem:[%s2778_s3 + $0x38] sm:$0xff]  ;;  %v879_v26 = vld [vmem:[%s2778_s3 + $0xc0] sm:$0xff]  ;;  %s1448_s18 = sshll.u32 %s328_s17, 6  ;;  %s2729_s15 = scalar_lea.sflag [#allocation4], %s328_s17 }
  0x30   : > { %1635 = vmatpush1.bf16.msra.mxu1 %v1634_v37  ;;  %1637 = vmatprep.subr.bf16.mxu0 %v1636_v38  ;;  %v1650_v22 = vpack.c.bf16 %v862_v20, %v861_v19  ;;  %v893_v23 = vld [vmem:[%s2778_s3 + $0x130] sm:$0xff]  ;;  %v894_v24 = vld [vmem:[%s2778_s3 + $0x138] sm:$0xff]  ;;  %v880_v27 = vld [vmem:[%s2778_s3 + $0xc8] sm:$0xff]  ;;  %s2695_s22 = scalar_lea.vmem [#allocation3], %s1448_s18  ;;  %s1844_s18 = scalar_lea.vmem %s1843_s16, 2048 }
  0x31   : > { %1669 = vmatprep.subr.bf16.mxu1 %v1668_v39  ;;  %v1682_v25 = vpack.c.bf16 %v894_v24, %v893_v23  ;;  %v911_v28 = vld [vmem:[%s2778_s3 + $0x1c0] sm:$0xff]  ;;  %v1652_v29 = vpack.c.bf16 %v880_v27, %v879_v26  ;;  %v912_v30 = vld [vmem:[%s2778_s3 + $0x1c8] sm:$0xff]  ;;  %v881_v38 = vld [vmem:[%s2778_s3 + $0xd0] sm:$0xff]  ;;  %s1328_s30 = sshll.u32 %s2695_s22, 4  ;;  %s2724_s30 = int_to_ptr.vmem [resolvable:$true] %s1328_s30 }
  0x32   : > { %526 = vmatmul.mubr.f32.vlgmr.msra.gmra.mrb[0].mxu0 %v2258_v46  ;;  %v863_v31 = vld [vmem:[%s2778_s3 + $0x40] sm:$0xff]  ;;  %v864_v32 = vld [vmem:[%s2778_s3 + $0x48] sm:$0xff]  ;;  %v1684_v33 = vpack.c.bf16 %v912_v30, %v911_v28  ;;  %v882_v39 = vld [vmem:[%s2778_s3 + $0xd8] sm:$0xff]  ;;  %s1838_s27 = scalar_lea.vmem %s2724_s30, 1024  ;;  %p1845_p1 = scmp.lt.s32.totalorder %s2724_s30, %s1843_s16 }
  0x33   : > { %639 = vmatmul.mubr.f32.vlgmr.msra.gmra.mrb[0].mxu1 %v2258_v46  ;;  %531 = vmatprep.mubr.f32.mxu0 %v1918_v7  ;;  %v1654_v34 = vpack.c.bf16 %v864_v32, %v863_v31  ;;  %v895_v35 = vld [vmem:[%s2778_s3 + $0x140] sm:$0xff]  ;;  %v896_v36 = vld [vmem:[%s2778_s3 + $0x148] sm:$0xff]  ;;  %v913_v40 = vld [vmem:[%s2778_s3 + $0x1d0] sm:$0xff]  ;;  %v1656_v41 = vpack.c.bf16 %v882_v39, %v881_v38  ;;  %p1839_p12 = scmp.ne.s32.totalorder %s2724_s30, %s1838_s27  ;;  %p1846_p2 = scmp.lt.s32.totalorder %s1844_s18, %s1838_s27 }
  0x34   : > { %644 = vmatprep.mubr.f32.mxu1 %v1918_v7  ;;  %1639 = vmatpush3.bf16.msra.mxu0 %v1638_v49  ;;  %v1686_v37 = vpack.c.bf16 %v896_v36, %v895_v35  ;;  %v914_v42 = vld [vmem:[%s2778_s3 + $0x1d8] sm:$0xff]  ;;  %v865_v43 = vld [vmem:[%s2778_s3 + $0x50] sm:$0xff]  ;;  %v884_v52 = vld [vmem:[%s2778_s3 + $0xe8] sm:$0xff] }
  0x35   : > { %1671 = vmatpush3.bf16.msra.mxu1 %v1670_v50  ;;  %1641 = vmatprep.subr.bf16.mxu0 %v1640_v51  ;;  %v866_v44 = vld [vmem:[%s2778_s3 + $0x58] sm:$0xff]  ;;  %v1688_v45 = vpack.c.bf16 %v914_v42, %v913_v40  ;;  %v897_v48 = vld [vmem:[%s2778_s3 + $0x150] sm:$0xff]  ;;  %v883_v51 = vld [vmem:[%s2778_s3 + $0xe0] sm:$0xff]  ;;  %p1840_p13 = pnand %p1839_p12, %p2002_p4  ;;  %p1847_p3 = por %p1846_p2, %p1845_p1 }
  0x36   : > { %532 = vmatmul.mubr.f32.gmra.mrb[2].mxu0 %v2288_v59  ;;  %1673 = vmatprep.subr.bf16.mxu1 %v1672_v55  ;;  %v1658_v47 = vpack.c.bf16 %v866_v44, %v865_v43  ;;  %v898_v49 = vld [vmem:[%s2778_s3 + $0x158] sm:$0xff]  ;;  %v915_v53 = vld [vmem:[%s2778_s3 + $0x1e0] sm:$0xff]  ;;  %v1660_v54 = vpack.c.bf16 %v884_v52, %v883_v51  ;;  %v916_v55 = vld [vmem:[%s2778_s3 + $0x1e8] sm:$0xff] }
  0x37   : > { %645 = vmatmul.mubr.f32.gmra.mrb[2].mxu1 %v2288_v59  ;;  %537 = vmatprep.mubr.f32.mxu0 %v1918_v7  ;;  %v1690_v50 = vpack.c.bf16 %v898_v49, %v897_v48  ;;  %v867_v56 = vld [vmem:[%s2778_s3 + $0x60] sm:$0xff]  ;;  %v868_v57 = vld [vmem:[%s2778_s3 + $0x68] sm:$0xff]  ;;  %v1692_v58 = vpack.c.bf16 %v916_v55, %v915_v53  ;;  %v886_v1 = vld [vmem:[%s2778_s3 + $0xf8] sm:$0xff]  ;;  %p1841_p0 = pneg %p1840_p13 }
  0x38   : > { %650 = vmatprep.mubr.f32.mxu1 %v1918_v7  ;;  %1643 = vmatpush3.bf16.msra.mxu0 %v1642_v62  ;;  %v1662_v60 = vpack.c.bf16 %v868_v57, %v867_v56  ;;  %v899_v61 = vld [vmem:[%s2778_s3 + $0x160] sm:$0xff]  ;;  %v900_v62 = vld [vmem:[%s2778_s3 + $0x168] sm:$0xff]  ;;  %v917_v2 = vld [vmem:[%s2778_s3 + $0x1f0] sm:$0xff] }
  0x39   : > { %1675 = vmatpush3.bf16.msra.mxu1 %v1674_v63  ;;  %1645 = vmatprep.subr.bf16.mxu0 %v1644_v0  ;;  %v1694_v63 = vpack.c.bf16 %v900_v62, %v899_v61  ;;  %v885_v0 = vld [vmem:[%s2778_s3 + $0xf0] sm:$0xff]  ;;  %v918_v4 = vld [vmem:[%s2778_s3 + $0x1f8] sm:$0xff]  ;;  %p1848_p5 = pnand %p1847_p3, %p1841_p0 }
  0x3a   : > { %538 = vmatmul.mubr.f32.gmra.mrb[4].mxu0 %v2313_v6  ;;  %1677 = vmatprep.subr.bf16.mxu1 %v1676_v3  ;;  %v1664_v3 = vpack.c.bf16 %v886_v1, %v885_v0  ;;  %v869_v5 = vld [vmem:[%s2778_s3 + $0x70] sm:$0xff] }
  0x3b   : > { %651 = vmatmul.mubr.f32.gmra.mrb[4].mxu1 %v2313_v6  ;;  %543 = vmatprep.mubr.f32.mxu0 %v1918_v7  ;;  %v901_v16 = vld [vmem:[%s2778_s3 + $0x170] sm:$0xff] }
  0x3c   : > { %656 = vmatprep.mubr.f32.mxu1 %v1918_v7  ;;  %1647 = vmatpush3.bf16.msra.mxu0 %v1646_v8  ;;  %v870_v8 = vld [vmem:[%s2778_s3 + $0x78] sm:$0xff] }
  0x3d   : > { %1679 = vmatpush3.bf16.msra.mxu1 %v1678_v9  ;;  %1649 = vmatprep.subr.bf16.mxu0 %v1648_v18  ;;  %v1696_v9 = vpack.c.bf16 %v918_v4, %v917_v2  ;;  %v1666_v15 = vpack.c.bf16 %v870_v8, %v869_v5 }
  0x3e   : > { %544 = vmatmul.mubr.f32.gmra.mrb[6].mxu0 %v2320_v10 }
  0x3f   : > { %657 = vmatmul.mubr.f32.gmra.mrb[6].mxu1 %v2320_v10  ;;  %549 = vmatprep.mubr.f32.mxu0 %v1918_v7 }
  0x40   : > { %662 = vmatprep.mubr.f32.mxu1 %v1918_v7  ;;  %1651 = vmatpush3.bf16.msra.mxu0 %v1650_v22 }
  0x41   : > { %1653 = vmatprep.subr.bf16.mxu0 %v1652_v29 }
  0x42   : > { %550 = vmatmul.mubr.f32.gmra.mrb[8].mxu0 %v2327_v11 }
  0x43   : > { %663 = vmatmul.mubr.f32.gmra.mrb[8].mxu1 %v2327_v11  ;;  %555 = vmatprep.mubr.f32.mxu0 %v1918_v7 }
  0x44   : > { %668 = vmatprep.mubr.f32.mxu1 %v1918_v7  ;;  %1655 = vmatpush3.bf16.msra.mxu0 %v1654_v34 }
  0x45   : > { %1657 = vmatprep.subr.bf16.mxu0 %v1656_v41 }
  0x46   : > { %556 = vmatmul.mubr.f32.gmra.mrb[10].mxu0 %v2334_v12 }
  0x47   : > { %669 = vmatmul.mubr.f32.gmra.mrb[10].mxu1 %v2334_v12  ;;  %561 = vmatprep.mubr.f32.mxu0 %v1918_v7 }
  0x48   : > { %674 = vmatprep.mubr.f32.mxu1 %v1918_v7  ;;  %1659 = vmatpush3.bf16.msra.mxu0 %v1658_v47 }
  0x49   : > { %1661 = vmatprep.subr.bf16.mxu0 %v1660_v54 }
  0x4a   : > { %562 = vmatmul.mubr.f32.gmra.mrb[12].mxu0 %v2341_v13 }
  0x4b   : > { %675 = vmatmul.mubr.f32.gmra.mrb[12].mxu1 %v2341_v13  ;;  %567 = vmatprep.mubr.f32.mxu0 %v1918_v7 }
  0x4c   : > { %680 = vmatprep.mubr.f32.mxu1 %v1918_v7  ;;  %v910_v7 = vld [vmem:[%s2778_s3 + $0x1b8] sm:$0xff]  ;;  %1663 = vmatpush3.bf16.msra.mxu0 %v1662_v60 }
  0x4d   : > { %v1680_v21 = vpack.c.bf16 %v910_v7, %v909_v17  ;;  %v902_v17 = vld [vmem:[%s2778_s3 + $0x178] sm:$0xff]  ;;  %1665 = vmatprep.subr.bf16.mxu0 %v1664_v3  ;;  %v441_v7 = vlaneseq }
  0x4e   : > { %568 = vmatmul.mubr.f32.gmra.mrb[14].mxu0 %v2348_v14  ;;  %v1698_v18 = vpack.c.bf16 %v902_v17, %v901_v16 }
  0x4f   : > { %681 = vmatmul.mubr.f32.gmra.mrb[14].mxu1 %v2348_v14  ;;  %1681 = vmatprep.subr.bf16.mxu1 %v1680_v21  ;;  %v442_v19 = vshrl.u32 %v441_v7, 7  ;;  %v439_v21 = vld [vmem:[%s2777_s2] sm:$0xf] }
  0x50   : > { %1683 = vmatpush3.bf16.msra.mxu1 %v1682_v25  ;;  %1667 = vmatpush3.bf16.msra.mxu0 %v1666_v15 }
  0x51   : > { %1685 = vmatprep.subr.bf16.mxu1 %v1684_v33  ;;  %v443_v20 = vsub.s32 0, %v442_v19  ;;  %v451_v22 = vsub.s32 2, %v442_v19  ;;  %v447_v23 = vsub.s32 1, %v442_v19  ;;  %v455_v25 = vsub.s32 3, %v442_v19 }
  0x53   : > { %v2476_v24 = vrot.slane %v439_v21, %v443_v20  ;;  %v2478_v26 = vrot.slane %v439_v21, %v451_v22  ;;  %v2480_v28 = vrot.slane %v439_v21, %v447_v23  ;;  %v2483_v32 = vrot.slane %v439_v21, %v455_v25 }
  0x54   : > { %1687 = vmatpush3.bf16.msra.mxu1 %v1686_v37 }
  0x55   : > { %1689 = vmatprep.subr.bf16.mxu1 %v1688_v45 }
  0x58   : > { %1691 = vmatpush3.bf16.msra.mxu1 %v1690_v50 }
  0x59   : > { %1693 = vmatprep.subr.bf16.mxu1 %v1692_v58 }
  0x5c   : > { %1695 = vmatpush3.bf16.msra.mxu1 %v1694_v63 }
  0x5d   : > { %1697 = vmatprep.subr.bf16.mxu1 %v1696_v9 }
  0x60   : > { %1699 = vmatpush3.bf16.msra.mxu1 %v1698_v18 }
 0x105   : > { %v527_v27 = vpop.f32.mrb[0].mxu0 }
 0x106   : > { %v528_v29 = vadd.f32 %v527_v27, %v2476_v24  ;;  %v640_v30 = vpop.f32.mrb[0].mxu1  ;;  %v529_v31 = vpop.f32.mrb[1].mxu0 }
 0x107   : > { %v641_v33 = vadd.f32 %v640_v30, %v2478_v26  ;;  %v642_v34 = vpop.f32.mrb[1].mxu1  ;;  %v530_v36 = vadd.f32 %v529_v31, %v2480_v28 }
 0x108   : > { %v719_v35 = vmul.f32 0.70710677, %v528_v29  ;;  %v643_v38 = vadd.f32 %v642_v34, %v2483_v32  ;;  %v687_v2 = vmul.f32 0.5, %v528_v29 }
 0x109   : > { %v721_v37 = vmul.f32 0.70710677, %v641_v33  ;;  %v533_v39 = vpop.f32.mrb[2].mxu0  ;;  %v720_v45 = vmul.f32 0.70710677, %v530_v36  ;;  %v689_v5 = vmul.f32 0.5, %v641_v33 }
 0x10a   : > { %v646_v40 = vpop.f32.mrb[2].mxu1  ;;  %v534_v41 = vadd.f32 %v533_v39, %v2476_v24  ;;  %v535_v42 = vpop.f32.mrb[3].mxu0  ;;  %1758 = verf.f32 %v719_v35  ;;  %v722_v49 = vmul.f32 0.70710677, %v643_v38  ;;  %v2501_v18 = vmul.f32 0.5, %v530_v36 }
 0x10b   : > { %v648_v43 = vpop.f32.mrb[3].mxu1  ;;  %v647_v44 = vadd.f32 %v646_v40, %v2478_v26  ;;  %v536_v47 = vadd.f32 %v535_v42, %v2480_v28  ;;  %1760 = verf.f32 %v721_v37  ;;  %v2503_v7 = vmul.f32 0.5, %v643_v38 }
 0x10c   : > { %v649_v50 = vadd.f32 %v648_v43, %v2483_v32  ;;  %v723_v51 = vmul.f32 0.70710677, %v534_v41  ;;  %1762 = verf.f32 %v720_v45  ;;  %v2508_v23 = vmul.f32 0.5, %v534_v41 }
 0x10d   : > { %v539_v48 = vpop.f32.mrb[4].mxu0  ;;  %v725_v54 = vmul.f32 0.70710677, %v647_v44  ;;  %v724_v56 = vmul.f32 0.70710677, %v536_v47  ;;  %1764 = verf.f32 %v722_v49  ;;  %v2510_v25 = vmul.f32 0.5, %v647_v44 }
 0x10e   : > { %v652_v52 = vpop.f32.mrb[4].mxu1  ;;  %v541_v53 = vpop.f32.mrb[5].mxu0  ;;  %v726_v58 = vmul.f32 0.70710677, %v649_v50  ;;  %v540_v60 = vadd.f32 %v539_v48, %v2476_v24  ;;  %1766 = verf.f32 %v723_v51  ;;  %v2515_v30 = vmul.f32 0.5, %v536_v47 }
 0x10f   : > { %v654_v55 = vpop.f32.mrb[5].mxu1  ;;  %v653_v63 = vadd.f32 %v652_v52, %v2478_v26  ;;  %1768 = verf.f32 %v725_v54  ;;  %v542_v1 = vadd.f32 %v541_v53, %v2480_v28  ;;  %v2517_v31 = vmul.f32 0.5, %v649_v50 }
 0x110   : > { %1770 = verf.f32 %v724_v56  ;;  %v2496_v3 = vadd.f32 %v654_v55, %v2483_v32  ;;  %v727_v8 = vmul.f32 0.70710677, %v540_v60  ;;  %v2531_v48 = vmul.f32 0.5, %v540_v60 }
 0x111   : > { %v545_v57 = vpop.f32.mrb[6].mxu0  ;;  %1772 = verf.f32 %v726_v58  ;;  %v729_v19 = vmul.f32 0.70710677, %v653_v63  ;;  %v728_v27 = vmul.f32 0.70710677, %v542_v1  ;;  %v2537_v52 = vmul.f32 0.5, %v653_v63 }
 0x112   : > { %v658_v61 = vpop.f32.mrb[6].mxu1  ;;  %v547_v62 = vpop.f32.mrb[7].mxu0  ;;  %v2499_v9 = vadd.f32 %v545_v57, %v2476_v24  ;;  %v730_v33 = vmul.f32 0.70710677, %v2496_v3  ;;  %1774 = verf.f32 %v727_v8  ;;  %v2539_v53 = vmul.f32 0.5, %v542_v1 }
 0x113   : > { %v660_v0 = vpop.f32.mrb[7].mxu1  ;;  %v2506_v20 = vadd.f32 %v658_v61, %v2478_v26  ;;  %v2513_v29 = vadd.f32 %v547_v62, %v2480_v28  ;;  %1776 = verf.f32 %v729_v19 }
 0x114   : > { %v1759_v17 = vpop.eup %1758  ;;  %v2521_v34 = vadd.f32 %v660_v0, %v2483_v32  ;;  %v731_v37 = vmul.f32 0.70710677, %v2499_v9  ;;  %1778 = verf.f32 %v728_v27 }
 0x115   : > { %v551_v4 = vpop.f32.mrb[8].mxu0  ;;  %v1761_v22 = vpop.eup %1760  ;;  %v783_v36 = vadd.f32 1.0, %v1759_v17  ;;  %v733_v43 = vmul.f32 0.70710677, %v2506_v20  ;;  %v732_v49 = vmul.f32 0.70710677, %v2513_v29  ;;  %1780 = verf.f32 %v730_v33 }
 0x116   : > { %v664_v15 = vpop.f32.mrb[8].mxu1  ;;  %v553_v16 = vpop.f32.mrb[9].mxu0  ;;  %v785_v42 = vadd.f32 1.0, %v1761_v22  ;;  %v2535_v50 = vadd.f32 %v551_v4, %v2476_v24  ;;  %v734_v54 = vmul.f32 0.70710677, %v2521_v34  ;;  %1782 = verf.f32 %v731_v37 }
 0x117   : > { %v666_v21 = vpop.f32.mrb[9].mxu1  ;;  %v2525_v38 = vadd.f32 %v553_v16, %v2480_v28  ;;  %v1763_v41 = vpop.eup %1762  ;;  %v815_v57 = vmul.f32 %v783_v36, %v687_v2  ;;  %1784 = verf.f32 %v733_v43  ;;  %v2546_v19 = vadd.f32 %v664_v15, %v2478_v26 }
 0x118   : > { %v2529_v44 = vadd.f32 %v666_v21, %v2483_v32  ;;  %v1765_v47 = vpop.eup %1764  ;;  %v784_v58 = vadd.f32 1.0, %v1763_v41  ;;  %v817_v4 = vmul.f32 %v785_v42, %v689_v5  ;;  %1786 = verf.f32 %v732_v49 }
 0x119   : > { %v557_v35 = vpop.f32.mrb[10].mxu0  ;;  %v1767_v51 = vpop.eup %1766  ;;  %v736_v60 = vmul.f32 0.70710677, %v2525_v38  ;;  %v786_v8 = vadd.f32 1.0, %v1765_v47  ;;  %v735_v17 = vmul.f32 0.70710677, %v2535_v50  ;;  %1788 = verf.f32 %v734_v54 }
 0x11a   : > { %v670_v39 = vpop.f32.mrb[10].mxu1  ;;  %v559_v40 = vpop.f32.mrb[11].mxu0  ;;  %v738_v63 = vmul.f32 0.70710677, %v2529_v44  ;;  %v2549_v2 = vadd.f32 %v557_v35, %v2476_v24  ;;  %v787_v33 = vadd.f32 1.0, %v1767_v51  ;;  %v816_v15 = vmul.f32 %v784_v58, %v2501_v18 }
 0x11b   : > { %v672_v45 = vpop.f32.mrb[11].mxu1  ;;  %v1769_v56 = vpop.eup %1768  ;;  %v2552_v21 = vadd.f32 %v670_v39, %v2478_v26  ;;  %v2555_v5 = vadd.f32 %v559_v40, %v2480_v28  ;;  %1790 = verf.f32 %v736_v60  ;;  %v737_v40 = vmul.f32 0.70710677, %v2546_v19 }
 0x11c   : > { %v1771_v0 = vpop.eup %1770  ;;  %v2558_v22 = vadd.f32 %v672_v45, %v2483_v32  ;;  %v789_v35 = vadd.f32 1.0, %v1769_v56  ;;  %1792 = verf.f32 %v738_v63  ;;  %983 = vmatprep.mubr.f32.mxu0 %v816_v15  ;;  %v818_v49 = vmul.f32 %v786_v8, %v2503_v7 }
 0x11d   : > { %v563_v55 = vpop.f32.mrb[12].mxu0  ;;  %v1773_v16 = vpop.eup %1772  ;;  %v788_v36 = vadd.f32 1.0, %v1771_v0  ;;  %v740_v39 = vmul.f32 0.70710677, %v2555_v5  ;;  %1794 = verf.f32 %v735_v17  ;;  %v739_v18 = vmul.f32 0.70710677, %v2549_v2  ;;  %984 = vmatmul.mubr.f32.vlgmr.msra.gmra.mrb[16].mxu0 %v815_v57 }
 0x11e   : > { %v676_v61 = vpop.f32.mrb[12].mxu1  ;;  %v565_v62 = vpop.f32.mrb[13].mxu0  ;;  %v790_v42 = vadd.f32 1.0, %v1773_v16  ;;  %v742_v45 = vmul.f32 0.70710677, %v2558_v22  ;;  %v2568_v56 = vadd.f32 %v563_v55, %v2476_v24  ;;  %1088 = vmatprep.mubr.f32.mxu1 %v818_v49  ;;  %v698_v57 = vmul.f32 0.5, %v2496_v3 }
 0x11f   : > { %v678_v1 = vpop.f32.mrb[13].mxu1  ;;  %v1775_v47 = vpop.eup %1774  ;;  %v741_v54 = vmul.f32 0.70710677, %v2552_v21  ;;  %v2571_v58 = vadd.f32 %v565_v62, %v2480_v28  ;;  %1796 = verf.f32 %v740_v39  ;;  %v2574_v0 = vadd.f32 %v676_v61, %v2478_v26  ;;  %1089 = vmatmul.mubr.f32.vlgmr.msra.gmra.mrb[16].mxu1 %v817_v4 }
 0x120   : > { %v1777_v51 = vpop.eup %1776  ;;  %v2577_v7 = vadd.f32 %v678_v1, %v2483_v32  ;;  %v820_v8 = vmul.f32 %v788_v36, %v2515_v30  ;;  %v2582_v55 = vmul.f32 0.5, %v2499_v9  ;;  %v700_v62 = vmul.f32 0.5, %v2513_v29 }
 0x121   : > { %v569_v27 = vpop.f32.mrb[14].mxu0  ;;  %v1779_v60 = vpop.eup %1778  ;;  %1798 = verf.f32 %v742_v45  ;;  %v791_v17 = vadd.f32 1.0, %v1775_v47  ;;  %v702_v61 = vmul.f32 0.5, %v2521_v34  ;;  %v744_v1 = vmul.f32 0.70710677, %v2571_v58 }
 0x122   : > { %v682_v37 = vpop.f32.mrb[14].mxu1  ;;  %v571_v41 = vpop.f32.mrb[15].mxu0  ;;  %1800 = verf.f32 %v737_v40  ;;  %988 = vmatprep.mubr.f32.mxu0 %v820_v8  ;;  %v743_v30 = vmul.f32 0.70710677, %v2568_v56  ;;  %v746_v3 = vmul.f32 0.70710677, %v2577_v7  ;;  %v822_v9 = vmul.f32 %v790_v42, %v2517_v31 }
 0x123   : > { %v684_v43 = vpop.f32.mrb[15].mxu1  ;;  %v1781_v63 = vpop.eup %1780  ;;  %1802 = verf.f32 %v739_v18  ;;  %v745_v29 = vmul.f32 0.70710677, %v2574_v0  ;;  %v819_v4 = vmul.f32 %v787_v33, %v2508_v23  ;;  %v821_v34 = vmul.f32 %v789_v35, %v2510_v25 }
 0x124   : > { %v1783_v16 = vpop.eup %1782  ;;  %1804 = verf.f32 %v741_v54  ;;  %v792_v47 = vadd.f32 1.0, %v1779_v60  ;;  %v794_v40 = vadd.f32 1.0, %v1781_v63  ;;  %1093 = vmatprep.mubr.f32.mxu1 %v822_v9  ;;  %v2594_v45 = vadd.f32 %v569_v27, %v2476_v24 }
 0x125   : > { %v1785_v15 = vpop.eup %1784  ;;  %1806 = verf.f32 %v744_v1  ;;  %989 = vmatmul.mubr.f32.gmra.mrb[18].mxu0 %v819_v4  ;;  %1094 = vmatmul.mubr.f32.gmra.mrb[18].mxu1 %v821_v34  ;;  %v2597_v31 = vadd.f32 %v682_v37, %v2478_v26  ;;  %v2600_v42 = vadd.f32 %v571_v41, %v2480_v28  ;;  %v2603_v23 = vadd.f32 %v684_v43, %v2483_v32 }
 0x126   : > { %v1787_v36 = vpop.eup %1786  ;;  %1808 = verf.f32 %v746_v3  ;;  %v793_v33 = vadd.f32 1.0, %v1777_v51  ;;  %v704_v18 = vmul.f32 0.5, %v2525_v38  ;;  %v795_v27 = vadd.f32 1.0, %v1783_v16 }
 0x127   : > { %v1789_v39 = vpop.eup %1788  ;;  %v796_v35 = vadd.f32 1.0, %v1787_v36  ;;  %1810 = verf.f32 %v743_v30  ;;  %v748_v60 = vmul.f32 0.70710677, %v2600_v42  ;;  %v747_v37 = vmul.f32 0.70710677, %v2594_v45 }
 0x128   : > { %v1791_v49 = vpop.eup %1790  ;;  %v798_v54 = vadd.f32 1.0, %v1789_v39  ;;  %1812 = verf.f32 %v745_v29  ;;  %v750_v28 = vmul.f32 0.70710677, %v2603_v23  ;;  %v824_v32 = vmul.f32 %v792_v47, %v2539_v53 }
 0x129   : > { %v1793_v25 = vpop.eup %1792  ;;  %v800_v26 = vadd.f32 1.0, %v1791_v49  ;;  %v749_v51 = vmul.f32 0.70710677, %v2597_v31  ;;  %v826_v8 = vmul.f32 %v794_v40, %v698_v57  ;;  %v823_v38 = vmul.f32 %v791_v17, %v2531_v48 }
 0x12a   : > { %v1795_v24 = vpop.eup %1794  ;;  %v802_v43 = vadd.f32 1.0, %v1793_v25  ;;  %v797_v16 = vadd.f32 1.0, %v1785_v15  ;;  %1814 = verf.f32 %v748_v60  ;;  %993 = vmatprep.mubr.f32.mxu0 %v824_v32  ;;  %v825_v1 = vmul.f32 %v793_v33, %v2537_v52 }
 0x12b   : > { %v1797_v41 = vpop.eup %1796  ;;  %v828_v30 = vmul.f32 %v796_v35, %v700_v62  ;;  %v701_v9 = vmul.f32 0.5, %v2506_v20  ;;  %v706_v36 = vmul.f32 0.5, %v2529_v44  ;;  %1816 = verf.f32 %v750_v28  ;;  %1098 = vmatprep.mubr.f32.mxu1 %v826_v8  ;;  %994 = vmatmul.mubr.f32.gmra.mrb[20].mxu0 %v823_v38 }
 0x12c   : > { %v1799_v63 = vpop.eup %1798  ;;  %v830_v53 = vmul.f32 %v798_v54, %v702_v61  ;;  %v799_v57 = vadd.f32 1.0, %v1795_v24  ;;  %v804_v4 = vadd.f32 1.0, %v1797_v41  ;;  %1818 = verf.f32 %v747_v37  ;;  %1099 = vmatmul.mubr.f32.gmra.mrb[20].mxu1 %v825_v1 }
 0x12d   : > { %v1801_v3 = vpop.eup %1800  ;;  %998 = vmatprep.mubr.f32.mxu0 %v828_v30  ;;  %v832_v48 = vmul.f32 %v800_v26, %v704_v18  ;;  %v806_v15 = vadd.f32 1.0, %v1799_v63  ;;  %1820 = verf.f32 %v749_v51  ;;  %v827_v52 = vmul.f32 %v795_v27, %v2582_v55 }
 0x12e   : > { %v1803_v29 = vpop.eup %1802  ;;  %1103 = vmatprep.mubr.f32.mxu1 %v830_v53  ;;  %v834_v20 = vmul.f32 %v802_v43, %v706_v36  ;;  %v801_v44 = vadd.f32 1.0, %v1801_v3  ;;  %v708_v34 = vmul.f32 0.5, %v2555_v5  ;;  %v829_v39 = vmul.f32 %v797_v16, %v701_v9 }
 0x12f   : > { %v1805_v17 = vpop.eup %1804  ;;  %v703_v47 = vmul.f32 0.5, %v2535_v50  ;;  %v710_v40 = vmul.f32 0.5, %v2558_v22  ;;  %999 = vmatmul.mubr.f32.gmra.mrb[22].mxu0 %v827_v52  ;;  %v705_v25 = vmul.f32 0.5, %v2546_v19  ;;  %v803_v18 = vadd.f32 1.0, %v1803_v29 }
 0x130   : > { %v1807_v62 = vpop.eup %1806  ;;  %1104 = vmatmul.mubr.f32.gmra.mrb[22].mxu1 %v829_v39  ;;  %1003 = vmatprep.mubr.f32.mxu0 %v832_v48  ;;  %v836_v35 = vmul.f32 %v804_v4, %v708_v34  ;;  %v805_v54 = vadd.f32 1.0, %v1805_v17  ;;  %v712_v60 = vmul.f32 0.5, %v2571_v58  ;;  %v707_v22 = vmul.f32 0.5, %v2549_v2 }
 0x131   : > { %v1809_v61 = vpop.eup %1808  ;;  %v808_v33 = vadd.f32 1.0, %v1807_v62  ;;  %1108 = vmatprep.mubr.f32.mxu1 %v834_v20  ;;  %v831_v27 = vmul.f32 %v799_v57, %v703_v47  ;;  %v838_v5 = vmul.f32 %v806_v15, %v710_v40  ;;  %v833_v50 = vmul.f32 %v801_v44, %v705_v25 }
 0x132   : > { %v1811_v49 = vpop.eup %1810  ;;  %v810_v24 = vadd.f32 1.0, %v1809_v61  ;;  %v714_v26 = vmul.f32 0.5, %v2577_v7  ;;  %v709_v37 = vmul.f32 0.5, %v2552_v21  ;;  %v835_v51 = vmul.f32 %v803_v18, %v707_v22 }
 0x133   : > { %v1813_v55 = vpop.eup %1812  ;;  %1004 = vmatmul.mubr.f32.gmra.mrb[24].mxu0 %v831_v27  ;;  %v840_v28 = vmul.f32 %v808_v33, %v712_v60  ;;  %v807_v41 = vadd.f32 1.0, %v1811_v49  ;;  %v716_v63 = vmul.f32 0.5, %v2600_v42  ;;  %v711_v1 = vmul.f32 0.5, %v2568_v56 }
 0x134   : > { %v1815_v19 = vpop.eup %1814  ;;  %1109 = vmatmul.mubr.f32.gmra.mrb[24].mxu1 %v833_v50  ;;  %1008 = vmatprep.mubr.f32.mxu0 %v836_v35  ;;  %v842_v8 = vmul.f32 %v810_v24, %v714_v26  ;;  %v809_v58 = vadd.f32 1.0, %v1813_v55  ;;  %v837_v16 = vmul.f32 %v805_v54, %v709_v37  ;;  %v718_v21 = vmul.f32 0.5, %v2603_v23 }
 0x135   : > { %v1817_v32 = vpop.eup %1816  ;;  %v812_v43 = vadd.f32 1.0, %v1815_v19  ;;  %1113 = vmatprep.mubr.f32.mxu1 %v838_v5  ;;  %v713_v30 = vmul.f32 0.5, %v2574_v0  ;;  %v839_v36 = vmul.f32 %v807_v41, %v711_v1  ;;  %v715_v42 = vmul.f32 0.5, %v2594_v45  ;;  %v2633_v45 = vld [vmem:[%s2779_s4] ss:$0 sm:$0xff] }
 0x136   : > { %v1819_v38 = vpop.eup %1818  ;;  %v814_v2 = vadd.f32 1.0, %v1817_v32  ;;  %v717_v4 = vmul.f32 0.5, %v2597_v31 }
 0x137   : > { %v1821_v7 = vpop.eup %1820  ;;  %1009 = vmatmul.mubr.f32.gmra.mrb[26].mxu0 %v835_v51  ;;  %v844_v3 = vmul.f32 %v812_v43, %v716_v63  ;;  %v811_v9 = vadd.f32 1.0, %v1819_v38  ;;  %v841_v57 = vmul.f32 %v809_v58, %v713_v30 }
 0x138   : > { %1114 = vmatmul.mubr.f32.gmra.mrb[26].mxu1 %v837_v16  ;;  %1013 = vmatprep.mubr.f32.mxu0 %v840_v28  ;;  %v846_v53 = vmul.f32 %v814_v2, %v718_v21  ;;  %v813_v29 = vadd.f32 1.0, %v1821_v7 }
 0x139   : > { %1118 = vmatprep.mubr.f32.mxu1 %v842_v8  ;;  %v843_v56 = vmul.f32 %v811_v9, %v715_v42 }
 0x13a   : > { %v845_v23 = vmul.f32 %v813_v29, %v717_v4 }
 0x13b   : > { %1014 = vmatmul.mubr.f32.gmra.mrb[28].mxu0 %v839_v36 }
 0x13c   : > { %1119 = vmatmul.mubr.f32.gmra.mrb[28].mxu1 %v841_v57  ;;  %1018 = vmatprep.mubr.f32.mxu0 %v844_v3 }
 0x13d   : > { %1123 = vmatprep.mubr.f32.mxu1 %v846_v53 }
 0x13f   : > { %1019 = vmatmul.mubr.f32.gmra.mrb[30].mxu0 %v843_v56 }
 0x140   : > { %1124 = vmatmul.mubr.f32.gmra.mrb[30].mxu1 %v845_v23 }
 0x1f0   : > { %v1492_v0 = vpop.f32.mrb[16].mxu0 }
 0x1f1   : > { %v1493_v48 = vpop.f32.mrb[17].mxu0 }
 0x1f2   : > { %v1548_v17 = vpop.f32.mrb[16].mxu1  ;;  %v1494_v15 = vadd.f32 %v1493_v48, %v1492_v0 }
 0x1f3   : > { %v1549_v52 = vpop.f32.mrb[17].mxu1 }
 0x1f4   : > { %v1550_v20 = vadd.f32 %v1549_v52, %v1548_v17 }
 0x1f6   : > { %v1091_v62 = vadd.f32 %v1550_v20, %v1494_v15 }
 0x1f8   : > { %v1495_v31 = vpop.f32.mrb[18].mxu0  ;;  %v1551_v44 = vpop.f32.mrb[18].mxu1  ;;  %v1163_v61 = vadd.f32 %v2633_v45, %v1091_v62 }
 0x1f9   : > { %v1496_v34 = vpop.f32.mrb[19].mxu0  ;;  %v1552_v39 = vpop.f32.mrb[19].mxu1 }
 0x1fa   : > { %v1497_v47 = vadd.f32 %v1496_v34, %v1495_v31  ;;  %v1553_v40 = vadd.f32 %v1552_v39, %v1551_v44  ;;  %v2637_v49 = vadd.f32 %v1163_v61, %v2258_v46 }
 0x1fc   : > { %v1096_v25 = vadd.f32 %v1553_v40, %v1497_v47  ;;  %1187 = vadd.xlane.f32.xlu0 %v2637_v49 }
 0x1fe   : > { %v1498_v33 = vpop.f32.mrb[20].mxu0  ;;  %v1164_v35 = vadd.f32 %v2633_v45, %v1096_v25 }
 0x1ff   : > { %v1554_v55 = vpop.f32.mrb[20].mxu1  ;;  %v1499_v18 = vpop.f32.mrb[21].mxu0 }
 0x200   : > { %v1500_v24 = vadd.f32 %v1499_v18, %v1498_v33  ;;  %v1555_v27 = vpop.f32.mrb[21].mxu1  ;;  %v2642_v5 = vadd.f32 %v1164_v35, %v2288_v59 }
 0x201   : > { %v1556_v54 = vadd.f32 %v1555_v27, %v1554_v55 }
 0x202   : > { %v1501_v60 = vpop.f32.mrb[22].mxu0  ;;  %1189 = vadd.xlane.f32.xlu0 %v2642_v5 }
 0x203   : > { %v1101_v50 = vadd.f32 %v1556_v54, %v1500_v24  ;;  %v1557_v46 = vpop.f32.mrb[22].mxu1  ;;  %v1502_v22 = vpop.f32.mrb[23].mxu0 }
 0x204   : > { %v1503_v26 = vadd.f32 %v1502_v22, %v1501_v60  ;;  %v1558_v19 = vpop.f32.mrb[23].mxu1 }
 0x205   : > { %v1559_v37 = vadd.f32 %v1558_v19, %v1557_v46  ;;  %v1165_v28 = vadd.f32 %v2633_v45, %v1101_v50 }
 0x206   : > { %v1504_v32 = vpop.f32.mrb[24].mxu0 }
 0x207   : > { %v1106_v41 = vadd.f32 %v1559_v37, %v1503_v26  ;;  %v1560_v43 = vpop.f32.mrb[24].mxu1  ;;  %v1505_v51 = vpop.f32.mrb[25].mxu0  ;;  %v1181_v8 = vadd.f32 %v1165_v28, %v2313_v6 }
 0x208   : > { %v1506_v59 = vadd.f32 %v1505_v51, %v1504_v32  ;;  %v1561_v38 = vpop.f32.mrb[25].mxu1 }
 0x209   : > { %v1562_v58 = vadd.f32 %v1561_v38, %v1560_v43  ;;  %1191 = vadd.xlane.f32.xlu1 %v1181_v8  ;;  %v1166_v63 = vadd.f32 %v2633_v45, %v1106_v41 }
 0x20a   : > { %v1507_v2 = vpop.f32.mrb[26].mxu0 }
 0x20b   : > { %v1111_v16 = vadd.f32 %v1562_v58, %v1506_v59  ;;  %v1563_v7 = vpop.f32.mrb[26].mxu1  ;;  %v1508_v1 = vpop.f32.mrb[27].mxu0  ;;  %v1182_v21 = vadd.f32 %v1166_v63, %v2320_v10 }
 0x20c   : > { %v1509_v30 = vadd.f32 %v1508_v1, %v1507_v2  ;;  %v1564_v3 = vpop.f32.mrb[27].mxu1 }
 0x20d   : > { %v1565_v9 = vadd.f32 %v1564_v3, %v1563_v7  ;;  %1193 = vadd.xlane.f32.xlu1 %v1182_v21  ;;  %v1167_v36 = vadd.f32 %v2633_v45, %v1111_v16 }
 0x20e   : > { %v1510_v53 = vpop.f32.mrb[28].mxu0 }
 0x20f   : > { %v1116_v6 = vadd.f32 %v1565_v9, %v1509_v30  ;;  %v1566_v29 = vpop.f32.mrb[28].mxu1  ;;  %v1511_v57 = vpop.f32.mrb[29].mxu0  ;;  %v1183_v42 = vadd.f32 %v1167_v36, %v2327_v11  ;;  %v2687_v36 = vld [vmem:[%s2780_s5] ss:$0 sm:$0xff] }
 0x210   : > { %v1512_v4 = vadd.f32 %v1511_v57, %v1510_v53  ;;  %v1567_v56 = vpop.f32.mrb[29].mxu1  ;;  %v1453_v57 = vld [vmem:[%s2781_s6] ss:$0 sm:$0xff] }
 0x211   : > { %v1568_v23 = vadd.f32 %v1567_v56, %v1566_v29  ;;  %1195 = vadd.xlane.f32.xlu0 %v1183_v42  ;;  %v1168_v0 = vadd.f32 %v2633_v45, %v1116_v6 }
 0x212   : > { %v1513_v48 = vpop.f32.mrb[30].mxu0 }
 0x213   : > { %v1121_v10 = vadd.f32 %v1568_v23, %v1512_v4  ;;  %v1569_v17 = vpop.f32.mrb[30].mxu1  ;;  %v1514_v15 = vpop.f32.mrb[31].mxu0  ;;  %v1184_v52 = vadd.f32 %v1168_v0, %v2334_v12 }
 0x214   : > { %v1515_v20 = vadd.f32 %v1514_v15, %v1513_v48  ;;  %v1570_v62 = vpop.f32.mrb[31].mxu1 }
 0x215   : > { %v1571_v31 = vadd.f32 %v1570_v62, %v1569_v17  ;;  %1197 = vadd.xlane.f32.xlu1 %v1184_v52  ;;  %v1169_v44 = vadd.f32 %v2633_v45, %v1121_v10 }
 0x217   : > { %v1126_v34 = vadd.f32 %v1571_v31, %v1515_v20  ;;  %v1185_v11 = vadd.f32 %v1169_v44, %v2341_v13 }
 0x219   : > { %1199 = vadd.xlane.f32.xlu0 %v1185_v11  ;;  %v1170_v39 = vadd.f32 %v2633_v45, %v1126_v34 }
 0x21b   : > { %v1186_v61 = vadd.f32 %v1170_v39, %v2348_v14 }
 0x21d   : > { %1201 = vadd.xlane.f32.xlu1 %v1186_v61 }
 0x289   : > { %v1188_v47 = vpop.xlane.xlu0 %1187 }
 0x28a   : > { %v1204_v40 = vmul.f32 0.0078125, %v1188_v47 }
 0x28c   : > { %v1212_v25 = vsub.f32 %v2637_v49, %v1204_v40 }
 0x28e   : > { %v1220_v33 = vmul.f32 %v1212_v25, %v1212_v25 }
 0x28f   : > { %v1190_v12 = vpop.xlane.xlu0 %1189 }
 0x290   : > { %v1205_v35 = vmul.f32 0.0078125, %v1190_v12  ;;  %1228 = vadd.xlane.f32.xlu0 %v1220_v33 }
 0x292   : > { %v1213_v55 = vsub.f32 %v2642_v5, %v1205_v35 }
 0x294   : > { %v1221_v18 = vmul.f32 %v1213_v55, %v1213_v55 }
 0x296   : > { %v1192_v24 = vpop.xlane.xlu1 %1191  ;;  %1230 = vadd.xlane.f32.xlu1 %v1221_v18 }
 0x297   : > { %v1206_v13 = vmul.f32 0.0078125, %v1192_v24 }
 0x299   : > { %v2659_v27 = vsub.f32 %v1181_v8, %v1206_v13 }
 0x29a   : > { %v1194_v45 = vpop.xlane.xlu1 %1193 }
 0x29b   : > { %v1207_v54 = vmul.f32 0.0078125, %v1194_v45  ;;  %v1222_v14 = vmul.f32 %v2659_v27, %v2659_v27 }
 0x29d   : > { %v2663_v60 = vsub.f32 %v1182_v21, %v1207_v54  ;;  %1232 = vadd.xlane.f32.xlu0 %v1222_v14 }
 0x29e   : > { %v1196_v49 = vpop.xlane.xlu0 %1195 }
 0x29f   : > { %v1208_v50 = vmul.f32 0.0078125, %v1196_v49  ;;  %v1223_v46 = vmul.f32 %v2663_v60, %v2663_v60 }
 0x2a1   : > { %v2667_v5 = vsub.f32 %v1183_v42, %v1208_v50  ;;  %1234 = vadd.xlane.f32.xlu1 %v1223_v46 }
 0x2a2   : > { %v1198_v22 = vpop.xlane.xlu1 %1197 }
 0x2a3   : > { %v1209_v26 = vmul.f32 0.0078125, %v1198_v22  ;;  %v1224_v19 = vmul.f32 %v2667_v5, %v2667_v5 }
 0x2a5   : > { %v2671_v37 = vsub.f32 %v1184_v52, %v1209_v26  ;;  %1236 = vadd.xlane.f32.xlu0 %v1224_v19 }
 0x2a6   : > { %v1200_v28 = vpop.xlane.xlu0 %1199 }
 0x2a7   : > { %v1210_v32 = vmul.f32 0.0078125, %v1200_v28  ;;  %v1225_v41 = vmul.f32 %v2671_v37, %v2671_v37 }
 0x2a9   : > { %v2675_v43 = vsub.f32 %v1185_v11, %v1210_v32  ;;  %1238 = vadd.xlane.f32.xlu1 %v1225_v41 }
 0x2aa   : > { %v1202_v51 = vpop.xlane.xlu1 %1201 }
 0x2ab   : > { %v1211_v8 = vmul.f32 0.0078125, %v1202_v51  ;;  %v1226_v59 = vmul.f32 %v2675_v43, %v2675_v43 }
 0x2ad   : > { %v2679_v38 = vsub.f32 %v1186_v61, %v1211_v8  ;;  %1240 = vadd.xlane.f32.xlu0 %v1226_v59 }
 0x2af   : > { %v1227_v58 = vmul.f32 %v2679_v38, %v2679_v38 }
 0x2b1   : > { %1242 = vadd.xlane.f32.xlu1 %v1227_v58 }
 0x31d   : > { %v1229_v63 = vpop.xlane.xlu0 %1228 }
 0x31e   : > { %v1244_v2 = vmul.f32 0.0078125, %v1229_v63 }
 0x320   : > { %v1252_v16 = vadd.f32 1e-05, %v1244_v2 }
 0x322   : > { %1822 = vrsqrt.f32 %v1252_v16 }
 0x323   : > { %v1231_v7 = vpop.xlane.xlu1 %1230 }
 0x324   : > { %v1245_v1 = vmul.f32 0.0078125, %v1231_v7 }
 0x326   : > { %v1253_v21 = vadd.f32 1e-05, %v1245_v1 }
 0x328   : > { %1824 = vrsqrt.f32 %v1253_v21 }
 0x32a   : > { %v1233_v30 = vpop.xlane.xlu0 %1232 }
 0x32b   : > { %v1246_v3 = vmul.f32 0.0078125, %v1233_v30 }
 0x32c   : > { %v1823_v9 = vpop.eup %1822 }
 0x32d   : > { %v1254_v53 = vadd.f32 1e-05, %v1246_v3  ;;  %v1268_v6 = vmul.f32 %v1823_v9, %v1212_v25 }
 0x32e   : > { %v1235_v29 = vpop.xlane.xlu1 %1234 }
 0x32f   : > { %1826 = vrsqrt.f32 %v1254_v53  ;;  %v1247_v42 = vmul.f32 0.0078125, %v1235_v29  ;;  %v1283_v4 = vmul.f32 %v2687_v36, %v1268_v6 }
 0x331   : > { %v1255_v56 = vadd.f32 1e-05, %v1247_v42  ;;  %v1298_v0 = vadd.f32 %v1453_v57, %v1283_v4 }
 0x332   : > { %v1825_v23 = vpop.eup %1824  ;;  %v1237_v48 = vpop.xlane.xlu0 %1236 }
 0x333   : > { %v1269_v10 = vmul.f32 %v1825_v23, %v1213_v55  ;;  %1828 = vrsqrt.f32 %v1255_v56  ;;  %v1248_v17 = vmul.f32 0.0078125, %v1237_v48  ;;  %1306 = vst [vmem:[%s2695_s22] sm:$0xff] %v1298_v0 }
 0x335   : > { %v1284_v15 = vmul.f32 %v2687_v36, %v1269_v10  ;;  %v1256_v52 = vadd.f32 1e-05, %v1248_v17 }
 0x336   : > { %v1239_v20 = vpop.xlane.xlu1 %1238 }
 0x337   : > { %v1299_v62 = vadd.f32 %v1453_v57, %v1284_v15  ;;  %1830 = vrsqrt.f32 %v1256_v52  ;;  %v1249_v31 = vmul.f32 0.0078125, %v1239_v20 }
 0x339   : > { %v1827_v44 = vpop.eup %1826  ;;  %1307 = vst [vmem:[%s2695_s22 + $0x8] sm:$0xff] %v1299_v62  ;;  %v1257_v34 = vadd.f32 1e-05, %v1249_v31 }
 0x33a   : > { %v1270_v11 = vmul.f32 %v1827_v44, %v2659_v27  ;;  %v1241_v39 = vpop.xlane.xlu0 %1240 }
 0x33b   : > { %1832 = vrsqrt.f32 %v1257_v34  ;;  %v1250_v61 = vmul.f32 0.0078125, %v1241_v39 }
 0x33c   : > { %v1285_v47 = vmul.f32 %v2687_v36, %v1270_v11 }
 0x33d   : > { %v1829_v40 = vpop.eup %1828  ;;  %v1258_v25 = vadd.f32 1e-05, %v1250_v61 }
 0x33e   : > { %v1300_v12 = vadd.f32 %v1453_v57, %v1285_v47  ;;  %v1271_v33 = vmul.f32 %v1829_v40, %v2663_v60  ;;  %v1243_v35 = vpop.xlane.xlu1 %1242 }
 0x33f   : > { %1834 = vrsqrt.f32 %v1258_v25  ;;  %v1251_v55 = vmul.f32 0.0078125, %v1243_v35 }
 0x340   : > { %1308 = vst [vmem:[%s2695_s22 + $0x10] sm:$0xff] %v1300_v12  ;;  %v1286_v18 = vmul.f32 %v2687_v36, %v1271_v33 }
 0x341   : > { %v1831_v24 = vpop.eup %1830  ;;  %v1259_v13 = vadd.f32 1e-05, %v1251_v55 }
 0x342   : > { %v1301_v27 = vadd.f32 %v1453_v57, %v1286_v18  ;;  %v1272_v45 = vmul.f32 %v1831_v24, %v2667_v5 }
 0x343   : > { %1836 = vrsqrt.f32 %v1259_v13 }
 0x344   : > { %1309 = vst [vmem:[%s2695_s22 + $0x18] sm:$0xff] %v1301_v27  ;;  %v1287_v54 = vmul.f32 %v2687_v36, %v1272_v45 }
 0x345   : > { %v1833_v14 = vpop.eup %1832 }
 0x346   : > { %v1302_v60 = vadd.f32 %v1453_v57, %v1287_v54  ;;  %v1273_v49 = vmul.f32 %v1833_v14, %v2671_v37 }
 0x348   : > { %1310 = vst [vmem:[%s2695_s22 + $0x20] sm:$0xff] %v1302_v60  ;;  %v1288_v50 = vmul.f32 %v2687_v36, %v1273_v49 }
 0x349   : > { %v1835_v46 = vpop.eup %1834 }
 0x34a   : > { %v1303_v22 = vadd.f32 %v1453_v57, %v1288_v50  ;;  %v1274_v5 = vmul.f32 %v1835_v46, %v2675_v43 }
 0x34c   : > { %1311 = vst [vmem:[%s2695_s22 + $0x28] sm:$0xff] %v1303_v22  ;;  %v1289_v26 = vmul.f32 %v2687_v36, %v1274_v5 }
 0x34d   : > { %v1837_v19 = vpop.eup %1836 }
 0x34e   : > { %v1304_v28 = vadd.f32 %v1453_v57, %v1289_v26  ;;  %v1275_v32 = vmul.f32 %v1837_v19, %v2679_v38 }
 0x350   : > { %1312 = vst [vmem:[%s2695_s22 + $0x30] sm:$0xff] %v1304_v28  ;;  %v1290_v37 = vmul.f32 %v2687_v36, %v1275_v32 }
 0x352   : > { %v1305_v41 = vadd.f32 %v1453_v57, %v1290_v37 }
 0x354   : > { %1313 = vst [vmem:[%s2695_s22 + $0x38] sm:$0xff] %v1305_v41 }
 0x355   : > { %1851 = shalt.err (!%p1848_p5)
}
 0x356   : > { %s1852_s17 = scalar_lea.hbm %s2722_s19, 1024  ;;  %s1856_s22 = scalar_lea.hbm %s2782_s7, 2048 }
 0x357   : > { %p1853_p6 = scmp.ne.s32.totalorder %s2722_s19, %s1852_s17  ;;  %p1857_p10 = scmp.lt.u32.totalorder %s2722_s19, %s2782_s7 }
 0x358   : > { %p1858_p11 = scmp.lt.u32.totalorder %s1856_s22, %s1852_s17  ;;  %p1860_p13 = scmp.lt.u32.totalorder %s1852_s17, %s2722_s19 }
 0x359   : > { %p1854_p7 = pnand %p1853_p6, %p2002_p4 }
 0x35a   : > { %p1859_p12 = por %p1858_p11, %p1857_p10 }
 0x35b   : > { %p1855_p9 = pneg %p1854_p7 }
 0x35c   : > { %p1861_p0 = por %p1860_p13, %p1859_p12 }
 0x35e   : > { %p1862_p1 = pnand %p1861_p0, %p1855_p9 }
 0x360   : > { %1865 = shalt.err (!%p1862_p1)
}
 0x361   : > { %s1920_s12 = smov 128   ;;  %s1921_s27 = smov 8  }
 0x362   : > { %1700 = dma.vmem_to_hbm [thread:$0]  (%p2002_p4), %s2724_s30, 1024, %s2722_s19, %s2729_s15, %s1920_s12, %s1920_s12, %s1921_s27  }
 0x363 PF: > { %p1706_p2 = scmp.ge.s32.totalorder %s1916_s29, 2  ;;  %s1343_s8 = sand.u32 1, %s1896_s24  }
 0x364   : > { %s1344_s16 = scalar_lea.sflag [#allocation4], %s1343_s8 }
 0x365   : > { %p1703_p3 = pnand %p1706_p2, %p2009_p8 }
 0x367   : > { %1891 = dma.done.wait (!%p1703_p3), %s1344_s16, 1024  }
 0x368   : > { %1893 = vsyncadd (!%p1703_p3), %s1344_s16, 4294966272  ;;  %s20_s29 = sadd.s32 1, %s1916_s29   ;;  %s2786_s24 = smov %s1900_s25 }
 0x369   : > { %p17_p5 = scmp.ge.s32.totalorder %s20_s29, 4   ;;  %s2787_s25 = smov %s1904_s26 }
 0x36a   : > { %s2788_s26 = smov %s2015_s14  ;;  %s2789_s27 = smov %s1912_s28 }
 0x36b   : > { %s2790_s28 = smov %s2792_s9  ;;  %19 = sbr.rel (!%p17_p5) target bundleno = 4 (0x4), region = 100 }
 0x372   :  { %1349 = vsyncpa [#allocation4], 1 }
 0x373   :  { %1351 = vsyncpa [#allocation4 + $0x1], 1 }

</bundles_post_ra>
